<compile_context>
chip_gen: v7x
topology: tpu7x:2x2x1
jax: 0.10.0
libtpu: 0.0.40
codegen_flags: <defaults>
</compile_context>

<pallas_src>
import functools

import jax
import jax.numpy as jnp
from jax.experimental import pallas as pl
from jax.experimental.pallas import tpu as pltpu

BN_EPS = 1e-5
LEAKY_SLOPE = 0.1
LANE = 128
VMEM_LIMIT_BYTES = 48 * 1024 * 1024  # > 32 MiB scoped default, < v7x 64 MiB physical


def _round_up(x, m):
    return (x + m - 1) // m * m


# --------------------------------------------------------------------------
# Kernel 1: conv (as shifted-tap matmuls on the MXU) + per-channel partial
#           BN statistics (sum, sum of squares) for this grid step's image.
# --------------------------------------------------------------------------
def _conv_stats_kernel(x_ref, w_ref, y_ref, stats_ref, *, ksize, H, W):
    """
    ksize == 1: x_ref block (1, H*W, Cin)          -- flattened rows
    ksize == 3: x_ref block (1, H+2, W+2, Cin)     -- spatially zero-padded image
    w_ref:      (ksize, ksize, Cin, Cout)  bf16, resident across the grid
    y_ref:      (1, H*W, Cout)             f32 conv output (pre-BN)
    stats_ref:  (1, 2, Cout)               f32 [sum(y), sum(y*y)] over this image
    """
    hw = H * W
    cout = y_ref.shape[-1]
    cin = x_ref.shape[-1]

    acc = jnp.zeros((hw, cout), jnp.float32)
    # Static tap loop (unrolled at trace time): identical MXU work to im2col,
    # but the activation is read from HBM only once (no 9x patch inflation).
    for dy in range(ksize):
        for dx in range(ksize):
            if ksize == 1:
                patch = x_ref[0]                                        # (HW, Cin)
            else:
                patch = x_ref[0, dy:dy + H, dx:dx + W, :].reshape(hw, cin)
            acc = acc + jnp.dot(patch, w_ref[dy, dx],
                                preferred_element_type=jnp.float32)

    y_ref[0] = acc
    s = jnp.sum(acc, axis=0, keepdims=True)          # (1, Cout)
    ss = jnp.sum(acc * acc, axis=0, keepdims=True)   # (1, Cout)
    stats_ref[0] = jnp.concatenate([s, ss], axis=0)  # (2, Cout)


def _conv_stats(conv_in, w, H, W):
    N = conv_in.shape[0]
    ksize, _, cin_p, cout_p = w.shape
    hw = H * W
    kernel = functools.partial(_conv_stats_kernel, ksize=ksize, H=H, W=W)

    if ksize == 1:
        x_spec = pl.BlockSpec((1, hw, cin_p), lambda n: (n, 0, 0))
    else:
        Hp, Wp = conv_in.shape[1], conv_in.shape[2]
        x_spec = pl.BlockSpec((1, Hp, Wp, cin_p), lambda n: (n, 0, 0, 0))

    return pl.pallas_call(
        kernel,
        grid=(N,),
        in_specs=[
            x_spec,
            # weight resident across the whole grid
            pl.BlockSpec((ksize, ksize, cin_p, cout_p), lambda n: (0, 0, 0, 0)),
        ],
        out_specs=(
            pl.BlockSpec((1, hw, cout_p), lambda n: (n, 0, 0)),
            pl.BlockSpec((1, 2, cout_p), lambda n: (n, 0, 0)),
        ),
        out_shape=(
            jax.ShapeDtypeStruct((N, hw, cout_p), jnp.float32),
            jax.ShapeDtypeStruct((N, 2, cout_p), jnp.float32),
        ),
        compiler_params=pltpu.CompilerParams(
            dimension_semantics=("parallel",),
            vmem_limit_bytes=VMEM_LIMIT_BYTES,
        ),
    )(conv_in, w)


# --------------------------------------------------------------------------
# Kernel 2: folded BatchNorm (one FMA per element) + LeakyReLU(0.1).
# --------------------------------------------------------------------------
def _bn_act_kernel(y_ref, scale_ref, shift_ref, o_ref):
    z = y_ref[0] * scale_ref[...] + shift_ref[...]     # (HW, C) * (1, C) + (1, C)
    o_ref[0] = jnp.where(z > 0, z, LEAKY_SLOPE * z).astype(o_ref.dtype)


def _bn_act(y, scale, shift):
    N, hw, cp = y.shape
    return pl.pallas_call(
        _bn_act_kernel,
        grid=(N,),
        in_specs=[
            pl.BlockSpec((1, hw, cp), lambda n: (n, 0, 0)),
            pl.BlockSpec((1, cp), lambda n: (0, 0)),
            pl.BlockSpec((1, cp), lambda n: (0, 0)),
        ],
        out_specs=pl.BlockSpec((1, hw, cp), lambda n: (n, 0, 0)),
        out_shape=jax.ShapeDtypeStruct((N, hw, cp), jnp.bfloat16),
        compiler_params=pltpu.CompilerParams(
            dimension_semantics=("parallel",),
            vmem_limit_bytes=VMEM_LIMIT_BYTES,
        ),
    )(y, scale, shift)


# --------------------------------------------------------------------------
# Parameters
# --------------------------------------------------------------------------
def init_convset_params(in_channel, first_filter, key):
    """Deterministic synthetic parameters in PyTorch layout (OIHW conv weights)."""
    layer_defs = [
        (in_channel, first_filter, 1),
        (first_filter, first_filter * 2, 3),
        (first_filter * 2, first_filter, 1),
        (first_filter, first_filter * 2, 3),
        (first_filter * 2, first_filter, 1),
    ]
    params = []
    for i, (cin, cout, k) in enumerate(layer_defs):
        kw, kg, kb = jax.random.split(jax.random.fold_in(key, i), 3)
        w = jax.random.normal(kw, (cout, cin, k, k), jnp.float32) * 0.1
        gamma = 1.0 + 0.1 * jax.random.normal(kg, (cout,), jnp.float32)
        beta = 0.05 * jax.random.normal(kb, (cout,), jnp.float32)
        params.append({"w": w, "gamma": gamma, "beta": beta})
    return params


def prepare_convset_params(raw_params):
    """PyTorch layout -> kernel layout: (k,k,Cin_p,Cout_p) bf16 weights with
    channel dims zero-padded to multiples of 128 (lane-dense MXU / stores),
    gamma/beta zero-padded (padded channels provably stay exactly zero)."""
    prepared = []
    for p in raw_params:
        w = p["w"]
        cout, cin, k, _ = w.shape
        cin_p, cout_p = _round_up(cin, LANE), _round_up(cout, LANE)
        w_kkio = jnp.transpose(w, (2, 3, 1, 0))                    # (k, k, Cin, Cout)
        w_kkio = jnp.pad(w_kkio,
                         ((0, 0), (0, 0), (0, cin_p - cin), (0, cout_p - cout)))
        gamma = jnp.pad(p["gamma"], (0, cout_p - cout)).reshape(1, cout_p)
        beta = jnp.pad(p["beta"], (0, cout_p - cout)).reshape(1, cout_p)
        prepared.append({
            "w": w_kkio.astype(jnp.bfloat16),
            "gamma": gamma.astype(jnp.float32),
            "beta": beta.astype(jnp.float32),
        })
    return tuple(prepared)


# --------------------------------------------------------------------------
# Forward
# --------------------------------------------------------------------------
@functools.partial(jax.jit, static_argnames=("out_channels",))
def convset_forward(x_nchw, params, *, out_channels):
    """Forward pass of convSet. Input/output are NCHW (PyTorch convention)."""
    N, C, H, W = x_nchw.shape
    hw = H * W
    cin_p0 = params[0]["w"].shape[2]

    x = jnp.transpose(x_nchw, (0, 2, 3, 1)).astype(jnp.bfloat16)        # NHWC, bf16
    x = jnp.pad(x, ((0, 0), (0, 0), (0, 0), (0, cin_p0 - C)))
    act = x.reshape(N, hw, cin_p0)                                      # flattened rows

    inv_count = 1.0 / float(N * hw)
    for p in params:
        ksize = p["w"].shape[0]          # static (from array shape) -> no tracer bool
        if ksize == 1:
            conv_in = act
        else:
            pad = (ksize - 1) // 2
            conv_in = jnp.pad(act.reshape(N, H, W, -1),
                              ((0, 0), (pad, pad), (pad, pad), (0, 0)))

        # Pass 1: conv + per-image partial sums (Pallas).
        y, stats = _conv_stats(conv_in, p["w"], H, W)                   # f32

        # Tiny cross-batch reduction + folded BN coefficients in f32.
        # (single-pass E[y^2]-mean^2; clamp guards fp cancellation)
        tot = jnp.sum(stats, axis=0)                                    # (2, Cout_p)
        mean = tot[0:1] * inv_count
        var = jnp.maximum(tot[1:2] * inv_count - mean * mean, 0.0)
        scale = p["gamma"] * jax.lax.rsqrt(var + BN_EPS)
        shift = p["beta"] - mean * scale

        # Pass 2: normalize + LeakyReLU (Pallas), bf16 output for the next matmul.
        act = _bn_act(y, scale, shift)                                  # (N, HW, Cout_p)

    out = act.reshape(N, H, W, -1)[..., :out_channels]
    return jnp.transpose(out, (0, 3, 1, 2)).astype(jnp.float32)         # NHWC -> NCHW


if __name__ == "__main__":
    key = jax.random.PRNGKey(0)
    k_x, k_p = jax.random.split(key)

    batch, in_channel, spatial, first_filter = 2, 4, 16, 8
    x = jax.random.normal(k_x, (batch, in_channel, spatial, spatial), jnp.float32)

    raw_params = init_convset_params(in_channel, first_filter, k_p)
    params = prepare_convset_params(raw_params)

    out = convset_forward(x, params, out_channels=first_filter)
    jax.block_until_ready(out)

    assert out.shape == (batch, first_filter, spatial, spatial), out.shape
    assert bool(jnp.all(jnp.isfinite(out)))
    print("KERNEL_OK")
</pallas_src>

<mosaic_0001>
module attributes {stable_mosaic.version = 11 : i64} {
  func.func @_conv_stats_kernel(%arg0: i32, %arg1: memref<1x256x128xbf16, #tpu.memory_space<vmem>>, %arg2: memref<1x1x128x128xbf16, #tpu.memory_space<vmem>>, %arg3: memref<1x256x128xf32, #tpu.memory_space<vmem>>, %arg4: memref<1x2x128xf32, #tpu.memory_space<vmem>>) attributes {dimension_semantics = [#tpu.dimension_semantics<parallel>], iteration_bounds = array<i64: 2>, scalar_prefetch = 0 : i64, scratch_operands = 0 : i64, tpu.core_type = #tpu.core_type<tc>, window_params = [{transform_indices = @transform_0, window_bounds = array<i64: 1, 256, 128>}, {pipeline_mode = #tpu.pipeline_mode<synchronous>, transform_indices = @transform_1, window_bounds = array<i64: 1, 1, 128, 128>}, {transform_indices = @transform_2, window_bounds = array<i64: 1, 256, 128>}, {transform_indices = @transform_3, window_bounds = array<i64: 1, 2, 128>}]} {
    %cst = arith.constant 0.000000e+00 : f32
    %0 = vector.broadcast %cst : f32 to vector<256x128xf32>
    %c0 = arith.constant 0 : index
    %c0_0 = arith.constant 0 : index
    %c0_1 = arith.constant 0 : index
    %1 = vector.load %arg1[%c0, %c0_0, %c0_1] : memref<1x256x128xbf16, #tpu.memory_space<vmem>>, vector<1x256x128xbf16>
    %2 = vector.shape_cast %1 : vector<1x256x128xbf16> to vector<256x128xbf16>
    %c0_2 = arith.constant 0 : index
    %c0_3 = arith.constant 0 : index
    %c0_4 = arith.constant 0 : index
    %c0_5 = arith.constant 0 : index
    %3 = vector.load %arg2[%c0_2, %c0_3, %c0_4, %c0_5] : memref<1x1x128x128xbf16, #tpu.memory_space<vmem>>, vector<1x1x128x128xbf16>
    %4 = vector.shape_cast %3 : vector<1x1x128x128xbf16> to vector<128x128xbf16>
    %cst_6 = arith.constant dense<0.000000e+00> : vector<256x128xf32>
    %5 = tpu.matmul %2, %4, %cst_6 {dimension_numbers = #tpu.dot_dimension_numbers<[1], [0], [0], [1], [0, 0, 1, 1], [], []>} : vector<256x128xbf16>, vector<128x128xbf16>, vector<256x128xf32> -> vector<256x128xf32>
    %6 = arith.addf %0, %5 : vector<256x128xf32>
    %c0_7 = arith.constant 0 : index
    %c0_8 = arith.constant 0 : index
    %c0_9 = arith.constant 0 : index
    %7 = vector.load %arg3[%c0_7, %c0_8, %c0_9] : memref<1x256x128xf32, #tpu.memory_space<vmem>>, vector<1x256x128xf32>
    %8 = vector.shape_cast %7 : vector<1x256x128xf32> to vector<256x128xf32>
    %9 = vector.shape_cast %6 : vector<256x128xf32> to vector<1x256x128xf32>
    tpu.vector_store %arg3[%c0_7, %c0_8, %c0_9], %9 {strides = array<i32>} : memref<1x256x128xf32, #tpu.memory_space<vmem>>, vector<1x256x128xf32>,
    %cst_10 = arith.constant dense<0.000000e+00> : vector<128xf32>
    %10 = vector.multi_reduction <add>, %6, %cst_10 [0] : vector<256x128xf32> to vector<128xf32>
    %11 = vector.shape_cast %10 : vector<128xf32> to vector<1x128xf32>
    %12 = arith.mulf %6, %6 : vector<256x128xf32>
    %cst_11 = arith.constant dense<0.000000e+00> : vector<128xf32>
    %13 = vector.multi_reduction <add>, %12, %cst_11 [0] : vector<256x128xf32> to vector<128xf32>
    %14 = vector.shape_cast %13 : vector<128xf32> to vector<1x128xf32>
    %15 = tpu.concatenate %11, %14 in 0 : vector<1x128xf32>, vector<1x128xf32> -> vector<2x128xf32>
    %c0_12 = arith.constant 0 : index
    %c0_13 = arith.constant 0 : index
    %c0_14 = arith.constant 0 : index
    %16 = vector.load %arg4[%c0_12, %c0_13, %c0_14] : memref<1x2x128xf32, #tpu.memory_space<vmem>>, vector<1x2x128xf32>
    %17 = vector.shape_cast %16 : vector<1x2x128xf32> to vector<2x128xf32>
    %18 = vector.shape_cast %15 : vector<2x128xf32> to vector<1x2x128xf32>
    tpu.vector_store %arg4[%c0_12, %c0_13, %c0_14], %18 {strides = array<i32>} : memref<1x2x128xf32, #tpu.memory_space<vmem>>, vector<1x2x128xf32>,
    return
  }
  func.func @transform_0(%arg0: i32) -> (i32, i32, i32) {
    %c0_i32 = arith.constant 0 : i32
    %c0_i32_0 = arith.constant 0 : i32
    %c0_i32_1 = arith.constant 0 : i32
    return %arg0, %c0_i32, %c0_i32_0 : i32, i32, i32
  }
  func.func @transform_1(%arg0: i32) -> (i32, i32, i32, i32) {
    %c0_i32 = arith.constant 0 : i32
    %c0_i32_0 = arith.constant 0 : i32
    %c0_i32_1 = arith.constant 0 : i32
    %c0_i32_2 = arith.constant 0 : i32
    %c0_i32_3 = arith.constant 0 : i32
    return %c0_i32, %c0_i32_0, %c0_i32_1, %c0_i32_2 : i32, i32, i32, i32
  }
  func.func @transform_2(%arg0: i32) -> (i32, i32, i32) {
    %c0_i32 = arith.constant 0 : i32
    %c0_i32_0 = arith.constant 0 : i32
    %c0_i32_1 = arith.constant 0 : i32
    return %arg0, %c0_i32, %c0_i32_0 : i32, i32, i32
  }
  func.func @transform_3(%arg0: i32) -> (i32, i32, i32) {
    %c0_i32 = arith.constant 0 : i32
    %c0_i32_0 = arith.constant 0 : i32
    %c0_i32_1 = arith.constant 0 : i32
    return %arg0, %c0_i32, %c0_i32_0 : i32, i32, i32
  }
}

module attributes {stable_mosaic.version = 11 : i64} {
  func.func @_bn_act_kernel(%arg0: i32, %arg1: memref<1x256x128xf32, #tpu.memory_space<vmem>>, %arg2: memref<1x128xf32, #tpu.memory_space<vmem>>, %arg3: memref<1x128xf32, #tpu.memory_space<vmem>>, %arg4: memref<1x256x128xbf16, #tpu.memory_space<vmem>>) attributes {dimension_semantics = [#tpu.dimension_semantics<parallel>], iteration_bounds = array<i64: 2>, scalar_prefetch = 0 : i64, scratch_operands = 0 : i64, tpu.core_type = #tpu.core_type<tc>, window_params = [{transform_indices = @transform_0, window_bounds = array<i64: 1, 256, 128>}, {pipeline_mode = #tpu.pipeline_mode<synchronous>, transform_indices = @transform_1, window_bounds = array<i64: 1, 128>}, {pipeline_mode = #tpu.pipeline_mode<synchronous>, transform_indices = @transform_2, window_bounds = array<i64: 1, 128>}, {transform_indices = @transform_3, window_bounds = array<i64: 1, 256, 128>}]} {
    %c0 = arith.constant 0 : index
    %c0_0 = arith.constant 0 : index
    %c0_1 = arith.constant 0 : index
    %0 = vector.load %arg1[%c0, %c0_0, %c0_1] : memref<1x256x128xf32, #tpu.memory_space<vmem>>, vector<1x256x128xf32>
    %1 = vector.shape_cast %0 : vector<1x256x128xf32> to vector<256x128xf32>
    %c0_2 = arith.constant 0 : index
    %c0_3 = arith.constant 0 : index
    %2 = vector.load %arg2[%c0_2, %c0_3] : memref<1x128xf32, #tpu.memory_space<vmem>>, vector<1x128xf32>
    %3 = vector.broadcast %2 : vector<1x128xf32> to vector<256x128xf32>
    %4 = arith.mulf %1, %3 : vector<256x128xf32>
    %c0_4 = arith.constant 0 : index
    %c0_5 = arith.constant 0 : index
    %5 = vector.load %arg3[%c0_4, %c0_5] : memref<1x128xf32, #tpu.memory_space<vmem>>, vector<1x128xf32>
    %6 = vector.broadcast %5 : vector<1x128xf32> to vector<256x128xf32>
    %7 = arith.addf %4, %6 : vector<256x128xf32>
    %cst = arith.constant 0.000000e+00 : f32
    %8 = vector.broadcast %cst : f32 to vector<256x128xf32>
    %9 = arith.cmpf ogt, %7, %8 : vector<256x128xf32>
    %cst_6 = arith.constant 1.000000e-01 : f32
    %10 = vector.broadcast %cst_6 : f32 to vector<256x128xf32>
    %11 = arith.mulf %10, %7 : vector<256x128xf32>
    %12 = arith.select %9, %7, %11 : vector<256x128xi1>, vector<256x128xf32>
    %13 = arith.truncf %12 : vector<256x128xf32> to vector<256x128xbf16>
    %c0_7 = arith.constant 0 : index
    %c0_8 = arith.constant 0 : index
    %c0_9 = arith.constant 0 : index
    %14 = vector.load %arg4[%c0_7, %c0_8, %c0_9] : memref<1x256x128xbf16, #tpu.memory_space<vmem>>, vector<1x256x128xbf16>
    %15 = vector.shape_cast %14 : vector<1x256x128xbf16> to vector<256x128xbf16>
    %16 = vector.shape_cast %13 : vector<256x128xbf16> to vector<1x256x128xbf16>
    tpu.vector_store %arg4[%c0_7, %c0_8, %c0_9], %16 {strides = array<i32>} : memref<1x256x128xbf16, #tpu.memory_space<vmem>>, vector<1x256x128xbf16>,
    return
  }
  func.func @transform_0(%arg0: i32) -> (i32, i32, i32) {
    %c0_i32 = arith.constant 0 : i32
    %c0_i32_0 = arith.constant 0 : i32
    %c0_i32_1 = arith.constant 0 : i32
    return %arg0, %c0_i32, %c0_i32_0 : i32, i32, i32
  }
  func.func @transform_1(%arg0: i32) -> (i32, i32) {
    %c0_i32 = arith.constant 0 : i32
    %c0_i32_0 = arith.constant 0 : i32
    %c0_i32_1 = arith.constant 0 : i32
    return %c0_i32, %c0_i32_0 : i32, i32
  }
  func.func @transform_2(%arg0: i32) -> (i32, i32) {
    %c0_i32 = arith.constant 0 : i32
    %c0_i32_0 = arith.constant 0 : i32
    %c0_i32_1 = arith.constant 0 : i32
    return %c0_i32, %c0_i32_0 : i32, i32
  }
  func.func @transform_3(%arg0: i32) -> (i32, i32, i32) {
    %c0_i32 = arith.constant 0 : i32
    %c0_i32_0 = arith.constant 0 : i32
    %c0_i32_1 = arith.constant 0 : i32
    return %arg0, %c0_i32, %c0_i32_0 : i32, i32, i32
  }
}

module attributes {stable_mosaic.version = 11 : i64} {
  func.func @_conv_stats_kernel(%arg0: i32, %arg1: memref<1x18x18x128xbf16, #tpu.memory_space<vmem>>, %arg2: memref<3x3x128x128xbf16, #tpu.memory_space<vmem>>, %arg3: memref<1x256x128xf32, #tpu.memory_space<vmem>>, %arg4: memref<1x2x128xf32, #tpu.memory_space<vmem>>) attributes {dimension_semantics = [#tpu.dimension_semantics<parallel>], iteration_bounds = array<i64: 2>, scalar_prefetch = 0 : i64, scratch_operands = 0 : i64, tpu.core_type = #tpu.core_type<tc>, window_params = [{transform_indices = @transform_0, window_bounds = array<i64: 1, 18, 18, 128>}, {pipeline_mode = #tpu.pipeline_mode<synchronous>, transform_indices = @transform_1, window_bounds = array<i64: 3, 3, 128, 128>}, {transform_indices = @transform_2, window_bounds = array<i64: 1, 256, 128>}, {transform_indices = @transform_3, window_bounds = array<i64: 1, 2, 128>}]} {
    %cst = arith.constant 0.000000e+00 : f32
    %0 = vector.broadcast %cst : f32 to vector<256x128xf32>
    %c0 = arith.constant 0 : index
    %c0_0 = arith.constant 0 : index
    %c0_1 = arith.constant 0 : index
    %c0_2 = arith.constant 0 : index
    %1 = vector.load %arg1[%c0, %c0_0, %c0_1, %c0_2] : memref<1x18x18x128xbf16, #tpu.memory_space<vmem>>, vector<1x16x16x128xbf16>
    %2 = vector.shape_cast %1 : vector<1x16x16x128xbf16> to vector<16x16x128xbf16>
    %3 = vector.shape_cast %2 : vector<16x16x128xbf16> to vector<256x128xbf16>
    %c0_3 = arith.constant 0 : index
    %c0_4 = arith.constant 0 : index
    %c0_5 = arith.constant 0 : index
    %c0_6 = arith.constant 0 : index
    %4 = vector.load %arg2[%c0_3, %c0_4, %c0_5, %c0_6] : memref<3x3x128x128xbf16, #tpu.memory_space<vmem>>, vector<1x1x128x128xbf16>
    %5 = vector.shape_cast %4 : vector<1x1x128x128xbf16> to vector<128x128xbf16>
    %cst_7 = arith.constant dense<0.000000e+00> : vector<256x128xf32>
    %6 = tpu.matmul %3, %5, %cst_7 {dimension_numbers = #tpu.dot_dimension_numbers<[1], [0], [0], [1], [0, 0, 1, 1], [], []>} : vector<256x128xbf16>, vector<128x128xbf16>, vector<256x128xf32> -> vector<256x128xf32>
    %7 = arith.addf %0, %6 : vector<256x128xf32>
    %c0_8 = arith.constant 0 : index
    %c0_9 = arith.constant 0 : index
    %c1 = arith.constant 1 : index
    %c0_10 = arith.constant 0 : index
    %8 = vector.load %arg1[%c0_8, %c0_9, %c1, %c0_10] : memref<1x18x18x128xbf16, #tpu.memory_space<vmem>>, vector<1x16x16x128xbf16>
    %9 = vector.shape_cast %8 : vector<1x16x16x128xbf16> to vector<16x16x128xbf16>
    %10 = vector.shape_cast %9 : vector<16x16x128xbf16> to vector<256x128xbf16>
    %c0_11 = arith.constant 0 : index
    %c1_12 = arith.constant 1 : index
    %c0_13 = arith.constant 0 : index
    %c0_14 = arith.constant 0 : index
    %11 = vector.load %arg2[%c0_11, %c1_12, %c0_13, %c0_14] : memref<3x3x128x128xbf16, #tpu.memory_space<vmem>>, vector<1x1x128x128xbf16>
    %12 = vector.shape_cast %11 : vector<1x1x128x128xbf16> to vector<128x128xbf16>
    %cst_15 = arith.constant dense<0.000000e+00> : vector<256x128xf32>
    %13 = tpu.matmul %10, %12, %cst_15 {dimension_numbers = #tpu.dot_dimension_numbers<[1], [0], [0], [1], [0, 0, 1, 1], [], []>} : vector<256x128xbf16>, vector<128x128xbf16>, vector<256x128xf32> -> vector<256x128xf32>
    %14 = arith.addf %7, %13 : vector<256x128xf32>
    %c0_16 = arith.constant 0 : index
    %c0_17 = arith.constant 0 : index
    %c2 = arith.constant 2 : index
    %c0_18 = arith.constant 0 : index
    %15 = vector.load %arg1[%c0_16, %c0_17, %c2, %c0_18] : memref<1x18x18x128xbf16, #tpu.memory_space<vmem>>, vector<1x16x16x128xbf16>
    %16 = vector.shape_cast %15 : vector<1x16x16x128xbf16> to vector<16x16x128xbf16>
    %17 = vector.shape_cast %16 : vector<16x16x128xbf16> to vector<256x128xbf16>
    %c0_19 = arith.constant 0 : index
    %c2_20 = arith.constant 2 : index
    %c0_21 = arith.constant 0 : index
    %c0_22 = arith.constant 0 : index
    %18 = vector.load %arg2[%c0_19, %c2_20, %c0_21, %c0_22] : memref<3x3x128x128xbf16, #tpu.memory_space<vmem>>, vector<1x1x128x128xbf16>
    %19 = vector.shape_cast %18 : vector<1x1x128x128xbf16> to vector<128x128xbf16>
    %cst_23 = arith.constant dense<0.000000e+00> : vector<256x128xf32>
    %20 = tpu.matmul %17, %19, %cst_23 {dimension_numbers = #tpu.dot_dimension_numbers<[1], [0], [0], [1], [0, 0, 1, 1], [], []>} : vector<256x128xbf16>, vector<128x128xbf16>, vector<256x128xf32> -> vector<256x128xf32>
    %21 = arith.addf %14, %20 : vector<256x128xf32>
    %c0_24 = arith.constant 0 : index
    %c1_25 = arith.constant 1 : index
    %c0_26 = arith.constant 0 : index
    %c0_27 = arith.constant 0 : index
    %22 = vector.load %arg1[%c0_24, %c1_25, %c0_26, %c0_27] : memref<1x18x18x128xbf16, #tpu.memory_space<vmem>>, vector<1x16x16x128xbf16>
    %23 = vector.shape_cast %22 : vector<1x16x16x128xbf16> to vector<16x16x128xbf16>
    %24 = vector.shape_cast %23 : vector<16x16x128xbf16> to vector<256x128xbf16>
    %c1_28 = arith.constant 1 : index
    %c0_29 = arith.constant 0 : index
    %c0_30 = arith.constant 0 : index
    %c0_31 = arith.constant 0 : index
    %25 = vector.load %arg2[%c1_28, %c0_29, %c0_30, %c0_31] : memref<3x3x128x128xbf16, #tpu.memory_space<vmem>>, vector<1x1x128x128xbf16>
    %26 = vector.shape_cast %25 : vector<1x1x128x128xbf16> to vector<128x128xbf16>
    %cst_32 = arith.constant dense<0.000000e+00> : vector<256x128xf32>
    %27 = tpu.matmul %24, %26, %cst_32 {dimension_numbers = #tpu.dot_dimension_numbers<[1], [0], [0], [1], [0, 0, 1, 1], [], []>} : vector<256x128xbf16>, vector<128x128xbf16>, vector<256x128xf32> -> vector<256x128xf32>
    %28 = arith.addf %21, %27 : vector<256x128xf32>
    %c0_33 = arith.constant 0 : index
    %c1_34 = arith.constant 1 : index
    %c1_35 = arith.constant 1 : index
    %c0_36 = arith.constant 0 : index
    %29 = vector.load %arg1[%c0_33, %c1_34, %c1_35, %c0_36] : memref<1x18x18x128xbf16, #tpu.memory_space<vmem>>, vector<1x16x16x128xbf16>
    %30 = vector.shape_cast %29 : vector<1x16x16x128xbf16> to vector<16x16x128xbf16>
    %31 = vector.shape_cast %30 : vector<16x16x128xbf16> to vector<256x128xbf16>
    %c1_37 = arith.constant 1 : index
    %c1_38 = arith.constant 1 : index
    %c0_39 = arith.constant 0 : index
    %c0_40 = arith.constant 0 : index
    %32 = vector.load %arg2[%c1_37, %c1_38, %c0_39, %c0_40] : memref<3x3x128x128xbf16, #tpu.memory_space<vmem>>, vector<1x1x128x128xbf16>
    %33 = vector.shape_cast %32 : vector<1x1x128x128xbf16> to vector<128x128xbf16>
    %cst_41 = arith.constant dense<0.000000e+00> : vector<256x128xf32>
    %34 = tpu.matmul %31, %33, %cst_41 {dimension_numbers = #tpu.dot_dimension_numbers<[1], [0], [0], [1], [0, 0, 1, 1], [], []>} : vector<256x128xbf16>, vector<128x128xbf16>, vector<256x128xf32> -> vector<256x128xf32>
    %35 = arith.addf %28, %34 : vector<256x128xf32>
    %c0_42 = arith.constant 0 : index
    %c1_43 = arith.constant 1 : index
    %c2_44 = arith.constant 2 : index
    %c0_45 = arith.constant 0 : index
    %36 = vector.load %arg1[%c0_42, %c1_43, %c2_44, %c0_45] : memref<1x18x18x128xbf16, #tpu.memory_space<vmem>>, vector<1x16x16x128xbf16>
    %37 = vector.shape_cast %36 : vector<1x16x16x128xbf16> to vector<16x16x128xbf16>
    %38 = vector.shape_cast %37 : vector<16x16x128xbf16> to vector<256x128xbf16>
    %c1_46 = arith.constant 1 : index
    %c2_47 = arith.constant 2 : index
    %c0_48 = arith.constant 0 : index
    %c0_49 = arith.constant 0 : index
    %39 = vector.load %arg2[%c1_46, %c2_47, %c0_48, %c0_49] : memref<3x3x128x128xbf16, #tpu.memory_space<vmem>>, vector<1x1x128x128xbf16>
    %40 = vector.shape_cast %39 : vector<1x1x128x128xbf16> to vector<128x128xbf16>
    %cst_50 = arith.constant dense<0.000000e+00> : vector<256x128xf32>
    %41 = tpu.matmul %38, %40, %cst_50 {dimension_numbers = #tpu.dot_dimension_numbers<[1], [0], [0], [1], [0, 0, 1, 1], [], []>} : vector<256x128xbf16>, vector<128x128xbf16>, vector<256x128xf32> -> vector<256x128xf32>
    %42 = arith.addf %35, %41 : vector<256x128xf32>
    %c0_51 = arith.constant 0 : index
    %c2_52 = arith.constant 2 : index
    %c0_53 = arith.constant 0 : index
    %c0_54 = arith.constant 0 : index
    %43 = vector.load %arg1[%c0_51, %c2_52, %c0_53, %c0_54] : memref<1x18x18x128xbf16, #tpu.memory_space<vmem>>, vector<1x16x16x128xbf16>
    %44 = vector.shape_cast %43 : vector<1x16x16x128xbf16> to vector<16x16x128xbf16>
    %45 = vector.shape_cast %44 : vector<16x16x128xbf16> to vector<256x128xbf16>
    %c2_55 = arith.constant 2 : index
    %c0_56 = arith.constant 0 : index
    %c0_57 = arith.constant 0 : index
    %c0_58 = arith.constant 0 : index
    %46 = vector.load %arg2[%c2_55, %c0_56, %c0_57, %c0_58] : memref<3x3x128x128xbf16, #tpu.memory_space<vmem>>, vector<1x1x128x128xbf16>
    %47 = vector.shape_cast %46 : vector<1x1x128x128xbf16> to vector<128x128xbf16>
    %cst_59 = arith.constant dense<0.000000e+00> : vector<256x128xf32>
    %48 = tpu.matmul %45, %47, %cst_59 {dimension_numbers = #tpu.dot_dimension_numbers<[1], [0], [0], [1], [0, 0, 1, 1], [], []>} : vector<256x128xbf16>, vector<128x128xbf16>, vector<256x128xf32> -> vector<256x128xf32>
    %49 = arith.addf %42, %48 : vector<256x128xf32>
    %c0_60 = arith.constant 0 : index
    %c2_61 = arith.constant 2 : index
    %c1_62 = arith.constant 1 : index
    %c0_63 = arith.constant 0 : index
    %50 = vector.load %arg1[%c0_60, %c2_61, %c1_62, %c0_63] : memref<1x18x18x128xbf16, #tpu.memory_space<vmem>>, vector<1x16x16x128xbf16>
    %51 = vector.shape_cast %50 : vector<1x16x16x128xbf16> to vector<16x16x128xbf16>
    %52 = vector.shape_cast %51 : vector<16x16x128xbf16> to vector<256x128xbf16>
    %c2_64 = arith.constant 2 : index
    %c1_65 = arith.constant 1 : index
    %c0_66 = arith.constant 0 : index
    %c0_67 = arith.constant 0 : index
    %53 = vector.load %arg2[%c2_64, %c1_65, %c0_66, %c0_67] : memref<3x3x128x128xbf16, #tpu.memory_space<vmem>>, vector<1x1x128x128xbf16>
    %54 = vector.shape_cast %53 : vector<1x1x128x128xbf16> to vector<128x128xbf16>
    %cst_68 = arith.constant dense<0.000000e+00> : vector<256x128xf32>
    %55 = tpu.matmul %52, %54, %cst_68 {dimension_numbers = #tpu.dot_dimension_numbers<[1], [0], [0], [1], [0, 0, 1, 1], [], []>} : vector<256x128xbf16>, vector<128x128xbf16>, vector<256x128xf32> -> vector<256x128xf32>
    %56 = arith.addf %49, %55 : vector<256x128xf32>
    %c0_69 = arith.constant 0 : index
    %c2_70 = arith.constant 2 : index
    %c2_71 = arith.constant 2 : index
    %c0_72 = arith.constant 0 : index
    %57 = vector.load %arg1[%c0_69, %c2_70, %c2_71, %c0_72] : memref<1x18x18x128xbf16, #tpu.memory_space<vmem>>, vector<1x16x16x128xbf16>
    %58 = vector.shape_cast %57 : vector<1x16x16x128xbf16> to vector<16x16x128xbf16>
    %59 = vector.shape_cast %58 : vector<16x16x128xbf16> to vector<256x128xbf16>
    %c2_73 = arith.constant 2 : index
    %c2_74 = arith.constant 2 : index
    %c0_75 = arith.constant 0 : index
    %c0_76 = arith.constant 0 : index
    %60 = vector.load %arg2[%c2_73, %c2_74, %c0_75, %c0_76] : memref<3x3x128x128xbf16, #tpu.memory_space<vmem>>, vector<1x1x128x128xbf16>
    %61 = vector.shape_cast %60 : vector<1x1x128x128xbf16> to vector<128x128xbf16>
    %cst_77 = arith.constant dense<0.000000e+00> : vector<256x128xf32>
    %62 = tpu.matmul %59, %61, %cst_77 {dimension_numbers = #tpu.dot_dimension_numbers<[1], [0], [0], [1], [0, 0, 1, 1], [], []>} : vector<256x128xbf16>, vector<128x128xbf16>, vector<256x128xf32> -> vector<256x128xf32>
    %63 = arith.addf %56, %62 : vector<256x128xf32>
    %c0_78 = arith.constant 0 : index
    %c0_79 = arith.constant 0 : index
    %c0_80 = arith.constant 0 : index
    %64 = vector.load %arg3[%c0_78, %c0_79, %c0_80] : memref<1x256x128xf32, #tpu.memory_space<vmem>>, vector<1x256x128xf32>
    %65 = vector.shape_cast %64 : vector<1x256x128xf32> to vector<256x128xf32>
    %66 = vector.shape_cast %63 : vector<256x128xf32> to vector<1x256x128xf32>
    tpu.vector_store %arg3[%c0_78, %c0_79, %c0_80], %66 {strides = array<i32>} : memref<1x256x128xf32, #tpu.memory_space<vmem>>, vector<1x256x128xf32>,
    %cst_81 = arith.constant dense<0.000000e+00> : vector<128xf32>
    %67 = vector.multi_reduction <add>, %63, %cst_81 [0] : vector<256x128xf32> to vector<128xf32>
    %68 = vector.shape_cast %67 : vector<128xf32> to vector<1x128xf32>
    %69 = arith.mulf %63, %63 : vector<256x128xf32>
    %cst_82 = arith.constant dense<0.000000e+00> : vector<128xf32>
    %70 = vector.multi_reduction <add>, %69, %cst_82 [0] : vector<256x128xf32> to vector<128xf32>
    %71 = vector.shape_cast %70 : vector<128xf32> to vector<1x128xf32>
    %72 = tpu.concatenate %68, %71 in 0 : vector<1x128xf32>, vector<1x128xf32> -> vector<2x128xf32>
    %c0_83 = arith.constant 0 : index
    %c0_84 = arith.constant 0 : index
    %c0_85 = arith.constant 0 : index
    %73 = vector.load %arg4[%c0_83, %c0_84, %c0_85] : memref<1x2x128xf32, #tpu.memory_space<vmem>>, vector<1x2x128xf32>
    %74 = vector.shape_cast %73 : vector<1x2x128xf32> to vector<2x128xf32>
    %75 = vector.shape_cast %72 : vector<2x128xf32> to vector<1x2x128xf32>
    tpu.vector_store %arg4[%c0_83, %c0_84, %c0_85], %75 {strides = array<i32>} : memref<1x2x128xf32, #tpu.memory_space<vmem>>, vector<1x2x128xf32>,
    return
  }
  func.func @transform_0(%arg0: i32) -> (i32, i32, i32, i32) {
    %c0_i32 = arith.constant 0 : i32
    %c0_i32_0 = arith.constant 0 : i32
    %c0_i32_1 = arith.constant 0 : i32
    %c0_i32_2 = arith.constant 0 : i32
    return %arg0, %c0_i32, %c0_i32_0, %c0_i32_1 : i32, i32, i32, i32
  }
  func.func @transform_1(%arg0: i32) -> (i32, i32, i32, i32) {
    %c0_i32 = arith.constant 0 : i32
    %c0_i32_0 = arith.constant 0 : i32
    %c0_i32_1 = arith.constant 0 : i32
    %c0_i32_2 = arith.constant 0 : i32
    %c0_i32_3 = arith.constant 0 : i32
    return %c0_i32, %c0_i32_0, %c0_i32_1, %c0_i32_2 : i32, i32, i32, i32
  }
  func.func @transform_2(%arg0: i32) -> (i32, i32, i32) {
    %c0_i32 = arith.constant 0 : i32
    %c0_i32_0 = arith.constant 0 : i32
    %c0_i32_1 = arith.constant 0 : i32
    return %arg0, %c0_i32, %c0_i32_0 : i32, i32, i32
  }
  func.func @transform_3(%arg0: i32) -> (i32, i32, i32) {
    %c0_i32 = arith.constant 0 : i32
    %c0_i32_0 = arith.constant 0 : i32
    %c0_i32_1 = arith.constant 0 : i32
    return %arg0, %c0_i32, %c0_i32_0 : i32, i32, i32
  }
}

</mosaic_0001>

<bundles_post_ra>
// kernel: convset_forward.10
= control target key start
LH: loop header
LB: loop body
LE: loop exit
PB: predicated region body
PF: predicated region fallthrough
CT: control target
= control target key end

     0   :  { %s949_s12 = smov 0   ;;  %s1128_s0 = inlined_call_operand.vmem [shape: bf16[2,256,128], index: 0, kind: input, shape index: {}]   ;;  %s1129_s1 = inlined_call_operand.vmem [shape: bf16[1,1,128,128], index: 1, kind: input, shape index: {}]   ;;  %s1130_s2 = inlined_call_operand.vmem [shape: f32[2,256,128], index: 2, kind: output, shape index: {0}]   ;;  %s1131_s3 = inlined_call_operand.vmem [shape: f32[2,2,128], index: 3, kind: output, shape index: {1}]  }
   0x1 LB: > { %s763_s13 = sadd.s32 4294967295, %s927_s12   ;;  %p767_p0 = scmp.ge.s32.totalorder %s927_s12, 1  ;;  %s927_s12 = sphi %s949_s12, %s14_s12  }
   0x2   : > { %p140_p1 = scmp.lt.s32.totalorder %s927_s12, 3 }
   0x4   : > { %p141_p2 = pnand %p767_p0, %p140_p1 }
   0x5   : > { %v897_v0 = vld [vmem:[%s1129_s1] sm:$0xff] (!%p141_p2)   ;;  %p168_p3 = scmp.lt.s32.totalorder (!%p141_p2), %s763_s13, 1  ;;  %v898_v1 = vld [vmem:[%s1129_s1 + $0x8] sm:$0xff] (!%p141_p2)   ;;  %v899_v2 = vld [vmem:[%s1129_s1 + $0x10] sm:$0xff] (!%p141_p2)   ;;  %vm674_vm0 = vcmask (!%p141_p2), 1040384  }
   0x6   : > { %144 = sbr.rel (%p141_p2) target bundleno = 331 (0x14b), region = 28  ;;  %825 = vmatprep.subr.bf16.mxu0 (!%p141_p2), %v897_v0  ;;  %873 = vmatprep.subr.bf16.mxu1 (!%p141_p2), %v897_v0  ;;  %v900_v3 = vld [vmem:[%s1129_s1 + $0x18] sm:$0xff] (!%p141_p2)   ;;  %v901_v5 = vld [vmem:[%s1129_s1 + $0x20] sm:$0xff] (!%p141_p2)   ;;  %v902_v6 = vld [vmem:[%s1129_s1 + $0x28] sm:$0xff] (!%p141_p2)  }
   0x7   : > { %826 = vmatpush3.bf16.msra.mxu0 (!%p141_p2), %v897_v0  ;;  %881 = vmatpush3.bf16.msra.mxu1 (!%p141_p2), %v897_v0  ;;  %v903_v8 = vld [vmem:[%s1129_s1 + $0x30] sm:$0xff] (!%p141_p2)   ;;  %v904_v9 = vld [vmem:[%s1129_s1 + $0x38] sm:$0xff] (!%p141_p2)  }
   0x8   : > { %827 = vmatprep.subr.bf16.mxu0 (!%p141_p2), %v898_v1  ;;  %874 = vmatprep.subr.bf16.mxu1 (!%p141_p2), %v898_v1 }
   0xb   : > { %828 = vmatpush3.bf16.msra.mxu0 (!%p141_p2), %v898_v1  ;;  %882 = vmatpush3.bf16.msra.mxu1 (!%p141_p2), %v898_v1 }
   0xc   : > { %829 = vmatprep.subr.bf16.mxu0 (!%p141_p2), %v899_v2  ;;  %875 = vmatprep.subr.bf16.mxu1 (!%p141_p2), %v899_v2 }
   0xd   : > { %s1133_s13 = smov (!%p168_p3, %s763_s13), 1 }
   0xe   : > { %s799_s20 = sshll.u32 %s1133_s13, 7  ;;  %s800_s7 = sshll.u32 %s1133_s13, 8 }
   0xf   : > { %s972_s23 = scalar_lea.vmem %s1128_s0, %s799_s20  ;;  %830 = vmatpush3.bf16.msra.mxu0 %v899_v2  ;;  %883 = vmatpush3.bf16.msra.mxu1 %v899_v2  ;;  %s1009_s10 = scalar_lea.vmem %s1130_s2, %s800_s7 }
  0x10   : > { %v905_v4 = vld [vmem:[%s972_s23] sm:$0xff]   ;;  %831 = vmatprep.subr.bf16.mxu0 %v900_v3  ;;  %876 = vmatprep.subr.bf16.mxu1 %v900_v3  ;;  %v906_v10 = vld [vmem:[%s972_s23 + $0x8] sm:$0xff]   ;;  %v907_v12 = vld [vmem:[%s972_s23 + $0x10] sm:$0xff]   ;;  %s772_s11 = sshll.u32 %s1133_s13, 1 }
  0x11   : > { %841 = vmatprep.mubr.bf16.mxu0 %v905_v4  ;;  %v913_v7 = vld [vmem:[%s972_s23 + $0x40] sm:$0xff]   ;;  %v914_v11 = vld [vmem:[%s972_s23 + $0x48] sm:$0xff]   ;;  %v915_v13 = vld [vmem:[%s972_s23 + $0x50] sm:$0xff]   ;;  %s181_s16 = scalar_lea.vmem %s1131_s3, %s772_s11 }
  0x12   : > { %857 = vmatprep.mubr.bf16.mxu1 %v913_v7  ;;  %v908_v14 = vld [vmem:[%s972_s23 + $0x18] sm:$0xff]   ;;  %v909_v16 = vld [vmem:[%s972_s23 + $0x20] sm:$0xff]   ;;  %v910_v18 = vld [vmem:[%s972_s23 + $0x28] sm:$0xff]  }
  0x13   : > { %832 = vmatpush3.bf16.msra.mxu0 %v900_v3  ;;  %884 = vmatpush3.bf16.msra.mxu1 %v900_v3  ;;  %v916_v15 = vld [vmem:[%s972_s23 + $0x58] sm:$0xff]   ;;  %v917_v17 = vld [vmem:[%s972_s23 + $0x60] sm:$0xff]   ;;  %v918_v19 = vld [vmem:[%s972_s23 + $0x68] sm:$0xff]  }
  0x14   : > { %833 = vmatprep.subr.bf16.mxu0 %v901_v5  ;;  %877 = vmatprep.subr.bf16.mxu1 %v901_v5  ;;  %v911_v20 = vld [vmem:[%s972_s23 + $0x30] sm:$0xff]   ;;  %v912_v22 = vld [vmem:[%s972_s23 + $0x38] sm:$0xff]  }
  0x15   : > { %v919_v21 = vld [vmem:[%s972_s23 + $0x70] sm:$0xff]   ;;  %v920_v23 = vld [vmem:[%s972_s23 + $0x78] sm:$0xff]  }
  0x17   : > { %834 = vmatpush3.bf16.msra.mxu0 %v901_v5  ;;  %885 = vmatpush3.bf16.msra.mxu1 %v901_v5 }
  0x18   : > { %835 = vmatprep.subr.bf16.mxu0 %v902_v6  ;;  %878 = vmatprep.subr.bf16.mxu1 %v902_v6 }
  0x1b   : > { %836 = vmatpush3.bf16.msra.mxu0 %v902_v6  ;;  %886 = vmatpush3.bf16.msra.mxu1 %v902_v6 }
  0x1c   : > { %837 = vmatprep.subr.bf16.mxu0 %v903_v8  ;;  %879 = vmatprep.subr.bf16.mxu1 %v903_v8 }
  0x1f   : > { %838 = vmatpush3.bf16.msra.mxu0 %v903_v8  ;;  %887 = vmatpush3.bf16.msra.mxu1 %v903_v8 }
  0x20   : > { %839 = vmatprep.subr.bf16.mxu0 %v904_v9  ;;  %880 = vmatprep.subr.bf16.mxu1 %v904_v9 }
  0x23   : > { %840 = vmatpush3.bf16.msra.mxu0 %v904_v9  ;;  %888 = vmatpush3.bf16.msra.mxu1 %v904_v9 }
  0x26   : > { %842 = vmatmul.mubr.bf16.vlgmr.msra.gmra.mrb[0].mxu0 %v906_v10  ;;  %858 = vmatmul.mubr.bf16.vlgmr.msra.gmra.mrb[0].mxu1 %v914_v11 }
  0x27   : > { %845 = vmatprep.mubr.bf16.mxu0 %v907_v12  ;;  %861 = vmatprep.mubr.bf16.mxu1 %v915_v13 }
  0x2e   : > { %846 = vmatmul.mubr.bf16.gmra.mrb[4].mxu0 %v908_v14  ;;  %862 = vmatmul.mubr.bf16.gmra.mrb[4].mxu1 %v916_v15 }
  0x2f   : > { %849 = vmatprep.mubr.bf16.mxu0 %v909_v16  ;;  %865 = vmatprep.mubr.bf16.mxu1 %v917_v17 }
  0x36   : > { %850 = vmatmul.mubr.bf16.gmra.mrb[8].mxu0 %v910_v18  ;;  %866 = vmatmul.mubr.bf16.gmra.mrb[8].mxu1 %v918_v19 }
  0x37   : > { %853 = vmatprep.mubr.bf16.mxu0 %v911_v20  ;;  %869 = vmatprep.mubr.bf16.mxu1 %v919_v21 }
  0x3e   : > { %854 = vmatmul.mubr.bf16.gmra.mrb[12].mxu0 %v912_v22  ;;  %870 = vmatmul.mubr.bf16.gmra.mrb[12].mxu1 %v920_v23 }
  0xf9   : > { %v843_v24 = vpop.f32.mrb[0].mxu0  ;;  %v1011_v25 = vpop.f32.mrb[0].mxu1 }
  0xfa   : > { %538 = vst [vmem:[%s1009_s10 + $0x10] sm:$0xff] %v843_v24  ;;  %v409_v26 = vpop.f32.mrb[1].mxu0  ;;  %554 = vst [vmem:[%s1009_s10 + $0x90] sm:$0xff] %v1011_v25  ;;  %v1016_v27 = vpop.f32.mrb[1].mxu1  ;;  %v607_v35 = vmul.f32 %v843_v24, %v843_v24 }
  0xfb   : > { %536 = vst [vmem:[%s1009_s10] sm:$0xff] %v409_v26  ;;  %v844_v28 = vpop.f32.mrb[2].mxu0  ;;  %552 = vst [vmem:[%s1009_s10 + $0x80] sm:$0xff] %v1016_v27  ;;  %v1021_v29 = vpop.f32.mrb[2].mxu1  ;;  %v605_v32 = vmul.f32 %v409_v26, %v409_v26 }
  0xfc   : > { %539 = vst [vmem:[%s1009_s10 + $0x18] sm:$0xff] %v844_v28  ;;  %v412_v30 = vpop.f32.mrb[3].mxu0  ;;  %555 = vst [vmem:[%s1009_s10 + $0x98] sm:$0xff] %v1021_v29  ;;  %v1026_v31 = vpop.f32.mrb[3].mxu1  ;;  %v608_v38 = vmul.f32 %v844_v28, %v844_v28 }
  0xfd   : > { %537 = vst [vmem:[%s1009_s10 + $0x8] sm:$0xff] %v412_v30  ;;  %v568_v33 = vadd.f32 %v412_v30, %v409_v26  ;;  %v606_v34 = vmul.f32 %v412_v30, %v412_v30  ;;  %553 = vst [vmem:[%s1009_s10 + $0x88] sm:$0xff] %v1026_v31 }
  0xff   : > { %v569_v36 = vadd.f32 %v843_v24, %v568_v33  ;;  %v637_v37 = vadd.f32 %v606_v34, %v605_v32 }
 0x101   : > { %v638_v39 = vadd.f32 %v637_v37, %v607_v35  ;;  %v847_v40 = vpop.f32.mrb[4].mxu0  ;;  %v570_v41 = vadd.f32 %v844_v28, %v569_v36  ;;  %v1031_v42 = vpop.f32.mrb[4].mxu1 }
 0x102   : > { %542 = vst [vmem:[%s1009_s10 + $0x30] sm:$0xff] %v847_v40  ;;  %v425_v43 = vpop.f32.mrb[5].mxu0  ;;  %558 = vst [vmem:[%s1009_s10 + $0xb0] sm:$0xff] %v1031_v42  ;;  %v1036_v44 = vpop.f32.mrb[5].mxu1  ;;  %v611_v55 = vmul.f32 %v847_v40, %v847_v40 }
 0x103   : > { %540 = vst [vmem:[%s1009_s10 + $0x20] sm:$0xff] %v425_v43  ;;  %v571_v45 = vadd.f32 %v570_v41, %v425_v43  ;;  %v609_v46 = vmul.f32 %v425_v43, %v425_v43  ;;  %v639_v47 = vadd.f32 %v638_v39, %v608_v38  ;;  %v848_v48 = vpop.f32.mrb[6].mxu0  ;;  %556 = vst [vmem:[%s1009_s10 + $0xa0] sm:$0xff] %v1036_v44  ;;  %v1041_v49 = vpop.f32.mrb[6].mxu1 }
 0x104   : > { %543 = vst [vmem:[%s1009_s10 + $0x38] sm:$0xff] %v848_v48  ;;  %v428_v50 = vpop.f32.mrb[7].mxu0  ;;  %559 = vst [vmem:[%s1009_s10 + $0xb8] sm:$0xff] %v1041_v49  ;;  %v1046_v51 = vpop.f32.mrb[7].mxu1  ;;  %v612_v58 = vmul.f32 %v848_v48, %v848_v48  ;;  %v621_v41 = vmul.f32 %v1016_v27, %v1016_v27 }
 0x105   : > { %v640_v52 = vadd.f32 %v639_v47, %v609_v46  ;;  %541 = vst [vmem:[%s1009_s10 + $0x28] sm:$0xff] %v428_v50  ;;  %v572_v53 = vadd.f32 %v571_v45, %v428_v50  ;;  %v610_v54 = vmul.f32 %v428_v50, %v428_v50  ;;  %557 = vst [vmem:[%s1009_s10 + $0xa8] sm:$0xff] %v1046_v51 }
 0x106   : > { %v623_v50 = vmul.f32 %v1011_v25, %v1011_v25 }
 0x107   : > { %v573_v56 = vadd.f32 %v847_v40, %v572_v53  ;;  %v641_v57 = vadd.f32 %v640_v52, %v610_v54  ;;  %v624_v54 = vmul.f32 %v1021_v29, %v1021_v29 }
 0x109   : > { %v642_v59 = vadd.f32 %v641_v57, %v611_v55  ;;  %v851_v60 = vpop.f32.mrb[8].mxu0  ;;  %v574_v61 = vadd.f32 %v848_v48, %v573_v56  ;;  %v1051_v62 = vpop.f32.mrb[8].mxu1  ;;  %v622_v48 = vmul.f32 %v1026_v31, %v1026_v31 }
 0x10a   : > { %546 = vst [vmem:[%s1009_s10 + $0x50] sm:$0xff] %v851_v60  ;;  %v441_v63 = vpop.f32.mrb[9].mxu0  ;;  %562 = vst [vmem:[%s1009_s10 + $0xd0] sm:$0xff] %v1051_v62  ;;  %v1056_v0 = vpop.f32.mrb[9].mxu1  ;;  %v615_v11 = vmul.f32 %v851_v60, %v851_v60 }
 0x10b   : > { %544 = vst [vmem:[%s1009_s10 + $0x40] sm:$0xff] %v441_v63  ;;  %v575_v1 = vadd.f32 %v574_v61, %v441_v63  ;;  %v613_v2 = vmul.f32 %v441_v63, %v441_v63  ;;  %v643_v3 = vadd.f32 %v642_v59, %v612_v58  ;;  %v852_v4 = vpop.f32.mrb[10].mxu0  ;;  %560 = vst [vmem:[%s1009_s10 + $0xc0] sm:$0xff] %v1056_v0  ;;  %v1061_v5 = vpop.f32.mrb[10].mxu1 }
 0x10c   : > { %547 = vst [vmem:[%s1009_s10 + $0x58] sm:$0xff] %v852_v4  ;;  %v444_v6 = vpop.f32.mrb[11].mxu0  ;;  %563 = vst [vmem:[%s1009_s10 + $0xd8] sm:$0xff] %v1061_v5  ;;  %v1066_v7 = vpop.f32.mrb[11].mxu1  ;;  %v616_v14 = vmul.f32 %v852_v4, %v852_v4 }
 0x10d   : > { %v644_v8 = vadd.f32 %v643_v3, %v613_v2  ;;  %545 = vst [vmem:[%s1009_s10 + $0x48] sm:$0xff] %v444_v6  ;;  %v576_v9 = vadd.f32 %v575_v1, %v444_v6  ;;  %v614_v10 = vmul.f32 %v444_v6, %v444_v6  ;;  %561 = vst [vmem:[%s1009_s10 + $0xc8] sm:$0xff] %v1066_v7 }
 0x10f   : > { %v577_v12 = vadd.f32 %v851_v60, %v576_v9  ;;  %v645_v13 = vadd.f32 %v644_v8, %v614_v10  ;;  %v626_v60 = vmul.f32 %v1046_v51, %v1046_v51  ;;  %v630_v8 = vmul.f32 %v1066_v7, %v1066_v7 }
 0x111   : > { %v646_v15 = vadd.f32 %v645_v13, %v615_v11  ;;  %v855_v16 = vpop.f32.mrb[12].mxu0  ;;  %v578_v17 = vadd.f32 %v852_v4, %v577_v12  ;;  %v1071_v18 = vpop.f32.mrb[12].mxu1 }
 0x112   : > { %550 = vst [vmem:[%s1009_s10 + $0x70] sm:$0xff] %v855_v16  ;;  %v457_v19 = vpop.f32.mrb[13].mxu0  ;;  %566 = vst [vmem:[%s1009_s10 + $0xf0] sm:$0xff] %v1071_v18  ;;  %v521_v20 = vpop.f32.mrb[13].mxu1  ;;  %v619_v35 = vmul.f32 %v855_v16, %v855_v16 }
 0x113   : > { %548 = vst [vmem:[%s1009_s10 + $0x60] sm:$0xff] %v457_v19  ;;  %v579_v21 = vadd.f32 %v578_v17, %v457_v19  ;;  %v617_v22 = vmul.f32 %v457_v19, %v457_v19  ;;  %v647_v23 = vadd.f32 %v646_v15, %v616_v14  ;;  %v856_v24 = vpop.f32.mrb[14].mxu0  ;;  %564 = vst [vmem:[%s1009_s10 + $0xe0] sm:$0xff] %v521_v20  ;;  %v872_v26 = vpop.f32.mrb[14].mxu1 }
 0x114   : > { %551 = vst [vmem:[%s1009_s10 + $0x78] sm:$0xff] %v856_v24  ;;  %v460_v28 = vpop.f32.mrb[15].mxu0  ;;  %567 = vst [vmem:[%s1009_s10 + $0xf8] sm:$0xff] %v872_v26  ;;  %v524_v30 = vpop.f32.mrb[15].mxu1  ;;  %v620_v38 = vmul.f32 %v856_v24, %v856_v24 }
 0x115   : > { %v648_v32 = vadd.f32 %v647_v23, %v617_v22  ;;  %549 = vst [vmem:[%s1009_s10 + $0x68] sm:$0xff] %v460_v28  ;;  %v580_v33 = vadd.f32 %v579_v21, %v460_v28  ;;  %v618_v34 = vmul.f32 %v460_v28, %v460_v28  ;;  %565 = vst [vmem:[%s1009_s10 + $0xe8] sm:$0xff] %v524_v30 }
 0x116   : > { %v634_v17 = vmul.f32 %v524_v30, %v524_v30  ;;  %v636_v21 = vmul.f32 %v872_v26, %v872_v26 }
 0x117   : > { %v581_v36 = vadd.f32 %v855_v16, %v580_v33  ;;  %v649_v37 = vadd.f32 %v648_v32, %v618_v34 }
 0x119   : > { %v650_v39 = vadd.f32 %v649_v37, %v619_v35  ;;  %v582_v40 = vadd.f32 %v856_v24, %v581_v36 }
 0x11b   : > { %v583_v43 = vadd.f32 %v582_v40, %v1016_v27  ;;  %v651_v45 = vadd.f32 %v650_v39, %v620_v38  ;;  %v625_v27 = vmul.f32 %v1036_v44, %v1036_v44 }
 0x11d   : > { %v652_v46 = vadd.f32 %v651_v45, %v621_v41  ;;  %v584_v47 = vadd.f32 %v583_v43, %v1026_v31 }
 0x11f   : > { %v585_v52 = vadd.f32 %v1011_v25, %v584_v47  ;;  %v653_v53 = vadd.f32 %v652_v46, %v622_v48  ;;  %v627_v25 = vmul.f32 %v1031_v42, %v1031_v42 }
 0x121   : > { %v654_v55 = vadd.f32 %v653_v53, %v623_v50  ;;  %v586_v56 = vadd.f32 %v1021_v29, %v585_v52  ;;  %v628_v29 = vmul.f32 %v1041_v49, %v1041_v49 }
 0x123   : > { %v587_v57 = vadd.f32 %v586_v56, %v1036_v44  ;;  %v655_v58 = vadd.f32 %v654_v55, %v624_v54  ;;  %v629_v44 = vmul.f32 %v1056_v0, %v1056_v0 }
 0x125   : > { %v656_v59 = vadd.f32 %v655_v58, %v625_v27  ;;  %v588_v31 = vadd.f32 %v587_v57, %v1046_v51 }
 0x127   : > { %v589_v61 = vadd.f32 %v1031_v42, %v588_v31  ;;  %v657_v63 = vadd.f32 %v656_v59, %v626_v60  ;;  %v631_v42 = vmul.f32 %v1051_v62, %v1051_v62 }
 0x129   : > { %v658_v1 = vadd.f32 %v657_v63, %v627_v25  ;;  %v590_v2 = vadd.f32 %v1041_v49, %v589_v61  ;;  %v632_v49 = vmul.f32 %v1061_v5, %v1061_v5 }
 0x12b   : > { %v591_v3 = vadd.f32 %v590_v2, %v1056_v0  ;;  %v659_v4 = vadd.f32 %v658_v1, %v628_v29  ;;  %v633_v0 = vmul.f32 %v521_v20, %v521_v20 }
 0x12d   : > { %v660_v6 = vadd.f32 %v659_v4, %v629_v44  ;;  %v592_v51 = vadd.f32 %v591_v3, %v1066_v7  ;;  %v635_v7 = vmul.f32 %v1071_v18, %v1071_v18 }
 0x12f   : > { %v593_v9 = vadd.f32 %v1051_v62, %v592_v51  ;;  %v661_v10 = vadd.f32 %v660_v6, %v630_v8 }
 0x131   : > { %v662_v11 = vadd.f32 %v661_v10, %v631_v42  ;;  %v594_v12 = vadd.f32 %v1061_v5, %v593_v9 }
 0x133   : > { %v595_v13 = vadd.f32 %v594_v12, %v521_v20  ;;  %v663_v14 = vadd.f32 %v662_v11, %v632_v49 }
 0x135   : > { %v664_v15 = vadd.f32 %v663_v14, %v633_v0  ;;  %v596_v16 = vadd.f32 %v595_v13, %v524_v30 }
 0x137   : > { %v597_v19 = vadd.f32 %v1071_v18, %v596_v16  ;;  %v665_v62 = vadd.f32 %v664_v15, %v634_v17 }
 0x139   : > { %v598_v22 = vadd.f32 %v872_v26, %v597_v19  ;;  %v666_v23 = vadd.f32 %v665_v62, %v635_v7 }
 0x13b   : > { %v599_v24 = vrot.slane %v598_v22, 4  ;;  %v667_v28 = vadd.f32 %v666_v23, %v636_v21 }
 0x13d   : > { %v600_v32 = vadd.f32 %v599_v24, %v598_v22  ;;  %v668_v5 = vrot.slane %v667_v28, 4 }
 0x13f   : > { %v601_v33 = vrot.slane %v600_v32, 2  ;;  %v669_v20 = vadd.f32 %v668_v5, %v667_v28 }
 0x141   : > { %v602_v34 = vadd.f32 %v601_v33, %v600_v32  ;;  %v670_v35 = vrot.slane %v669_v20, 2 }
 0x143   : > { %v603_v36 = vrot.slane %v602_v34, 1  ;;  %v671_v30 = vadd.f32 %v670_v35, %v669_v20 }
 0x145   : > { %v672_v37 = vrot.slane %v671_v30, 1  ;;  %v604_v18 = vadd.f32 %v603_v36, %v602_v34 }
 0x147   : > { %v673_v26 = vadd.f32 %v672_v37, %v671_v30 }
 0x149   : > { %v675_v38 = vsel %vm674_vm0, %v604_v18, %v673_v26 }
 0x14a   : > { %676 = vst [vmem:[%s181_s16] sm:$0x3] %v675_v38 }
 0x14b PF: > { %s14_s12 = sadd.s32 1, %s927_s12  }
 0x14c   : > { %p11_p4 = scmp.ge.s32.totalorder %s14_s12, 4  }
 0x14e   :  { %13 = sbr.rel (!%p11_p4) target bundleno = 1 (0x1), region = 70 }

// kernel: convset_forward.11
= control target key start
LH: loop header
LB: loop body
LE: loop exit
PB: predicated region body
PF: predicated region fallthrough
CT: control target
= control target key end

     0   :  { %s802_s12 = smov 0   ;;  %s950_s0 = inlined_call_operand.vmem [shape: f32[2,256,128], index: 0, kind: input, shape index: {}]   ;;  %s951_s1 = inlined_call_operand.vmem [shape: f32[1,128], index: 1, kind: input, shape index: {}]   ;;  %s952_s2 = inlined_call_operand.vmem [shape: f32[1,128], index: 2, kind: input, shape index: {}]   ;;  %s953_s3 = inlined_call_operand.vmem [shape: bf16[2,256,128], index: 3, kind: output, shape index: {}]  }
   0x1 LB: > { %s592_s13 = sadd.s32 4294967295, %s780_s12   ;;  %p596_p0 = scmp.ge.s32.totalorder %s780_s12, 1  ;;  %s780_s12 = sphi %s802_s12, %s13_s12  }
   0x2   : > { %p137_p1 = scmp.lt.s32.totalorder %s780_s12, 3 }
   0x4   : > { %p138_p2 = pnand %p596_p0, %p137_p1 }
   0x5   : > { %p161_p3 = scmp.lt.s32.totalorder (!%p138_p2), %s592_s13, 1  ;;  %v816_v0 = vld [vmem:[%s951_s1] ss:$0 sm:$0xff] (!%p138_p2) }
   0x6   : > { %141 = sbr.rel (%p138_p2) target bundleno = 67 (0x43), region = 32  ;;  %v826_v1 = vld [vmem:[%s952_s2] ss:$0 sm:$0xff] (!%p138_p2) }
   0xd   : > { %s955_s13 = smov (!%p161_p3, %s592_s13), 1 }
   0xe   : > { %s637_s14 = sshll.u32 %s955_s13, 8  ;;  %s638_s22 = sshll.u32 %s955_s13, 7 }
   0xf   : > { %s821_s19 = scalar_lea.vmem %s950_s0, %s637_s14  ;;  %s854_s25 = scalar_lea.vmem %s953_s3, %s638_s22 }
  0x10   : > { %v171_v2 = vld [vmem:[%s821_s19] sm:$0xff]  ;;  %v172_v3 = vld [vmem:[%s821_s19 + $0x8] sm:$0xff]  ;;  %v173_v4 = vld [vmem:[%s821_s19 + $0x10] sm:$0xff] }
  0x11   : > { %v210_v5 = vmul.f32 %v816_v0, %v171_v2  ;;  %v211_v6 = vmul.f32 %v816_v0, %v172_v3  ;;  %v174_v7 = vld [vmem:[%s821_s19 + $0x18] sm:$0xff]  ;;  %v212_v8 = vmul.f32 %v816_v0, %v173_v4  ;;  %v175_v9 = vld [vmem:[%s821_s19 + $0x20] sm:$0xff]  ;;  %v176_v10 = vld [vmem:[%s821_s19 + $0x28] sm:$0xff] }
  0x12   : > { %v213_v11 = vmul.f32 %v816_v0, %v174_v7  ;;  %v214_v12 = vmul.f32 %v816_v0, %v175_v9  ;;  %v215_v13 = vmul.f32 %v816_v0, %v176_v10  ;;  %v177_v14 = vld [vmem:[%s821_s19 + $0x30] sm:$0xff]  ;;  %v178_v15 = vld [vmem:[%s821_s19 + $0x38] sm:$0xff]  ;;  %v179_v30 = vld [vmem:[%s821_s19 + $0x40] sm:$0xff] }
  0x13   : > { %v249_v16 = vadd.f32 %v826_v1, %v210_v5  ;;  %v250_v17 = vadd.f32 %v826_v1, %v211_v6  ;;  %v251_v18 = vadd.f32 %v826_v1, %v212_v8  ;;  %v216_v19 = vmul.f32 %v816_v0, %v177_v14  ;;  %v180_v31 = vld [vmem:[%s821_s19 + $0x48] sm:$0xff]  ;;  %v181_v32 = vld [vmem:[%s821_s19 + $0x50] sm:$0xff]  ;;  %v182_v44 = vld [vmem:[%s821_s19 + $0x58] sm:$0xff] }
  0x14   : > { %v252_v20 = vadd.f32 %v826_v1, %v213_v11  ;;  %v253_v21 = vadd.f32 %v826_v1, %v214_v12  ;;  %v254_v22 = vadd.f32 %v826_v1, %v215_v13  ;;  %v217_v23 = vmul.f32 %v816_v0, %v178_v15  ;;  %v183_v46 = vld [vmem:[%s821_s19 + $0x60] sm:$0xff]  ;;  %v184_v56 = vld [vmem:[%s821_s19 + $0x68] sm:$0xff]  ;;  %v185_v60 = vld [vmem:[%s821_s19 + $0x70] sm:$0xff] }
  0x15   : > { %vm281_vm0 = vcmp.gt.f32.partialorder %v249_v16, 0.0  ;;  %vm282_vm1 = vcmp.gt.f32.partialorder %v250_v17, 0.0  ;;  %v313_v24 = vmul.f32 0.1, %v249_v16  ;;  %v314_v25 = vmul.f32 0.1, %v250_v17 }
  0x16   : > { %vm283_vm2 = vcmp.gt.f32.partialorder %v251_v18, 0.0  ;;  %vm284_vm3 = vcmp.gt.f32.partialorder %v252_v20, 0.0  ;;  %v315_v26 = vmul.f32 0.1, %v251_v18  ;;  %v316_v27 = vmul.f32 0.1, %v252_v20 }
  0x17   : > { %v345_v28 = vsel %vm281_vm0, %v249_v16, %v313_v24  ;;  %v346_v29 = vsel %vm282_vm1, %v250_v17, %v314_v25  ;;  %vm285_vm4 = vcmp.gt.f32.partialorder %v253_v21, 0.0  ;;  %vm286_vm5 = vcmp.gt.f32.partialorder %v254_v22, 0.0  ;;  %v186_v6 = vld [vmem:[%s821_s19 + $0x78] sm:$0xff]  ;;  %v187_v10 = vld [vmem:[%s821_s19 + $0x80] sm:$0xff] }
  0x18   : > { %v674_v33 = vpack.c.bf16 %v346_v29, %v345_v28  ;;  %v347_v34 = vsel %vm283_vm2, %v251_v18, %v315_v26  ;;  %v348_v35 = vsel %vm284_vm3, %v252_v20, %v316_v27  ;;  %v317_v36 = vmul.f32 0.1, %v253_v21  ;;  %v188_v18 = vld [vmem:[%s821_s19 + $0x88] sm:$0xff]  ;;  %v190_v26 = vld [vmem:[%s821_s19 + $0x98] sm:$0xff] }
  0x19   : > { %v679_v37 = vpack.c.bf16 %v348_v35, %v347_v34  ;;  %v318_v38 = vmul.f32 0.1, %v254_v22  ;;  %v255_v39 = vadd.f32 %v826_v1, %v216_v19  ;;  %v256_v40 = vadd.f32 %v826_v1, %v217_v23  ;;  %v189_v19 = vld [vmem:[%s821_s19 + $0x90] sm:$0xff] }
  0x1a   : > { %675 = vst [vmem:[%s854_s25] sm:$0xff] %v674_v33   ;;  %v349_v41 = vsel %vm285_vm4, %v253_v21, %v317_v36  ;;  %v218_v42 = vmul.f32 %v816_v0, %v179_v30  ;;  %v219_v43 = vmul.f32 %v816_v0, %v180_v31  ;;  %v220_v45 = vmul.f32 %v816_v0, %v181_v32  ;;  %v191_v31 = vld [vmem:[%s821_s19 + $0xa0] sm:$0xff]  ;;  %v192_v32 = vld [vmem:[%s821_s19 + $0xa8] sm:$0xff] }
  0x1b   : > { %751 = vst [vmem:[%s854_s25 + $0x8] sm:$0xff] %v679_v37   ;;  %v350_v47 = vsel %vm286_vm5, %v254_v22, %v318_v38  ;;  %vm287_vm6 = vcmp.gt.f32.partialorder %v255_v39, 0.0  ;;  %vm288_vm7 = vcmp.gt.f32.partialorder %v256_v40, 0.0  ;;  %v319_v48 = vmul.f32 0.1, %v255_v39 }
  0x1c   : > { %v684_v49 = vpack.c.bf16 %v350_v47, %v349_v41  ;;  %v320_v50 = vmul.f32 0.1, %v256_v40  ;;  %v257_v51 = vadd.f32 %v826_v1, %v218_v42  ;;  %v258_v52 = vadd.f32 %v826_v1, %v219_v43  ;;  %v193_v43 = vld [vmem:[%s821_s19 + $0xb0] sm:$0xff] }
  0x1d   : > { %v351_v53 = vsel %vm287_vm6, %v255_v39, %v319_v48  ;;  %v221_v54 = vmul.f32 %v816_v0, %v182_v44  ;;  %v259_v55 = vadd.f32 %v826_v1, %v220_v45  ;;  %v222_v57 = vmul.f32 %v816_v0, %v183_v46  ;;  %v194_v44 = vld [vmem:[%s821_s19 + $0xb8] sm:$0xff] }
  0x1e   : > { %752 = vst [vmem:[%s854_s25 + $0x10] sm:$0xff] %v684_v49   ;;  %v352_v58 = vsel %vm288_vm7, %v256_v40, %v320_v50  ;;  %vm289_vm8 = vcmp.gt.f32.partialorder %v257_v51, 0.0  ;;  %vm290_vm9 = vcmp.gt.f32.partialorder %v258_v52, 0.0  ;;  %v321_v59 = vmul.f32 0.1, %v257_v51 }
  0x1f   : > { %v689_v61 = vpack.c.bf16 %v352_v58, %v351_v53  ;;  %v322_v62 = vmul.f32 0.1, %v258_v52  ;;  %v260_v63 = vadd.f32 %v826_v1, %v221_v54  ;;  %vm291_vm10 = vcmp.gt.f32.partialorder %v259_v55, 0.0 }
  0x20   : > { %v353_v2 = vsel %vm289_vm8, %v257_v51, %v321_v59  ;;  %v323_v3 = vmul.f32 0.1, %v259_v55  ;;  %v223_v4 = vmul.f32 %v816_v0, %v184_v56  ;;  %v261_v5 = vadd.f32 %v826_v1, %v222_v57  ;;  %v196_v59 = vld [vmem:[%s821_s19 + $0xc8] sm:$0xff] }
  0x21   : > { %753 = vst [vmem:[%s854_s25 + $0x18] sm:$0xff] %v689_v61   ;;  %v354_v7 = vsel %vm290_vm9, %v258_v52, %v322_v62  ;;  %vm292_vm11 = vcmp.gt.f32.partialorder %v260_v63, 0.0  ;;  %v324_v8 = vmul.f32 0.1, %v260_v63  ;;  %v224_v9 = vmul.f32 %v816_v0, %v185_v60 }
  0x22   : > { %v694_v11 = vpack.c.bf16 %v354_v7, %v353_v2  ;;  %v355_v12 = vsel %vm291_vm10, %v259_v55, %v323_v3  ;;  %v262_v13 = vadd.f32 %v826_v1, %v223_v4  ;;  %vm293_vm12 = vcmp.gt.f32.partialorder %v261_v5, 0.0  ;;  %v195_v55 = vld [vmem:[%s821_s19 + $0xc0] sm:$0xff]  ;;  %v197_v4 = vld [vmem:[%s821_s19 + $0xd0] sm:$0xff] }
  0x23   : > { %v356_v14 = vsel %vm292_vm11, %v260_v63, %v324_v8  ;;  %v325_v15 = vmul.f32 0.1, %v261_v5  ;;  %v225_v16 = vmul.f32 %v816_v0, %v186_v6  ;;  %v263_v17 = vadd.f32 %v826_v1, %v224_v9  ;;  %v198_v9 = vld [vmem:[%s821_s19 + $0xd8] sm:$0xff] }
  0x24   : > { %754 = vst [vmem:[%s854_s25 + $0x20] sm:$0xff] %v694_v11   ;;  %v699_v20 = vpack.c.bf16 %v356_v14, %v355_v12  ;;  %vm294_vm13 = vcmp.gt.f32.partialorder %v262_v13, 0.0  ;;  %v326_v21 = vmul.f32 0.1, %v262_v13  ;;  %v226_v22 = vmul.f32 %v816_v0, %v187_v10  ;;  %v199_v10 = vld [vmem:[%s821_s19 + $0xe0] sm:$0xff]  ;;  %v200_v11 = vld [vmem:[%s821_s19 + $0xe8] sm:$0xff] }
  0x25   : > { %v357_v23 = vsel %vm293_vm12, %v261_v5, %v325_v15  ;;  %v264_v24 = vadd.f32 %v826_v1, %v225_v16  ;;  %vm295_vm14 = vcmp.gt.f32.partialorder %v263_v17, 0.0  ;;  %v327_v25 = vmul.f32 0.1, %v263_v17 }
  0x26   : > { %755 = vst [vmem:[%s854_s25 + $0x28] sm:$0xff] %v699_v20   ;;  %v358_v27 = vsel %vm294_vm13, %v262_v13, %v326_v21  ;;  %v227_v28 = vmul.f32 %v816_v0, %v188_v18  ;;  %v265_v29 = vadd.f32 %v826_v1, %v226_v22  ;;  %v228_v30 = vmul.f32 %v816_v0, %v189_v19  ;;  %v201_v22 = vld [vmem:[%s821_s19 + $0xf0] sm:$0xff] }
  0x27   : > { %v704_v33 = vpack.c.bf16 %v358_v27, %v357_v23  ;;  %vm296_vm15 = vcmp.gt.f32.partialorder %v264_v24, 0.0  ;;  %v328_v34 = vmul.f32 0.1, %v264_v24  ;;  %v359_v35 = vsel %vm295_vm14, %v263_v17, %v327_v25 }
  0x28   : > { %v266_v36 = vadd.f32 %v826_v1, %v227_v28  ;;  %vm297_vm0 = vcmp.gt.f32.partialorder %v265_v29, 0.0  ;;  %v329_v37 = vmul.f32 0.1, %v265_v29  ;;  %v229_v38 = vmul.f32 %v816_v0, %v190_v26 }
  0x29   : > { %756 = vst [vmem:[%s854_s25 + $0x30] sm:$0xff] %v704_v33   ;;  %v360_v39 = vsel %vm296_vm15, %v264_v24, %v328_v34  ;;  %v267_v40 = vadd.f32 %v826_v1, %v228_v30  ;;  %v230_v41 = vmul.f32 %v816_v0, %v191_v31  ;;  %v231_v42 = vmul.f32 %v816_v0, %v192_v32  ;;  %v202_v32 = vld [vmem:[%s821_s19 + $0xf8] sm:$0xff] }
  0x2a   : > { %v709_v45 = vpack.c.bf16 %v360_v39, %v359_v35  ;;  %vm298_vm1 = vcmp.gt.f32.partialorder %v266_v36, 0.0  ;;  %v330_v46 = vmul.f32 0.1, %v266_v36  ;;  %v361_v47 = vsel %vm297_vm0, %v265_v29, %v329_v37 }
  0x2b   : > { %v268_v48 = vadd.f32 %v826_v1, %v229_v38  ;;  %vm299_vm2 = vcmp.gt.f32.partialorder %v267_v40, 0.0  ;;  %v331_v49 = vmul.f32 0.1, %v267_v40  ;;  %v269_v50 = vadd.f32 %v826_v1, %v230_v41 }
  0x2c   : > { %757 = vst [vmem:[%s854_s25 + $0x38] sm:$0xff] %v709_v45   ;;  %v362_v51 = vsel %vm298_vm1, %v266_v36, %v330_v46  ;;  %v270_v52 = vadd.f32 %v826_v1, %v231_v42  ;;  %v232_v53 = vmul.f32 %v816_v0, %v193_v43  ;;  %v233_v54 = vmul.f32 %v816_v0, %v194_v44 }
  0x2d   : > { %v714_v56 = vpack.c.bf16 %v362_v51, %v361_v47  ;;  %vm300_vm3 = vcmp.gt.f32.partialorder %v268_v48, 0.0  ;;  %v332_v57 = vmul.f32 0.1, %v268_v48  ;;  %v363_v58 = vsel %vm299_vm2, %v267_v40, %v331_v49 }
  0x2e   : > { %vm301_vm4 = vcmp.gt.f32.partialorder %v269_v50, 0.0  ;;  %vm302_vm5 = vcmp.gt.f32.partialorder %v270_v52, 0.0  ;;  %v333_v60 = vmul.f32 0.1, %v269_v50  ;;  %v334_v61 = vmul.f32 0.1, %v270_v52 }
  0x2f   : > { %758 = vst [vmem:[%s854_s25 + $0x40] sm:$0xff] %v714_v56   ;;  %v364_v62 = vsel %vm300_vm3, %v268_v48, %v332_v57  ;;  %v271_v63 = vadd.f32 %v826_v1, %v232_v53  ;;  %v272_v2 = vadd.f32 %v826_v1, %v233_v54  ;;  %v234_v3 = vmul.f32 %v816_v0, %v195_v55 }
  0x30   : > { %v719_v5 = vpack.c.bf16 %v364_v62, %v363_v58  ;;  %v365_v6 = vsel %vm301_vm4, %v269_v50, %v333_v60  ;;  %v366_v7 = vsel %vm302_vm5, %v270_v52, %v334_v61  ;;  %v235_v8 = vmul.f32 %v816_v0, %v196_v59 }
  0x31   : > { %v724_v12 = vpack.c.bf16 %v366_v7, %v365_v6  ;;  %vm303_vm6 = vcmp.gt.f32.partialorder %v271_v63, 0.0  ;;  %vm304_vm7 = vcmp.gt.f32.partialorder %v272_v2, 0.0  ;;  %v335_v13 = vmul.f32 0.1, %v271_v63 }
  0x32   : > { %759 = vst [vmem:[%s854_s25 + $0x48] sm:$0xff] %v719_v5   ;;  %v336_v14 = vmul.f32 0.1, %v272_v2  ;;  %v273_v15 = vadd.f32 %v826_v1, %v234_v3  ;;  %v274_v16 = vadd.f32 %v826_v1, %v235_v8  ;;  %v236_v17 = vmul.f32 %v816_v0, %v197_v4 }
  0x33   : > { %760 = vst [vmem:[%s854_s25 + $0x50] sm:$0xff] %v724_v12   ;;  %v367_v18 = vsel %vm303_vm6, %v271_v63, %v335_v13  ;;  %v237_v19 = vmul.f32 %v816_v0, %v198_v9  ;;  %v238_v20 = vmul.f32 %v816_v0, %v199_v10  ;;  %v239_v21 = vmul.f32 %v816_v0, %v200_v11 }
  0x34   : > { %v368_v23 = vsel %vm304_vm7, %v272_v2, %v336_v14  ;;  %vm305_vm8 = vcmp.gt.f32.partialorder %v273_v15, 0.0  ;;  %vm306_vm9 = vcmp.gt.f32.partialorder %v274_v16, 0.0  ;;  %v337_v24 = vmul.f32 0.1, %v273_v15 }
  0x35   : > { %v729_v25 = vpack.c.bf16 %v368_v23, %v367_v18  ;;  %v338_v26 = vmul.f32 0.1, %v274_v16  ;;  %v275_v27 = vadd.f32 %v826_v1, %v236_v17  ;;  %v276_v28 = vadd.f32 %v826_v1, %v237_v19 }
  0x36   : > { %v369_v29 = vsel %vm305_vm8, %v273_v15, %v337_v24  ;;  %v277_v30 = vadd.f32 %v826_v1, %v238_v20  ;;  %v278_v31 = vadd.f32 %v826_v1, %v239_v21  ;;  %v240_v33 = vmul.f32 %v816_v0, %v201_v22 }
  0x37   : > { %761 = vst [vmem:[%s854_s25 + $0x58] sm:$0xff] %v729_v25   ;;  %v370_v34 = vsel %vm306_vm9, %v274_v16, %v338_v26  ;;  %vm307_vm10 = vcmp.gt.f32.partialorder %v275_v27, 0.0  ;;  %vm308_vm11 = vcmp.gt.f32.partialorder %v276_v28, 0.0  ;;  %v339_v35 = vmul.f32 0.1, %v275_v27 }
  0x38   : > { %v734_v36 = vpack.c.bf16 %v370_v34, %v369_v29  ;;  %v340_v37 = vmul.f32 0.1, %v276_v28  ;;  %vm309_vm12 = vcmp.gt.f32.partialorder %v277_v30, 0.0  ;;  %vm310_vm13 = vcmp.gt.f32.partialorder %v278_v31, 0.0 }
  0x39   : > { %v371_v38 = vsel %vm307_vm10, %v275_v27, %v339_v35  ;;  %v341_v39 = vmul.f32 0.1, %v277_v30  ;;  %v342_v40 = vmul.f32 0.1, %v278_v31  ;;  %v241_v41 = vmul.f32 %v816_v0, %v202_v32 }
  0x3a   : > { %762 = vst [vmem:[%s854_s25 + $0x60] sm:$0xff] %v734_v36   ;;  %v372_v42 = vsel %vm308_vm11, %v276_v28, %v340_v37  ;;  %v279_v43 = vadd.f32 %v826_v1, %v240_v33 }
  0x3b   : > { %v739_v44 = vpack.c.bf16 %v372_v42, %v371_v38  ;;  %v373_v45 = vsel %vm309_vm12, %v277_v30, %v341_v39  ;;  %v374_v46 = vsel %vm310_vm13, %v278_v31, %v342_v40  ;;  %v280_v47 = vadd.f32 %v826_v1, %v241_v41 }
  0x3c   : > { %v744_v48 = vpack.c.bf16 %v374_v46, %v373_v45  ;;  %vm311_vm14 = vcmp.gt.f32.partialorder %v279_v43, 0.0  ;;  %v343_v49 = vmul.f32 0.1, %v279_v43 }
  0x3d   : > { %763 = vst [vmem:[%s854_s25 + $0x68] sm:$0xff] %v739_v44   ;;  %vm312_vm15 = vcmp.gt.f32.partialorder %v280_v47, 0.0  ;;  %v344_v50 = vmul.f32 0.1, %v280_v47 }
  0x3e   : > { %764 = vst [vmem:[%s854_s25 + $0x70] sm:$0xff] %v744_v48   ;;  %v375_v51 = vsel %vm311_vm14, %v279_v43, %v343_v49 }
  0x3f   : > { %v376_v52 = vsel %vm312_vm15, %v280_v47, %v344_v50 }
  0x40   : > { %v749_v0 = vpack.c.bf16 %v376_v52, %v375_v51 }
  0x42   : > { %765 = vst [vmem:[%s854_s25 + $0x78] sm:$0xff] %v749_v0  }
  0x43 PF: > { %s13_s12 = sadd.s32 1, %s780_s12  }
  0x44   : > { %p10_p4 = scmp.ge.s32.totalorder %s13_s12, 4  }
  0x46   :  { %12 = sbr.rel (!%p10_p4) target bundleno = 1 (0x1), region = 62 }

// kernel: convset_forward.12
= control target key start
LH: loop header
LB: loop body
LE: loop exit
PB: predicated region body
PF: predicated region fallthrough
CT: control target
= control target key end

     0   :  { %s6962_s12 = smov 0   ;;  %s8794_s0 = inlined_call_operand.vmem [shape: bf16[2,18,18,128], index: 0, kind: input, shape index: {}]   ;;  %s8795_s1 = inlined_call_operand.vmem [shape: bf16[3,3,128,128], index: 1, kind: input, shape index: {}]   ;;  %s8796_s2 = inlined_call_operand.vmem [shape: f32[2,256,128], index: 2, kind: output, shape index: {0}]   ;;  %s8797_s3 = inlined_call_operand.vmem [shape: f32[2,2,128], index: 3, kind: output, shape index: {1}]  }
   0x1 LB: > { %s5219_s13 = sadd.s32 4294967295, %s6940_s12   ;;  %p5223_p0 = scmp.ge.s32.totalorder %s6940_s12, 1  ;;  %s6940_s12 = sphi %s6962_s12, %s14_s12  }
   0x2   : > { %p140_p1 = scmp.lt.s32.totalorder %s6940_s12, 3 }
   0x4   : > { %p141_p2 = pnand %p5223_p0, %p140_p1 }
   0x6   : > { %144 = sbr.rel (%p141_p2) target bundleno = 604 (0x25c), region = 28 }
   0xd   : > { %v6744_v0 = vld [vmem:[%s8795_s1 + $0x40] sm:$0xff]   ;;  %p168_p3 = scmp.lt.s32.totalorder %s5219_s13, 1  ;;  %v6746_v2 = vld [vmem:[%s8795_s1 + $0x48] sm:$0xff]   ;;  %v6748_v4 = vld [vmem:[%s8795_s1 + $0x50] sm:$0xff]   ;;  %vm247_vm0 = vsmask.f32 3328 }
   0xe   : > { %v6745_v1 = vld [vmem:[%s8795_s1 + $0x100] sm:$0xff]   ;;  %6031 = vmatprep.subr.bf16.mxu1 %v6744_v0  ;;  %v6747_v3 = vld [vmem:[%s8795_s1 + $0x108] sm:$0xff]   ;;  %v6749_v5 = vld [vmem:[%s8795_s1 + $0x110] sm:$0xff]   ;;  %vm248_vm1 = vsmask.f32 7440  ;;  %vm1277_vm3 = vcmask 1042432  }
   0xf   : > { %6223 = vmatprep.subr.bf16.mxu0 %v6745_v1  ;;  %6032 = vmatpush3.bf16.msra.mxu1 %v6744_v0  ;;  %s8865_s13 = smov (!%p168_p3, %s5219_s13), 1  ;;  %v6750_v6 = vld [vmem:[%s8795_s1 + $0x58] sm:$0xff]   ;;  %v6752_v8 = vld [vmem:[%s8795_s1 + $0x60] sm:$0xff]   ;;  %v6754_v10 = vld [vmem:[%s8795_s1 + $0x68] sm:$0xff]   ;;  %vm1278_vm4 = vcmask 1046532   ;;  %vm5130_vm6 = vcmask 1040384  }
  0x10   : > { %6224 = vmatpush3.bf16.msra.mxu0 %v6745_v1  ;;  %6033 = vmatprep.subr.bf16.mxu1 %v6746_v2  ;;  %v6751_v7 = vld [vmem:[%s8795_s1 + $0x118] sm:$0xff]   ;;  %s6735_s30 = smul.u32 216, %s8865_s13  ;;  %v6753_v9 = vld [vmem:[%s8795_s1 + $0x120] sm:$0xff]   ;;  %v6755_v11 = vld [vmem:[%s8795_s1 + $0x128] sm:$0xff]   ;;  %s5227_s9 = sshll.u32 %s8865_s13, 1 }
  0x11   : > { %6225 = vmatprep.subr.bf16.mxu0 %v6747_v3  ;;  %v6756_v25 = vld [vmem:[%s8795_s1 + $0x70] sm:$0xff]   ;;  %v6758_v36 = vld [vmem:[%s8795_s1 + $0x78] sm:$0xff]   ;;  %vm7038_vm2 = vmor %vm247_vm0, %vm248_vm1  ;;  %s181_s15 = scalar_lea.vmem %s8797_s3, %s5227_s9 }
  0x12   : > { %s7006_s10 = scalar_lea.vmem %s8794_s0, %s6735_s30  ;;  %v6757_v30 = vld [vmem:[%s8795_s1 + $0x130] sm:$0xff]   ;;  %v6759_v51 = vld [vmem:[%s8795_s1 + $0x138] sm:$0xff]   ;;  %vm7284_vm5 = vmor %vm1277_vm3, %vm1278_vm4 }
  0x13   : > { %6034 = vmatpush3.bf16.msra.mxu1 %v6746_v2  ;;  %v183_v12 = vld [vmem:[%s7006_s10] sm:$0xf]  ;;  %v184_v13 = vld [vmem:[%s7006_s10 + $0x4] sm:$0xf]  ;;  %v231_v14 = vld [vmem:[%s7006_s10 + $0x8] sm:$0x1] }
  0x14   : > { %6226 = vmatpush3.bf16.msra.mxu0 %v6747_v3  ;;  %6035 = vmatprep.subr.bf16.mxu1 %v6748_v4  ;;  %v251_v15 = vshrl.u32 %v183_v12, 16  ;;  %v254_v16 = vshll.u32 %v183_v12, 16  ;;  %v260_v17 = vshll.u32 %v184_v13, 16  ;;  %v264_v18 = vshrl.u32 %v184_v13, 16  ;;  %v5420_v20 = vld [vmem:[%s7006_s10 + $0xc] sm:$0xf] }
  0x15   : > { %6227 = vmatprep.subr.bf16.mxu0 %v6749_v5  ;;  %v270_v19 = vshll.u32 %v231_v14, 16  ;;  %v7019_v23 = vld [vmem:[%s7006_s10 + $0x10] sm:$0xf]  ;;  %v7022_v24 = vld [vmem:[%s7006_s10 + $0x14] sm:$0x1]  ;;  %v2150_v29 = vshrl.u32 %v5420_v20, 16 }
  0x16   : > { %v253_v21 = vrot.slane %v251_v15, 4  ;;  %v256_v22 = vrot.slane %v254_v16, 5  ;;  %v262_v26 = vrot.slane %v260_v17, 5  ;;  %v266_v27 = vrot.slane %v264_v18, 4  ;;  %v185_v35 = vld [vmem:[%s7006_s10 + $0xc] sm:$0xf] }
  0x17   : > { %6036 = vmatpush3.bf16.msra.mxu1 %v6748_v4  ;;  %v272_v28 = vrot.slane %v270_v19, 5  ;;  %v2153_v32 = vshll.u32 %v5420_v20, 16  ;;  %v2159_v33 = vshll.u32 %v7019_v23, 16  ;;  %v2163_v34 = vshrl.u32 %v7019_v23, 16  ;;  %v186_v42 = vld [vmem:[%s7006_s10 + $0x10] sm:$0xf] }
  0x18   : > { %6228 = vmatpush3.bf16.msra.mxu0 %v6749_v5  ;;  %6037 = vmatprep.subr.bf16.mxu1 %v6750_v6  ;;  %v257_v31 = vor.u32 %v256_v22, %v253_v21  ;;  %v267_v38 = vor.u32 %v266_v27, %v262_v26  ;;  %v2152_v39 = vrot.slane %v2150_v29, 4  ;;  %v2169_v40 = vshll.u32 %v7022_v24, 16  ;;  %v232_v55 = vld [vmem:[%s7006_s10 + $0x14] sm:$0x1]  ;;  %v5423_v57 = vld [vmem:[%s7006_s10 + $0x18] sm:$0xf] }
  0x19   : > { %6229 = vmatprep.subr.bf16.mxu0 %v6751_v7  ;;  %v2924_v41 = vrot.slane %v7022_v24, 5  ;;  %v2155_v44 = vrot.slane %v2153_v32, 5  ;;  %v2161_v45 = vrot.slane %v2159_v33, 5  ;;  %v2165_v46 = vrot.slane %v2163_v34, 4  ;;  %v7055_v62 = vld [vmem:[%s7006_s10 + $0x1c] sm:$0xf] }
  0x1a   : > { %v258_v43 = vrot.slane %v257_v31, 4  ;;  %v268_v47 = vrot.slane %v267_v38, 4  ;;  %v2171_v48 = vrot.slane %v2169_v40, 5  ;;  %v275_v49 = vshrl.u32 %v185_v35, 16  ;;  %v6760_v3 = vld [vmem:[%s8795_s1] sm:$0xff]  }
  0x1b   : > { %6038 = vmatpush3.bf16.msra.mxu1 %v6750_v6  ;;  %v278_v50 = vshll.u32 %v185_v35, 16  ;;  %v2156_v53 = vor.u32 %v2155_v44, %v2152_v39  ;;  %v2166_v54 = vor.u32 %v2165_v46, %v2161_v45  ;;  %v284_v56 = vshll.u32 %v186_v42, 16  ;;  %v7063_v4 = vld [vmem:[%s8795_s1 + $0x140] sm:$0xff]   ;;  %v187_v21 = vld [vmem:[%s7006_s10 + $0x18] sm:$0xf]  ;;  %v6763_v46 = vld [vmem:[%s8795_s1 + $0x8] sm:$0xff]  }
  0x1c   : > { %6230 = vmatpush3.bf16.msra.mxu0 %v6751_v7  ;;  %6039 = vmatprep.subr.bf16.mxu1 %v6752_v8  ;;  %v263_v52 = vsel %vm7038_vm2, %v258_v43, %v262_v26  ;;  %v273_v58 = vsel %vm7038_vm2, %v268_v47, %v272_v28  ;;  %v277_v59 = vrot.slane %v275_v49, 4  ;;  %v288_v61 = vshrl.u32 %v186_v42, 16  ;;  %v188_v28 = vld [vmem:[%s7006_s10 + $0x1c] sm:$0xf]  ;;  %v233_v33 = vld [vmem:[%s7006_s10 + $0x20] sm:$0x1] }
  0x1d   : > { %6231 = vmatprep.subr.bf16.mxu0 %v6753_v9  ;;  %v280_v60 = vrot.slane %v278_v50, 5  ;;  %v5244_v63 = vcombine.low %v263_v52, %v273_v58  ;;  %v2157_v0 = vrot.slane %v2156_v53, 4  ;;  %v2167_v1 = vrot.slane %v2166_v54, 4  ;;  %v5426_v39 = vld [vmem:[%s7006_s10 + $0x24] sm:$0xf] }
  0x1e   : > { %v286_v2 = vrot.slane %v284_v56, 5  ;;  %v290_v6 = vrot.slane %v288_v61, 4  ;;  %v294_v7 = vshll.u32 %v232_v55, 16  ;;  %v2177_v12 = vshll.u32 %v5423_v57, 16  ;;  %v189_v52 = vld [vmem:[%s7006_s10 + $0x24] sm:$0xf] }
  0x1f   : > { %6040 = vmatpush3.bf16.msra.mxu1 %v6752_v8  ;;  %v281_v5 = vor.u32 %v280_v60, %v277_v59  ;;  %v7066_v8 = vld [vmem:[%s7006_s10 + $0x20] sm:$0x1]  ;;  %6047 = vmatprep.mubr.bf16.mxu1 %v5244_v63  ;;  %v2183_v19 = vshll.u32 %v7055_v62, 16  ;;  %v2187_v20 = vshrl.u32 %v7055_v62, 16  ;;  %v2928_v27 = vrot.slane %v7055_v62, 5  ;;  %v6762_v63 = vld [vmem:[%s8795_s1 + $0x148] sm:$0xff]  }
  0x20   : > { %6232 = vmatpush3.bf16.msra.mxu0 %v6753_v9  ;;  %6041 = vmatprep.subr.bf16.mxu1 %v6754_v10  ;;  %v2162_v9 = vsel %vm7038_vm2, %v2157_v0, %v2161_v45  ;;  %v291_v15 = vor.u32 %v290_v6, %v286_v2  ;;  %v296_v16 = vrot.slane %v294_v7, 5  ;;  %v2179_v18 = vrot.slane %v2177_v12, 5  ;;  %v7091_v45 = vld [vmem:[%s7006_s10 + $0x28] sm:$0xf] }
  0x21   : > { %6233 = vmatprep.subr.bf16.mxu0 %v6755_v11  ;;  %v282_v14 = vrot.slane %v281_v5, 4  ;;  %v2193_v26 = vshll.u32 %v7066_v8, 16  ;;  %v2189_v31 = vrot.slane %v2187_v20, 4  ;;  %v2931_v32 = vrot.slane %v7066_v8, 5  ;;  %v190_v5 = vld [vmem:[%s7006_s10 + $0x28] sm:$0xf] }
  0x22   : > { %v299_v38 = vshrl.u32 %v187_v21, 16  ;;  %v302_v44 = vshll.u32 %v187_v21, 16  ;;  %v312_v49 = vshrl.u32 %v188_v28, 16  ;;  %v318_v50 = vshll.u32 %v233_v33, 16  ;;  %v7122_v33 = vld [vmem:[%s7006_s10 + $0x34] sm:$0xf] }
  0x23   : > { %6042 = vmatpush3.bf16.msra.mxu1 %v6754_v10  ;;  %v2172_v10 = vsel %vm7038_vm2, %v2167_v1, %v2171_v48  ;;  %v287_v22 = vsel %vm7038_vm2, %v282_v14, %v286_v2  ;;  %v2195_v35 = vrot.slane %v2193_v26, 5  ;;  %v308_v48 = vshll.u32 %v188_v28, 16 }
  0x24   : > { %6234 = vmatpush3.bf16.msra.mxu0 %v6755_v11  ;;  %6043 = vmatprep.subr.bf16.mxu1 %v6756_v25  ;;  %v2174_v11 = vshrl.u32 %v5423_v57, 16  ;;  %v5484_v13 = vcombine.low %v2162_v9, %v2172_v10  ;;  %v301_v47 = vrot.slane %v299_v38, 4  ;;  %v304_v55 = vrot.slane %v302_v44, 5 }
  0x25   : > { %6235 = vmatprep.subr.bf16.mxu0 %v6757_v30  ;;  %v2198_v56 = vshrl.u32 %v5426_v39, 16  ;;  %v310_v57 = vrot.slane %v308_v48, 5  ;;  %v314_v58 = vrot.slane %v312_v49, 4  ;;  %v320_v59 = vrot.slane %v318_v50, 5  ;;  %v6765_v48 = vld [vmem:[%s8795_s1 + $0x158] sm:$0xff]  }
  0x26   : > { %v2176_v17 = vrot.slane %v2174_v11, 4  ;;  %6239 = vmatprep.mubr.bf16.mxu0 %v5484_v13  ;;  %v2201_v60 = vshll.u32 %v5426_v39, 16  ;;  %v305_v0 = vor.u32 %v304_v55, %v301_v47  ;;  %v2207_v2 = vshll.u32 %v7091_v45, 16  ;;  %v234_v11 = vld [vmem:[%s7006_s10 + $0x2c] sm:$0x1] }
  0x27   : > { %6044 = vmatpush3.bf16.msra.mxu1 %v6756_v25  ;;  %v292_v25 = vrot.slane %v291_v15, 4  ;;  %v2200_v1 = vrot.slane %v2198_v56, 4  ;;  %v315_v7 = vor.u32 %v314_v58, %v310_v57  ;;  %v2211_v10 = vshrl.u32 %v7091_v45, 16 }
  0x28   : > { %6236 = vmatpush3.bf16.msra.mxu0 %v6757_v30  ;;  %6045 = vmatprep.subr.bf16.mxu1 %v6758_v36  ;;  %v2180_v29 = vor.u32 %v2179_v18, %v2176_v17  ;;  %v2185_v30 = vrot.slane %v2183_v19, 5  ;;  %v2203_v9 = vrot.slane %v2201_v60, 5  ;;  %v306_v12 = vrot.slane %v305_v0, 4  ;;  %v6772_v60 = vld [vmem:[%s8795_s1 + $0x20] sm:$0xff]  }
  0x29   : > { %6237 = vmatprep.subr.bf16.mxu0 %v6759_v51  ;;  %v297_v34 = vsel %vm7038_vm2, %v292_v25, %v296_v16  ;;  %v2209_v13 = vrot.slane %v2207_v2, 5  ;;  %v323_v15 = vshrl.u32 %v189_v52, 16  ;;  %v5429_v16 = vld [vmem:[%s7006_s10 + $0x30] sm:$0xf]  ;;  %v316_v17 = vrot.slane %v315_v7, 4 }
  0x2a   : > { %v5245_v40 = vcombine.low %v287_v22, %v297_v34  ;;  %v2181_v42 = vrot.slane %v2180_v29, 4  ;;  %v2190_v43 = vor.u32 %v2189_v31, %v2185_v30  ;;  %v2204_v18 = vor.u32 %v2203_v9, %v2200_v1  ;;  %v6769_v34 = vld [vmem:[%s8795_s1 + $0x18] sm:$0xff]  }
  0x2b   : > { %6046 = vmatpush3.bf16.msra.mxu1 %v6758_v36  ;;  %v7087_v36 = vrot.slane %v2928_v27, 4  ;;  %v2213_v19 = vrot.slane %v2211_v10, 4  ;;  %v326_v20 = vshll.u32 %v189_v52, 16  ;;  %v311_v21 = vsel %vm7038_vm2, %v306_v12, %v310_v57  ;;  %v235_v2 = vld [vmem:[%s7006_s10 + $0x38] sm:$0x1] }
  0x2c   : > { %6238 = vmatpush3.bf16.msra.mxu0 %v6759_v51  ;;  %6079 = vmatprep.subr.bf16.mxu1 %v6760_v3  ;;  %v7097_v51 = vld [vmem:[%s7006_s10 + $0x2c] sm:$0x1]  ;;  %v2186_v53 = vsel %vm7038_vm2, %v2181_v42, %v2185_v30  ;;  %v2191_v54 = vrot.slane %v2190_v43, 4  ;;  %v325_v25 = vrot.slane %v323_v15, 4  ;;  %v332_v26 = vshll.u32 %v190_v5, 16 }
  0x2d   : > { %6271 = vmatprep.subr.bf16.mxu0 %v7063_v4  ;;  %v2217_v14 = vshll.u32 %v7097_v51, 16  ;;  %v321_v28 = vsel %vm7038_vm2, %v316_v17, %v320_v59  ;;  %v2205_v29 = vrot.slane %v2204_v18, 4  ;;  %v2214_v30 = vor.u32 %v2213_v19, %v2209_v13  ;;  %v192_v59 = vld [vmem:[%s7006_s10 + $0x34] sm:$0xf]  ;;  %v5432_v9 = vld [vmem:[%s7006_s10 + $0x3c] sm:$0xf] }
  0x2e   : > { %6048 = vmatmul.mubr.bf16.vlgmr.msra.gmra.mrb[0].mxu1 %v5245_v40  ;;  %v2196_v61 = vsel %vm7038_vm2, %v2191_v54, %v2195_v35  ;;  %v328_v31 = vrot.slane %v326_v20, 5  ;;  %v5246_v35 = vcombine.low %v311_v21, %v321_v28  ;;  %v334_v38 = vrot.slane %v332_v26, 5  ;;  %v191_v54 = vld [vmem:[%s7006_s10 + $0x30] sm:$0xf]  ;;  %v7156_v19 = vld [vmem:[%s7006_s10 + $0x40] sm:$0xf] }
  0x2f   : > { %6080 = vmatpush3.bf16.msra.mxu1 %v6760_v3  ;;  %v6766_v3 = vld [vmem:[%s8795_s1 + $0x10] sm:$0xff]   ;;  %v5485_v6 = vcombine.low %v2186_v53, %v2196_v61  ;;  %v2219_v22 = vrot.slane %v2217_v14, 5  ;;  %v336_v39 = vshrl.u32 %v190_v5, 16  ;;  %v342_v40 = vshll.u32 %v234_v11, 16  ;;  %v6774_v14 = vld [vmem:[%s8795_s1 + $0x28] sm:$0xff]   ;;  %v6767_v20 = vld [vmem:[%s8795_s1 + $0x160] sm:$0xff]  }
  0x30   : > { %6081 = vmatprep.subr.bf16.mxu1 %v6763_v46  ;;  %v2210_v42 = vsel %vm7038_vm2, %v2205_v29, %v2209_v13  ;;  %v2215_v43 = vrot.slane %v2214_v30, 4  ;;  %v329_v44 = vor.u32 %v328_v31, %v325_v25  ;;  %v2222_v47 = vshrl.u32 %v5429_v16, 16  ;;  %6051 = vmatprep.mubr.bf16.mxu1 %v5246_v35  ;;  %v7164_v28 = vld [vmem:[%s7006_s10 + $0x44] sm:$0x1]  ;;  %v6776_v35 = vld [vmem:[%s8795_s1 + $0x30] sm:$0xff]  }
  0x31   : > { %6240 = vmatmul.mubr.bf16.vlgmr.msra.gmra.mrb[0].mxu0 %v5485_v6  ;;  %v338_v49 = vrot.slane %v336_v39, 4  ;;  %v344_v50 = vrot.slane %v342_v40, 5  ;;  %v2225_v52 = vshll.u32 %v5429_v16, 16  ;;  %v2231_v53 = vshll.u32 %v7122_v33, 16 }
  0x32   : > { %6272 = vmatpush3.bf16.msra.mxu0 %v7063_v4  ;;  %v6764_v4 = vld [vmem:[%s8795_s1 + $0x150] sm:$0xff]   ;;  %v2220_v55 = vsel %vm7038_vm2, %v2215_v43, %v2219_v22  ;;  %v330_v56 = vrot.slane %v329_v44, 4  ;;  %v2224_v57 = vrot.slane %v2222_v47, 4  ;;  %v2235_v58 = vshrl.u32 %v7122_v33, 16 }
  0x33   : > { %6082 = vmatpush3.bf16.msra.mxu1 %v6763_v46  ;;  %6273 = vmatprep.subr.bf16.mxu0 %v6762_v63  ;;  %v7133_v46 = vld [vmem:[%s7006_s10 + $0x38] sm:$0x1]  ;;  %v5486_v61 = vcombine.low %v2210_v42, %v2220_v55  ;;  %v2227_v0 = vrot.slane %v2225_v52, 5  ;;  %v2233_v1 = vrot.slane %v2231_v53, 5  ;;  %v347_v7 = vshrl.u32 %v191_v54, 16 }
  0x34   : > { %6083 = vmatprep.subr.bf16.mxu1 %v6766_v3  ;;  %v335_v5 = vsel %vm7038_vm2, %v330_v56, %v334_v38  ;;  %v2241_v6 = vshll.u32 %v7133_v46, 16  ;;  %v350_v12 = vshll.u32 %v191_v54, 16  ;;  %v356_v13 = vshll.u32 %v192_v59, 16  ;;  %v194_v55 = vld [vmem:[%s7006_s10 + $0x40] sm:$0xf] }
  0x35   : > { %6243 = vmatprep.mubr.bf16.mxu0 %v5486_v61  ;;  %v2228_v11 = vor.u32 %v2227_v0, %v2224_v57  ;;  %v349_v17 = vrot.slane %v347_v7, 4  ;;  %v360_v18 = vshrl.u32 %v192_v59, 16  ;;  %v2246_v40 = vshrl.u32 %v5432_v9, 16 }
  0x36   : > { %6274 = vmatpush3.bf16.msra.mxu0 %v6762_v63  ;;  %v339_v63 = vor.u32 %v338_v49, %v334_v38  ;;  %v2243_v16 = vrot.slane %v2241_v6, 5  ;;  %v352_v25 = vrot.slane %v350_v12, 5  ;;  %v358_v26 = vrot.slane %v356_v13, 5 }
  0x37   : > { %6084 = vmatpush3.bf16.msra.mxu1 %v6766_v3  ;;  %6275 = vmatprep.subr.bf16.mxu0 %v6764_v4  ;;  %v2237_v3 = vrot.slane %v2235_v58, 4  ;;  %v2229_v22 = vrot.slane %v2228_v11, 4  ;;  %v362_v31 = vrot.slane %v360_v18, 4  ;;  %v2249_v42 = vshll.u32 %v5432_v9, 16  ;;  %v5435_v9 = vld [vmem:[%s7006_s10 + $0x48] sm:$0xf] }
  0x38   : > { %6085 = vmatprep.subr.bf16.mxu1 %v6769_v34  ;;  %v340_v10 = vrot.slane %v339_v63, 4  ;;  %v353_v39 = vor.u32 %v352_v25, %v349_v17  ;;  %v2255_v49 = vshll.u32 %v7156_v19, 16  ;;  %v2248_v53 = vrot.slane %v2246_v40, 4  ;;  %v236_v63 = vld [vmem:[%s7006_s10 + $0x44] sm:$0x1] }
  0x39   : > { %v2238_v15 = vor.u32 %v2237_v3, %v2233_v1  ;;  %v2234_v38 = vsel %vm7038_vm2, %v2229_v22, %v2233_v1  ;;  %v363_v44 = vor.u32 %v362_v31, %v358_v26  ;;  %v2251_v54 = vrot.slane %v2249_v42, 5  ;;  %v7197_v22 = vld [vmem:[%s7006_s10 + $0x50] sm:$0x1]  ;;  %v6771_v31 = vld [vmem:[%s8795_s1 + $0x178] sm:$0xff]  }
  0x3a   : > { %6276 = vmatpush3.bf16.msra.mxu0 %v6764_v4  ;;  %v345_v21 = vsel %vm7038_vm2, %v340_v10, %v344_v50  ;;  %v366_v4 = vshll.u32 %v235_v2, 16  ;;  %v354_v52 = vrot.slane %v353_v39, 4  ;;  %v2257_v57 = vrot.slane %v2255_v49, 5  ;;  %v6778_v2 = vld [vmem:[%s8795_s1 + $0x38] sm:$0xff]  }
  0x3b   : > { %6086 = vmatpush3.bf16.msra.mxu1 %v6769_v34  ;;  %6277 = vmatprep.subr.bf16.mxu0 %v6765_v48  ;;  %v5247_v29 = vcombine.low %v335_v5, %v345_v21  ;;  %v2239_v30 = vrot.slane %v2238_v15, 4  ;;  %v193_v34 = vld [vmem:[%s7006_s10 + $0x3c] sm:$0xf]  ;;  %v364_v56 = vrot.slane %v363_v44, 4  ;;  %v2259_v58 = vshrl.u32 %v7156_v19, 16  ;;  %v6770_v15 = vld [vmem:[%s8795_s1 + $0x170] sm:$0xff]  }
  0x3c   : > { %6087 = vmatprep.subr.bf16.mxu1 %v6772_v60  ;;  %v368_v47 = vrot.slane %v366_v4, 5  ;;  %v2265_v59 = vshll.u32 %v7164_v28, 16  ;;  %v2252_v61 = vor.u32 %v2251_v54, %v2248_v53  ;;  %v371_v0 = vshrl.u32 %v193_v34, 16  ;;  %v7208_v4 = vld [vmem:[%s8795_s1 + $0x80] sm:$0xff]   ;;  %v196_v53 = vld [vmem:[%s7006_s10 + $0x4c] sm:$0xf] }
  0x3d   : > { %6052 = vmatmul.mubr.bf16.gmra.mrb[4].mxu1 %v5247_v29  ;;  %v2244_v43 = vsel %vm7038_vm2, %v2239_v30, %v2243_v16  ;;  %v374_v1 = vshll.u32 %v193_v34, 16  ;;  %v2261_v3 = vrot.slane %v2259_v58, 4  ;;  %v380_v7 = vshll.u32 %v194_v55, 16  ;;  %v195_v30 = vld [vmem:[%s7006_s10 + $0x48] sm:$0xf] }
  0x3e   : > { %6278 = vmatpush3.bf16.msra.mxu0 %v6765_v48  ;;  %v5487_v50 = vcombine.low %v2234_v38, %v2244_v43  ;;  %v6768_v48 = vld [vmem:[%s8795_s1 + $0x168] sm:$0xff]   ;;  %v369_v5 = vsel %vm7038_vm2, %v364_v56, %v368_v47  ;;  %v2267_v6 = vrot.slane %v2265_v59, 5  ;;  %v2253_v11 = vrot.slane %v2252_v61, 4  ;;  %v237_v54 = vld [vmem:[%s7006_s10 + $0x50] sm:$0x1] }
  0x3f   : > { %6088 = vmatpush3.bf16.msra.mxu1 %v6772_v60  ;;  %6279 = vmatprep.subr.bf16.mxu0 %v6767_v20  ;;  %v359_v60 = vsel %vm7038_vm2, %v354_v52, %v358_v26  ;;  %v373_v12 = vrot.slane %v371_v0, 4  ;;  %v376_v13 = vrot.slane %v374_v1, 5  ;;  %v2262_v16 = vor.u32 %v2261_v3, %v2257_v57  ;;  %v5438_v58 = vld [vmem:[%s7006_s10 + $0x54] sm:$0xf]  ;;  %v7222_v0 = vld [vmem:[%s7006_s10 + $0x58] sm:$0xf] }
  0x40   : > { %6089 = vmatprep.subr.bf16.mxu1 %v6774_v14  ;;  %6244 = vmatmul.mubr.bf16.gmra.mrb[4].mxu0 %v5487_v50  ;;  %v5248_v10 = vcombine.low %v359_v60, %v369_v5  ;;  %v382_v17 = vrot.slane %v380_v7, 5  ;;  %v384_v18 = vshrl.u32 %v194_v55, 16  ;;  %v390_v21 = vshll.u32 %v236_v63, 16 }
  0x41   : > { %v377_v25 = vor.u32 %v376_v13, %v373_v12  ;;  %v2270_v26 = vshrl.u32 %v5435_v9, 16  ;;  %v2273_v29 = vshll.u32 %v5435_v9, 16  ;;  %v2263_v34 = vrot.slane %v2262_v16, 4 }
  0x42   : > { %6280 = vmatpush3.bf16.msra.mxu0 %v6767_v20  ;;  %6055 = vmatprep.mubr.bf16.mxu1 %v5248_v10  ;;  %v2258_v20 = vsel %vm7038_vm2, %v2253_v11, %v2257_v57  ;;  %v392_v38 = vrot.slane %v390_v21, 5  ;;  %v2289_v52 = vshll.u32 %v7197_v22, 16  ;;  %v395_v61 = vshrl.u32 %v195_v30, 16 }
  0x43   : > { %6090 = vmatpush3.bf16.msra.mxu1 %v6774_v14  ;;  %v7191_v14 = vld [vmem:[%s7006_s10 + $0x4c] sm:$0xf]  ;;  %6281 = vmatprep.subr.bf16.mxu0 %v6768_v48  ;;  %v378_v40 = vrot.slane %v377_v25, 4  ;;  %v2272_v42 = vrot.slane %v2270_v26, 4  ;;  %v2275_v43 = vrot.slane %v2273_v29, 5  ;;  %v2268_v47 = vsel %vm7038_vm2, %v2263_v34, %v2267_v6  ;;  %v7227_v6 = vld [vmem:[%s8795_s1 + $0x180] sm:$0xff]  }
  0x44   : > { %6091 = vmatprep.subr.bf16.mxu1 %v6776_v35  ;;  %v2279_v39 = vshll.u32 %v7191_v14, 16  ;;  %v2283_v44 = vshrl.u32 %v7191_v14, 16  ;;  %v5488_v55 = vcombine.low %v2258_v20, %v2268_v47  ;;  %v2291_v60 = vrot.slane %v2289_v52, 5  ;;  %v7234_v20 = vld [vmem:[%s7006_s10 + $0x5c] sm:$0x1] }
  0x45   : > { %v2276_v56 = vor.u32 %v2275_v43, %v2272_v42  ;;  %v398_v63 = vshll.u32 %v195_v30, 16  ;;  %v408_v3 = vshrl.u32 %v196_v53, 16  ;;  %v397_v9 = vrot.slane %v395_v61, 4  ;;  %v198_v43 = vld [vmem:[%s7006_s10 + $0x58] sm:$0xf] }
  0x46   : > { %6282 = vmatpush3.bf16.msra.mxu0 %v6768_v48  ;;  %v2281_v50 = vrot.slane %v2279_v39, 5  ;;  %v383_v48 = vsel %vm7038_vm2, %v378_v40, %v382_v17  ;;  %v2285_v57 = vrot.slane %v2283_v44, 4  ;;  %6247 = vmatprep.mubr.bf16.mxu0 %v5488_v55  ;;  %v414_v11 = vshll.u32 %v237_v54, 16  ;;  %v5441_v52 = vld [vmem:[%s7006_s10 + $0x60] sm:$0xf] }
  0x47   : > { %6092 = vmatpush3.bf16.msra.mxu1 %v6776_v35  ;;  %v386_v35 = vrot.slane %v384_v18, 4  ;;  %6283 = vmatprep.subr.bf16.mxu0 %v6770_v15  ;;  %v2277_v1 = vrot.slane %v2276_v56, 4  ;;  %v400_v10 = vrot.slane %v398_v63, 5  ;;  %v410_v18 = vrot.slane %v408_v3, 4 }
  0x48   : > { %6093 = vmatprep.subr.bf16.mxu1 %v6778_v2  ;;  %v2286_v5 = vor.u32 %v2285_v57, %v2281_v50  ;;  %v416_v21 = vrot.slane %v414_v11, 5  ;;  %v2294_v25 = vshrl.u32 %v5438_v58, 16  ;;  %v2297_v29 = vshll.u32 %v5438_v58, 16 }
  0x49   : > { %v387_v49 = vor.u32 %v386_v35, %v382_v17  ;;  %v2282_v13 = vsel %vm7038_vm2, %v2277_v1, %v2281_v50  ;;  %v401_v17 = vor.u32 %v400_v10, %v397_v9  ;;  %v2303_v30 = vshll.u32 %v7222_v0, 16  ;;  %v197_v35 = vld [vmem:[%s7006_s10 + $0x54] sm:$0xf]  ;;  %v238_v50 = vld [vmem:[%s7006_s10 + $0x5c] sm:$0x1] }
  0x4a   : > { %6284 = vmatpush3.bf16.msra.mxu0 %v6770_v15  ;;  %v2287_v15 = vrot.slane %v2286_v5, 4  ;;  %v2307_v34 = vshrl.u32 %v7222_v0, 16  ;;  %v2296_v42 = vrot.slane %v2294_v25, 4  ;;  %v419_v55 = vshrl.u32 %v197_v35, 16  ;;  %v7262_v25 = vld [vmem:[%s7006_s10 + $0x60] sm:$0xf] }
  0x4b   : > { %6094 = vmatpush3.bf16.msra.mxu1 %v6778_v2  ;;  %v388_v59 = vrot.slane %v387_v49, 4  ;;  %v404_v2 = vshll.u32 %v196_v53, 16  ;;  %6285 = vmatprep.subr.bf16.mxu0 %v6771_v31  ;;  %v402_v39 = vrot.slane %v401_v17, 4  ;;  %v2305_v44 = vrot.slane %v2303_v30, 5  ;;  %v7258_v17 = vld [vmem:[%s7006_s10 + $0x68] sm:$0x1] }
  0x4c   : > { %6127 = vmatprep.subr.bf16.mxu1 %v7208_v4  ;;  %v2292_v26 = vsel %vm7038_vm2, %v2287_v15, %v2291_v60  ;;  %v2309_v47 = vrot.slane %v2307_v34, 4  ;;  %v2313_v49 = vshll.u32 %v7234_v20, 16  ;;  %v7249_v60 = vld [vmem:[%s7006_s10 + $0x64] sm:$0xf]  ;;  %v421_v63 = vrot.slane %v419_v55, 4 }
  0x4d   : > { %v393_v7 = vsel %vm7038_vm2, %v388_v59, %v392_v38  ;;  %v406_v16 = vrot.slane %v404_v2, 5  ;;  %v5489_v38 = vcombine.low %v2282_v13, %v2292_v26  ;;  %v428_v59 = vshll.u32 %v198_v43, 16 }
  0x4e   : > { %v5249_v12 = vcombine.low %v383_v48, %v393_v7  ;;  %6286 = vmatpush3.bf16.msra.mxu0 %v6771_v31  ;;  %v2299_v31 = vrot.slane %v2297_v29, 5  ;;  %v422_v48 = vshll.u32 %v197_v35, 16  ;;  %v2310_v57 = vor.u32 %v2309_v47, %v2305_v44  ;;  %v7265_v35 = vld [vmem:[%s7006_s10 + $0x64] sm:$0xf] }
  0x4f   : > { %6319 = vmatprep.subr.bf16.mxu0 %v7227_v6  ;;  %v411_v40 = vor.u32 %v410_v18, %v406_v16  ;;  %6248 = vmatmul.mubr.bf16.gmra.mrb[8].mxu0 %v5489_v38  ;;  %v407_v53 = vsel %vm7038_vm2, %v402_v39, %v406_v16  ;;  %v2315_v58 = vrot.slane %v2313_v49, 5  ;;  %v432_v5 = vshrl.u32 %v198_v43, 16  ;;  %v239_v43 = vld [vmem:[%s7006_s10 + $0x68] sm:$0x1] }
  0x50   : > { %6056 = vmatmul.mubr.bf16.gmra.mrb[8].mxu1 %v5249_v12  ;;  %v2300_v56 = vor.u32 %v2299_v31, %v2296_v42  ;;  %v424_v1 = vrot.slane %v422_v48, 5  ;;  %v2311_v7 = vrot.slane %v2310_v57, 4  ;;  %v430_v9 = vrot.slane %v428_v59, 5 }
  0x51   : > { %v412_v54 = vrot.slane %v411_v40, 4  ;;  %v434_v11 = vrot.slane %v432_v5, 4  ;;  %v438_v12 = vshll.u32 %v238_v50, 16  ;;  %v2318_v13 = vshrl.u32 %v5441_v52, 16  ;;  %v5508_v50 = vld [vmem:[%s7006_s10 + $0xc] sm:$0xe] }
  0x52   : > { %v2301_v3 = vrot.slane %v2300_v56, 4  ;;  %v425_v10 = vor.u32 %v424_v1, %v421_v63  ;;  %v2316_v16 = vsel %vm7038_vm2, %v2311_v7, %v2315_v58  ;;  %v2321_v18 = vshll.u32 %v5441_v52, 16  ;;  %v7280_v5 = vld [vmem:[%s7006_s10 + $0x6c] sm:$0xf] }
  0x53   : > { %v417_v61 = vsel %vm7038_vm2, %v412_v54, %v416_v21  ;;  %v2327_v21 = vshll.u32 %v7249_v60, 16  ;;  %v435_v30 = vor.u32 %v434_v11, %v430_v9  ;;  %v440_v34 = vrot.slane %v438_v12, 5 }
  0x54   : > { %v5250_v2 = vcombine.low %v407_v53, %v417_v61  ;;  %v2306_v15 = vsel %vm7038_vm2, %v2301_v3, %v2305_v44  ;;  %v426_v29 = vrot.slane %v425_v10, 4  ;;  %v2320_v38 = vrot.slane %v2318_v13, 4 }
  0x55   : > { %v5490_v26 = vcombine.low %v2306_v15, %v2316_v16  ;;  %v2323_v39 = vrot.slane %v2321_v18, 5  ;;  %v2329_v40 = vrot.slane %v2327_v21, 5  ;;  %v2331_v42 = vshrl.u32 %v7249_v60, 16  ;;  %v7292_v21 = vld [vmem:[%s7006_s10 + $0x70] sm:$0xf] }
  0x56   : > { %6059 = vmatprep.mubr.bf16.mxu1 %v5250_v2  ;;  %v431_v31 = vsel %vm7038_vm2, %v426_v29, %v430_v9  ;;  %v436_v44 = vrot.slane %v435_v30, 4  ;;  %v2337_v47 = vshll.u32 %v7258_v17, 16  ;;  %v443_v49 = vshrl.u32 %v7262_v25, 16  ;;  %v6862_v9 = vld [vmem:[%s7006_s10 + $0xb4] sm:$0xff]  }
  0x57   : > { %6251 = vmatprep.mubr.bf16.mxu0 %v5490_v26  ;;  %v2324_v52 = vor.u32 %v2323_v39, %v2320_v38  ;;  %v2333_v53 = vrot.slane %v2331_v42, 4  ;;  %v446_v54 = vshll.u32 %v7262_v25, 16  ;;  %v452_v55 = vshll.u32 %v7265_v35, 16 }
  0x58   : > { %v441_v48 = vsel %vm7038_vm2, %v436_v44, %v440_v34  ;;  %v2339_v56 = vrot.slane %v2337_v47, 5  ;;  %v445_v57 = vrot.slane %v443_v49, 4  ;;  %v456_v58 = vshrl.u32 %v7265_v35, 16  ;;  %v7303_v47 = vld [vmem:[%s7006_s10 + $0x78] sm:$0xf] }
  0x59   : > { %v5251_v59 = vcombine.low %v431_v31, %v441_v48  ;;  %v2325_v61 = vrot.slane %v2324_v52, 4  ;;  %v2334_v63 = vor.u32 %v2333_v53, %v2329_v40  ;;  %v448_v1 = vrot.slane %v446_v54, 5  ;;  %v7314_v54 = vld [vmem:[%s7006_s10 + $0x7c] sm:$0xf] }
  0x5a   : > { %v454_v2 = vrot.slane %v452_v55, 5  ;;  %v458_v3 = vrot.slane %v456_v58, 4  ;;  %v462_v7 = vshll.u32 %v239_v43, 16  ;;  %v5524_v10 = vrot.slane %v5508_v50, 9  ;;  %v241_v58 = vld [vmem:[%s7006_s10 + $0x80] sm:$0x1] }
  0x5b   : > { %6060 = vmatmul.mubr.bf16.gmra.mrb[12].mxu1 %v5251_v59  ;;  %v2330_v11 = vsel %vm7038_vm2, %v2325_v61, %v2329_v40  ;;  %v2335_v12 = vrot.slane %v2334_v63, 4  ;;  %v449_v13 = vor.u32 %v448_v1, %v445_v57  ;;  %v2921_v15 = vrot.slane %v7019_v23, 5  ;;  %v240_v40 = vld [vmem:[%s7006_s10 + $0x74] sm:$0x1]  ;;  %v5509_v23 = vld [vmem:[%s7006_s10 + $0x18] sm:$0xe] }
  0x5c   : > { %v459_v16 = vor.u32 %v458_v3, %v454_v2  ;;  %v464_v18 = vrot.slane %v462_v7, 5  ;;  %v467_v26 = vshrl.u32 %v7280_v5, 16  ;;  %v470_v29 = vshll.u32 %v7280_v5, 16 }
  0x5d   : > { %v2340_v30 = vsel %vm7038_vm2, %v2335_v12, %v2339_v56  ;;  %v450_v34 = vrot.slane %v449_v13, 4  ;;  %v2922_v38 = vsel %vm7284_vm5, %v5524_v10, %v2921_v15  ;;  %v2923_v39 = vrot.slane %v2921_v15, 4  ;;  %v5510_v13 = vld [vmem:[%s7006_s10 + $0x24] sm:$0xe] }
  0x5e   : > { %v5491_v42 = vcombine.low %v2330_v11, %v2340_v30  ;;  %v460_v43 = vrot.slane %v459_v16, 4  ;;  %v469_v31 = vrot.slane %v467_v26, 4  ;;  %v472_v44 = vrot.slane %v470_v29, 5  ;;  %v7336_v16 = vld [vmem:[%s7006_s10 + $0x84] sm:$0xf]  ;;  %v6775_v29 = vld [vmem:[%s8795_s1 + $0x188] sm:$0xff]  }
  0x5f   : > { %v455_v49 = vsel %vm7038_vm2, %v450_v34, %v454_v2  ;;  %v2925_v50 = vsel %vm7284_vm5, %v2923_v39, %v2924_v41  ;;  %v476_v52 = vshll.u32 %v7292_v21, 16  ;;  %v480_v53 = vshrl.u32 %v7292_v21, 16 }
  0x60   : > { %6252 = vmatmul.mubr.bf16.gmra.mrb[12].mxu0 %v5491_v42  ;;  %v465_v55 = vsel %vm7038_vm2, %v460_v43, %v464_v18  ;;  %v5556_v48 = vcombine.low %v2922_v38, %v2925_v50  ;;  %v473_v56 = vor.u32 %v472_v44, %v469_v31  ;;  %v486_v57 = vshll.u32 %v240_v40, 16  ;;  %v7344_v40 = vld [vmem:[%s7006_s10 + $0x88] sm:$0xf]  ;;  %v242_v31 = vld [vmem:[%s7006_s10 + $0x8c] sm:$0x1] }
  0x61   : > { %v5252_v59 = vcombine.low %v455_v49, %v465_v55  ;;  %v478_v24 = vrot.slane %v476_v52, 5  ;;  %v482_v61 = vrot.slane %v480_v53, 4  ;;  %v5525_v63 = vrot.slane %v5509_v23, 9 }
  0x62   : > { %6287 = vmatprep.mubr.bf16.mxu0 %v5556_v48  ;;  %v474_v41 = vrot.slane %v473_v56, 4  ;;  %v488_v1 = vrot.slane %v486_v57, 5  ;;  %v2932_v2 = vsel %vm7284_vm5, %v7087_v36, %v2931_v32  ;;  %v491_v3 = vshrl.u32 %v7303_v47, 16 }
  0x63   : > { %6063 = vmatprep.mubr.bf16.mxu1 %v5252_v59  ;;  %v483_v7 = vor.u32 %v482_v61, %v478_v24  ;;  %v2929_v10 = vsel %vm7284_vm5, %v5525_v63, %v2928_v27  ;;  %v494_v11 = vshll.u32 %v7303_v47, 16  ;;  %v500_v12 = vshll.u32 %v7314_v54, 16 }
  0x64   : > { %v479_v8 = vsel %vm7038_vm2, %v474_v41, %v478_v24  ;;  %v5557_v15 = vcombine.low %v2929_v10, %v2932_v2  ;;  %v493_v32 = vrot.slane %v491_v3, 4  ;;  %v504_v36 = vshrl.u32 %v7314_v54, 16  ;;  %v7365_v2 = vld [vmem:[%s7006_s10 + $0x90] sm:$0xf]  ;;  %v7368_v3 = vld [vmem:[%s7006_s10 + $0x94] sm:$0xf] }
  0x65   : > { %v484_v62 = vrot.slane %v483_v7, 4  ;;  %v496_v18 = vrot.slane %v494_v11, 5  ;;  %v502_v26 = vrot.slane %v500_v12, 5  ;;  %v510_v27 = vshll.u32 %v241_v58, 16 }
  0x66   : > { %v506_v30 = vrot.slane %v504_v36, 4  ;;  %v5526_v34 = vrot.slane %v5510_v13, 9  ;;  %v2935_v38 = vrot.slane %v7091_v45, 5  ;;  %v2938_v39 = vrot.slane %v7097_v51, 5  ;;  %v5511_v45 = vld [vmem:[%s7006_s10 + $0x30] sm:$0xe] }
  0x67   : > { %v489_v23 = vsel %vm7038_vm2, %v484_v62, %v488_v1  ;;  %v497_v42 = vor.u32 %v496_v18, %v493_v32  ;;  %v512_v43 = vrot.slane %v510_v27, 5  ;;  %v515_v44 = vshrl.u32 %v7336_v16, 16  ;;  %v243_v62 = vld [vmem:[%s7006_s10 + $0x98] sm:$0x1] }
  0x68   : > { %v5253_v49 = vcombine.low %v479_v8, %v489_v23  ;;  %6288 = vmatmul.mubr.bf16.vlgmr.msra.gmra.mrb[0].mxu0 %v5557_v15  ;;  %v507_v50 = vor.u32 %v506_v30, %v502_v26  ;;  %v2936_v52 = vsel %vm7284_vm5, %v5526_v34, %v2935_v38  ;;  %v2937_v53 = vrot.slane %v2935_v38, 4  ;;  %v6779_v30 = vld [vmem:[%s8795_s1 + $0x198] sm:$0xff]  }
  0x69   : > { %6320 = vmatpush3.bf16.msra.mxu0 %v7227_v6  ;;  %v498_v51 = vrot.slane %v497_v42, 4  ;;  %v517_v55 = vrot.slane %v515_v44, 4  ;;  %v518_v48 = vshll.u32 %v7336_v16, 16  ;;  %v524_v56 = vshll.u32 %v7344_v40, 16  ;;  %v6777_v6 = vld [vmem:[%s8795_s1 + $0x190] sm:$0xff]  }
  0x6a   : > { %6064 = vmatmul.mubr.bf16.gmra.mrb[16].mxu1 %v5253_v49  ;;  %v508_v57 = vrot.slane %v507_v50, 4  ;;  %v2939_v58 = vsel %vm7284_vm5, %v2937_v53, %v2938_v39  ;;  %v528_v59 = vshrl.u32 %v7344_v40, 16  ;;  %v534_v24 = vshll.u32 %v242_v31, 16  ;;  %6321 = vmatprep.subr.bf16.mxu0 %v6775_v29  ;;  %v5512_v38 = vld [vmem:[%s7006_s10 + $0x3c] sm:$0xe] }
  0x6b   : > { %v503_v61 = vsel %vm7038_vm2, %v498_v51, %v502_v26  ;;  %v5558_v63 = vcombine.low %v2936_v52, %v2939_v58  ;;  %v520_v41 = vrot.slane %v518_v48, 5  ;;  %v526_v1 = vrot.slane %v524_v56, 5  ;;  %v7386_v31 = vld [vmem:[%s7006_s10 + $0x9c] sm:$0xf]  ;;  %v7395_v48 = vld [vmem:[%s7006_s10 + $0xa0] sm:$0xf] }
  0x6c   : > { %v513_v7 = vsel %vm7038_vm2, %v508_v57, %v512_v43  ;;  %v530_v10 = vrot.slane %v528_v59, 4  ;;  %v536_v11 = vrot.slane %v534_v24, 5  ;;  %v5527_v12 = vrot.slane %v5511_v45, 9  ;;  %v6783_v56 = vld [vmem:[%s8795_s1 + $0x1a0] sm:$0xff]  }
  0x6d   : > { %v5254_v13 = vcombine.low %v503_v61, %v513_v7  ;;  %6291 = vmatprep.mubr.bf16.mxu0 %v5558_v63  ;;  %v521_v8 = vor.u32 %v520_v41, %v517_v55  ;;  %v2942_v15 = vrot.slane %v7122_v33, 5  ;;  %v2945_v32 = vrot.slane %v7133_v46, 5  ;;  %6322 = vmatpush3.bf16.msra.mxu0 %v6775_v29  ;;  %v244_v61 = vld [vmem:[%s7006_s10 + $0xa4] sm:$0x1] }
  0x6e   : > { %v531_v36 = vor.u32 %v530_v10, %v526_v1  ;;  %v539_v18 = vshrl.u32 %v7365_v2, 16  ;;  %v542_v26 = vshll.u32 %v7365_v2, 16  ;;  %v548_v27 = vshll.u32 %v7368_v3, 16  ;;  %6323 = vmatprep.subr.bf16.mxu0 %v6777_v6 }
  0x6f   : > { %6067 = vmatprep.mubr.bf16.mxu1 %v5254_v13  ;;  %v522_v34 = vrot.slane %v521_v8, 4  ;;  %v2943_v33 = vsel %vm7284_vm5, %v5527_v12, %v2942_v15  ;;  %v2944_v46 = vrot.slane %v2942_v15, 4  ;;  %v552_v29 = vshrl.u32 %v7368_v3, 16  ;;  %v5513_v15 = vld [vmem:[%s7006_s10 + $0x48] sm:$0xe] }
  0x70   : > { %v532_v39 = vrot.slane %v531_v36, 4  ;;  %v541_v23 = vrot.slane %v539_v18, 4  ;;  %v544_v42 = vrot.slane %v542_v26, 5  ;;  %v550_v43 = vrot.slane %v548_v27, 5  ;;  %v7420_v27 = vld [vmem:[%s7006_s10 + $0xa8] sm:$0xf] }
  0x71   : > { %v527_v44 = vsel %vm7038_vm2, %v522_v34, %v526_v1  ;;  %v2946_v49 = vsel %vm7284_vm5, %v2944_v46, %v2945_v32  ;;  %v554_v50 = vrot.slane %v552_v29, 4  ;;  %v558_v52 = vshll.u32 %v243_v62, 16  ;;  %6324 = vmatpush3.bf16.msra.mxu0 %v6777_v6  ;;  %v6787_v32 = vld [vmem:[%s8795_s1 + $0x1a8] sm:$0xff]  }
  0x72   : > { %v537_v53 = vsel %vm7038_vm2, %v532_v39, %v536_v11  ;;  %v5559_v45 = vcombine.low %v2943_v33, %v2946_v49  ;;  %v545_v51 = vor.u32 %v544_v42, %v541_v23  ;;  %v5528_v55 = vrot.slane %v5512_v38, 9  ;;  %6325 = vmatprep.subr.bf16.mxu0 %v6779_v30  ;;  %v7423_v29 = vld [vmem:[%s7006_s10 + $0xac] sm:$0xf] }
  0x73   : > { %v5255_v57 = vcombine.low %v527_v44, %v537_v53  ;;  %v555_v58 = vor.u32 %v554_v50, %v550_v43  ;;  %v560_v59 = vrot.slane %v558_v52, 5  ;;  %v2949_v24 = vrot.slane %v7156_v19, 5  ;;  %v5514_v53 = vld [vmem:[%s7006_s10 + $0x54] sm:$0xe] }
  0x74   : > { %6292 = vmatmul.mubr.bf16.gmra.mrb[4].mxu0 %v5559_v45  ;;  %v546_v6 = vrot.slane %v545_v51, 4  ;;  %v2952_v63 = vrot.slane %v7164_v28, 5  ;;  %v563_v41 = vshrl.u32 %v7386_v31, 16  ;;  %v566_v1 = vshll.u32 %v7386_v31, 16  ;;  %v6791_v45 = vld [vmem:[%s8795_s1 + $0x1b0] sm:$0xff]  }
  0x75   : > { %6068 = vmatmul.mubr.bf16.gmra.mrb[20].mxu1 %v5255_v57  ;;  %v556_v7 = vrot.slane %v555_v58, 4  ;;  %v2950_v10 = vsel %vm7284_vm5, %v5528_v55, %v2949_v24  ;;  %v2951_v11 = vrot.slane %v2949_v24, 4  ;;  %v572_v12 = vshll.u32 %v7395_v48, 16  ;;  %6326 = vmatpush3.bf16.msra.mxu0 %v6779_v30 }
  0x76   : > { %v551_v19 = vsel %vm7038_vm2, %v546_v6, %v550_v43  ;;  %v565_v13 = vrot.slane %v563_v41, 4  ;;  %v568_v28 = vrot.slane %v566_v1, 5  ;;  %v576_v8 = vshrl.u32 %v7395_v48, 16  ;;  %6327 = vmatprep.subr.bf16.mxu0 %v6783_v56  ;;  %v245_v43 = vld [vmem:[%s7006_s10 + $0xb0] sm:$0x1] }
  0x77   : > { %v561_v36 = vsel %vm7038_vm2, %v556_v7, %v560_v59  ;;  %v2953_v62 = vsel %vm7284_vm5, %v2951_v11, %v2952_v63  ;;  %v574_v18 = vrot.slane %v572_v12, 5  ;;  %v582_v26 = vshll.u32 %v244_v61, 16  ;;  %v7443_v41 = vld [vmem:[%s7006_s10 + $0xb4] sm:$0xf]  ;;  %v7448_v12 = vld [vmem:[%s7006_s10 + $0xb8] sm:$0xf] }
  0x78   : > { %v5256_v30 = vcombine.low %v551_v19, %v561_v36  ;;  %v5560_v34 = vcombine.low %v2950_v10, %v2953_v62  ;;  %v569_v33 = vor.u32 %v568_v28, %v565_v13  ;;  %v578_v46 = vrot.slane %v576_v8, 4  ;;  %v246_v19 = vld [vmem:[%s7006_s10 + $0xbc] sm:$0x1] }
  0x79   : > { %v584_v38 = vrot.slane %v582_v26, 5  ;;  %v5529_v39 = vrot.slane %v5513_v15, 9  ;;  %v2956_v23 = vrot.slane %v7191_v14, 5  ;;  %v2959_v42 = vrot.slane %v7197_v22, 5  ;;  %6328 = vmatpush3.bf16.msra.mxu0 %v6783_v56  ;;  %v6795_v13 = vld [vmem:[%s8795_s1 + $0x1b8] sm:$0xff]  }
  0x7a   : > { %6071 = vmatprep.mubr.bf16.mxu1 %v5256_v30  ;;  %6295 = vmatprep.mubr.bf16.mxu0 %v5560_v34  ;;  %v570_v44 = vrot.slane %v569_v33, 4  ;;  %v579_v49 = vor.u32 %v578_v46, %v574_v18  ;;  %v587_v50 = vshrl.u32 %v7420_v27, 16  ;;  %v590_v52 = vshll.u32 %v7420_v27, 16  ;;  %v5515_v30 = vld [vmem:[%s7006_s10 + $0x60] sm:$0xe] }
  0x7b   : > { %v2957_v14 = vsel %vm7284_vm5, %v5529_v39, %v2956_v23  ;;  %v2958_v22 = vrot.slane %v2956_v23, 4  ;;  %v596_v51 = vshll.u32 %v7423_v29, 16  ;;  %v600_v55 = vshrl.u32 %v7423_v29, 16  ;;  %6329 = vmatprep.subr.bf16.mxu0 %v6787_v32  ;;  %v5445_v39 = vld [vmem:[%s7006_s10 + $0x70] sm:$0xf] }
  0x7c   : > { %v575_v56 = vsel %vm7038_vm2, %v570_v44, %v574_v18  ;;  %v580_v57 = vrot.slane %v579_v49, 4  ;;  %v589_v58 = vrot.slane %v587_v50, 4  ;;  %v592_v59 = vrot.slane %v590_v52, 5  ;;  %v7470_v44 = vld [vmem:[%s8795_s1 + $0x1c0] sm:$0xff]  }
  0x7d   : > { %v2960_v24 = vsel %vm7284_vm5, %v2958_v22, %v2959_v42  ;;  %v598_v61 = vrot.slane %v596_v51, 5  ;;  %v602_v6 = vrot.slane %v600_v55, 4  ;;  %v606_v63 = vshll.u32 %v245_v43, 16  ;;  %6330 = vmatpush3.bf16.msra.mxu0 %v6787_v32  ;;  %v5516_v43 = vld [vmem:[%s7006_s10 + $0x6c] sm:$0xe] }
  0x7e   : > { %v585_v1 = vsel %vm7038_vm2, %v580_v57, %v584_v38  ;;  %v5561_v7 = vcombine.low %v2957_v14, %v2960_v24  ;;  %v593_v10 = vor.u32 %v592_v59, %v589_v58  ;;  %v5530_v11 = vrot.slane %v5514_v53, 9  ;;  %6331 = vmatprep.subr.bf16.mxu0 %v6791_v45  ;;  %v5446_v55 = vld [vmem:[%s7006_s10 + $0x74] sm:$0x1]  ;;  %v5517_v24 = vld [vmem:[%s7006_s10 + $0x78] sm:$0xe] }
  0x7f   : > { %v5257_v28 = vcombine.low %v575_v56, %v585_v1  ;;  %v603_v8 = vor.u32 %v602_v6, %v598_v61  ;;  %v608_v15 = vrot.slane %v606_v63, 5  ;;  %v2963_v32 = vrot.slane %v7222_v0, 5 }
  0x80   : > { %6296 = vmatmul.mubr.bf16.gmra.mrb[8].mxu0 %v5561_v7  ;;  %v594_v36 = vrot.slane %v593_v10, 4  ;;  %v2966_v62 = vrot.slane %v7234_v20, 5  ;;  %v611_v18 = vshrl.u32 %v7443_v41, 16  ;;  %v614_v26 = vshll.u32 %v7443_v41, 16 }
  0x81   : > { %6072 = vmatmul.mubr.bf16.gmra.mrb[24].mxu1 %v5257_v28  ;;  %v604_v34 = vrot.slane %v603_v8, 4  ;;  %v2964_v33 = vsel %vm7284_vm5, %v5530_v11, %v2963_v32  ;;  %v2965_v46 = vrot.slane %v2963_v32, 4  ;;  %v620_v38 = vshll.u32 %v7448_v12, 16  ;;  %6332 = vmatpush3.bf16.msra.mxu0 %v6791_v45  ;;  %v7483_v11 = vld [vmem:[%s7006_s10 + $0x7c] sm:$0xf] }
  0x82   : > { %v599_v0 = vsel %vm7038_vm2, %v594_v36, %v598_v61  ;;  %v613_v20 = vrot.slane %v611_v18, 4  ;;  %v616_v23 = vrot.slane %v614_v26, 5  ;;  %v624_v42 = vshrl.u32 %v7448_v12, 16  ;;  %6333 = vmatprep.subr.bf16.mxu0 %v6795_v13  ;;  %v6864_v36 = vld [vmem:[%s7006_s10] sm:$0xf] }
  0x83   : > { %v609_v49 = vsel %vm7038_vm2, %v604_v34, %v608_v15  ;;  %v2967_v50 = vsel %vm7284_vm5, %v2965_v46, %v2966_v62  ;;  %v622_v52 = vrot.slane %v620_v38, 5  ;;  %v630_v53 = vshll.u32 %v246_v19, 16  ;;  %v5451_v15 = vld [vmem:[%s7006_s10 + $0x88] sm:$0xf]  ;;  %v7498_v62 = vld [vmem:[%s7006_s10 + $0x4] sm:$0xf] }
  0x84   : > { %v5258_v45 = vcombine.low %v599_v0, %v609_v49  ;;  %v5562_v14 = vcombine.low %v2964_v33, %v2967_v50  ;;  %v617_v22 = vor.u32 %v616_v23, %v613_v20  ;;  %v626_v51 = vrot.slane %v624_v42, 4  ;;  %v5452_v26 = vld [vmem:[%s7006_s10 + $0x8c] sm:$0x1]  ;;  %v5455_v23 = vld [vmem:[%s7006_s10 + $0x98] sm:$0x1] }
  0x85   : > { %v632_v56 = vrot.slane %v630_v53, 5  ;;  %v5531_v57 = vrot.slane %v5515_v30, 9  ;;  %v2970_v58 = vrot.slane %v7249_v60, 5  ;;  %v2973_v59 = vrot.slane %v7258_v17, 5  ;;  %6334 = vmatpush3.bf16.msra.mxu0 %v6795_v13  ;;  %v7486_v17 = vld [vmem:[%s7006_s10 + $0x80] sm:$0x1] }
  0x86   : > { %6075 = vmatprep.mubr.bf16.mxu1 %v5258_v45  ;;  %6299 = vmatprep.mubr.bf16.mxu0 %v5562_v14  ;;  %v618_v61 = vrot.slane %v617_v22, 4  ;;  %v627_v6 = vor.u32 %v626_v51, %v622_v52  ;;  %v5532_v63 = vrot.slane %v5516_v43, 9  ;;  %v2977_v1 = vrot.slane %v5445_v39, 5  ;;  %v5518_v30 = vld [vmem:[%s7006_s10 + $0x84] sm:$0xe] }
  0x87   : > { %v2971_v7 = vsel %vm7284_vm5, %v5531_v57, %v2970_v58  ;;  %v2972_v10 = vrot.slane %v2970_v58, 4  ;;  %v2980_v60 = vrot.slane %v5446_v55, 5  ;;  %6367 = vmatprep.subr.bf16.mxu0 %v7470_v44  ;;  %v5268_v18 = vcombine.low %v6864_v36, %v7498_v62  ;;  %v5454_v39 = vld [vmem:[%s7006_s10 + $0x94] sm:$0xf]  ;;  %v5519_v42 = vld [vmem:[%s7006_s10 + $0x90] sm:$0xe] }
  0x88   : > { %v623_v19 = vsel %vm7038_vm2, %v618_v61, %v622_v52  ;;  %v628_v13 = vrot.slane %v627_v6, 4  ;;  %v2978_v28 = vsel %vm7284_vm5, %v5532_v63, %v2977_v1  ;;  %v2979_v8 = vrot.slane %v2977_v1, 4  ;;  %v5520_v50 = vld [vmem:[%s7006_s10 + $0x9c] sm:$0xe]  ;;  %v5457_v14 = vld [vmem:[%s7006_s10 + $0xa0] sm:$0xf] }
  0x89   : > { %v2974_v32 = vsel %vm7284_vm5, %v2972_v10, %v2973_v59  ;;  %v5533_v38 = vrot.slane %v5517_v24, 9  ;;  %v2984_v43 = vrot.slane %v7483_v11, 5  ;;  %v2987_v49 = vrot.slane %v7486_v17, 5  ;;  %v5458_v22 = vld [vmem:[%s7006_s10 + $0xa4] sm:$0x1] }
  0x8a   : > { %v633_v34 = vsel %vm7038_vm2, %v628_v13, %v632_v56  ;;  %v5563_v33 = vcombine.low %v2971_v7, %v2974_v32  ;;  %v2981_v46 = vsel %vm7284_vm5, %v2979_v8, %v2980_v60  ;;  %v5534_v52 = vrot.slane %v5518_v30, 9  ;;  %v5460_v59 = vld [vmem:[%s7006_s10 + $0xac] sm:$0xf]  ;;  %v7522_v61 = vld [vmem:[%s7006_s10 + $0x10] sm:$0xf] }
  0x8b   : > { %v5259_v0 = vcombine.low %v623_v19, %v633_v34  ;;  %v5564_v20 = vcombine.low %v2978_v28, %v2981_v46  ;;  %v2991_v53 = vrot.slane %v5451_v15, 5  ;;  %v2994_v45 = vrot.slane %v5452_v26, 5  ;;  %v6866_v24 = vld [vmem:[%s7006_s10 + $0xc] sm:$0xf]  ;;  %v6868_v8 = vld [vmem:[%s7006_s10 + $0x18] sm:$0xf] }
  0x8c   : > { %6300 = vmatmul.mubr.bf16.gmra.mrb[12].mxu0 %v5563_v33  ;;  %v2985_v51 = vsel %vm7284_vm5, %v5533_v38, %v2984_v43  ;;  %v2986_v55 = vrot.slane %v2984_v43, 4  ;;  %v2998_v58 = vrot.slane %v5454_v39, 5  ;;  %v5269_v6 = vcombine.low %v6866_v24, %v7522_v61  ;;  %v6786_v19 = vld [vmem:[%s8795_s1 + $0x88] sm:$0xff]   ;;  %v7534_v15 = vld [vmem:[%s7006_s10 + $0x1c] sm:$0xf] }
  0x8d   : > { %6076 = vmatmul.mubr.bf16.gmra.mrb[28].mxu1 %v5259_v0  ;;  %6303 = vmatprep.mubr.bf16.mxu0 %v5564_v20  ;;  %v2992_v56 = vsel %vm7284_vm5, %v5534_v52, %v2991_v53  ;;  %v2993_v57 = vrot.slane %v2991_v53, 4  ;;  %v5535_v1 = vrot.slane %v5519_v42, 9  ;;  %v3001_v7 = vrot.slane %v5455_v23, 5  ;;  %v5461_v30 = vld [vmem:[%s7006_s10 + $0xb0] sm:$0x1] }
  0x8e   : > { %6095 = vmatprep.mubr.bf16.mxu1 %v5268_v18  ;;  %v2988_v63 = vsel %vm7284_vm5, %v2986_v55, %v2987_v49  ;;  %v3000_v13 = vrot.slane %v2998_v58, 4  ;;  %v5536_v28 = vrot.slane %v5520_v50, 9  ;;  %v5270_v32 = vcombine.low %v6868_v8, %v7534_v15  ;;  %v5521_v34 = vld [vmem:[%s7006_s10 + $0xa8] sm:$0xe]  ;;  %v5463_v33 = vld [vmem:[%s7006_s10 + $0xb8] sm:$0xf] }
  0x8f   : > { %v5565_v10 = vcombine.low %v2985_v51, %v2988_v63  ;;  %v2995_v60 = vsel %vm7284_vm5, %v2993_v57, %v2994_v45  ;;  %v3005_v18 = vrot.slane %v5457_v14, 5  ;;  %v3008_v26 = vrot.slane %v5458_v22, 5  ;;  %v5464_v20 = vld [vmem:[%s7006_s10 + $0xbc] sm:$0x1]  ;;  %v5522_v23 = vld [vmem:[%s7006_s10 + $0xb4] sm:$0xe] }
  0x90   : > { %v5566_v36 = vcombine.low %v2992_v56, %v2995_v60  ;;  %v3012_v38 = vrot.slane %v5460_v59, 5  ;;  %v2999_v39 = vsel %vm7284_vm5, %v5535_v1, %v2998_v58  ;;  %v3002_v0 = vsel %vm7284_vm5, %v3000_v13, %v3001_v7  ;;  %v6790_v50 = vld [vmem:[%s8795_s1 + $0x90] sm:$0xff]   ;;  %v5466_v53 = vld [vmem:[%s7006_s10 + $0xc4] sm:$0xf]  ;;  %v7557_v51 = vld [vmem:[%s7006_s10 + $0x28] sm:$0xf] }
  0x91   : > { %v3007_v46 = vrot.slane %v3005_v18, 4  ;;  %v3006_v42 = vsel %vm7284_vm5, %v5536_v28, %v3005_v18  ;;  %v3019_v49 = vrot.slane %v5463_v33, 5  ;;  %v5537_v52 = vrot.slane %v5521_v34, 9  ;;  %v6870_v22 = vld [vmem:[%s7006_s10 + $0x24] sm:$0xf]  ;;  %v6794_v1 = vld [vmem:[%s8795_s1 + $0x98] sm:$0xff]  }
  0x92   : > { %v5567_v45 = vcombine.low %v2999_v39, %v3002_v0  ;;  %v3014_v14 = vrot.slane %v3012_v38, 4  ;;  %v5271_v55 = vcombine.low %v6870_v22, %v7557_v51  ;;  %v6872_v57 = vld [vmem:[%s7006_s10 + $0x30] sm:$0xf]  ;;  %v7562_v58 = vld [vmem:[%s7006_s10 + $0x34] sm:$0xf]  ;;  %v5538_v24 = vrot.slane %v5522_v23, 9 }
  0x93   : > { %v3009_v43 = vsel %vm7284_vm5, %v3007_v46, %v3008_v26  ;;  %v5272_v59 = vcombine.low %v6872_v57, %v7562_v58  ;;  %v3022_v63 = vrot.slane %v5464_v20, 5  ;;  %v5523_v7 = vld [vmem:[%s7006_s10 + $0xc0] sm:$0xe]  ;;  %v3013_v60 = vsel %vm7284_vm5, %v5537_v52, %v3012_v38  ;;  %v5467_v8 = vld [vmem:[%s7006_s10 + $0xc8] sm:$0x1]  ;;  %v6797_v22 = vld [vmem:[%s7006_s10 + $0x18] sm:$0xff]  }
  0x94   : > { %6304 = vmatmul.mubr.bf16.gmra.mrb[16].mxu0 %v5565_v10  ;;  %v5568_v56 = vcombine.low %v3006_v42, %v3009_v43  ;;  %v3026_v10 = vrot.slane %v5466_v53, 5  ;;  %v3020_v13 = vsel %vm7284_vm5, %v5538_v24, %v3019_v49  ;;  %v5539_v18 = vrot.slane %v5523_v7, 9  ;;  %v6874_v26 = vld [vmem:[%s7006_s10 + $0x3c] sm:$0xf]  ;;  %v6876_v39 = vld [vmem:[%s7006_s10 + $0x48] sm:$0xf] }
  0x95   : > { %6096 = vmatmul.mubr.bf16.vlgmr.msra.gmra.mrb[0].mxu1 %v5269_v6  ;;  %6307 = vmatprep.mubr.bf16.mxu0 %v5566_v36  ;;  %v3021_v6 = vrot.slane %v3019_v49, 4  ;;  %v3029_v38 = vrot.slane %v5467_v8, 5  ;;  %v7588_v0 = vld [vmem:[%s7006_s10 + $0x4c] sm:$0xf]  ;;  %v6811_v49 = vld [vmem:[%s8795_s1 + $0xb0] sm:$0xff]   ;;  %v2379_v52 = vshrl.u32 %v7483_v11, 16 }
  0x96   : > { %6128 = vmatpush3.bf16.msra.mxu1 %v7208_v4  ;;  %6099 = vmatprep.mubr.bf16.mxu1 %v5270_v32  ;;  %v3015_v4 = vrot.slane %v5461_v30, 5  ;;  %v6799_v32 = vld [vmem:[%s8795_s1 + $0xa0] sm:$0xff]   ;;  %v3028_v46 = vrot.slane %v3026_v10, 4  ;;  %v5274_v20 = vcombine.low %v6876_v39, %v7588_v0  ;;  %v6805_v23 = vld [vmem:[%s8795_s1 + $0xa8] sm:$0xff]   ;;  %v3027_v42 = vsel %vm7284_vm5, %v5539_v18, %v3026_v10  ;;  %v6803_v18 = vld [vmem:[%s7006_s10 + $0x30] sm:$0xff]  }
  0x97   : > { %6129 = vmatprep.subr.bf16.mxu1 %v6786_v19  ;;  %v3023_v28 = vsel %vm7284_vm5, %v3021_v6, %v3022_v63  ;;  %v7583_v30 = vld [vmem:[%s7006_s10 + $0x40] sm:$0xf]  ;;  %v7616_v57 = vrot.slane %v2379_v52, 4  ;;  %v6800_v6 = vld [vmem:[%s7006_s10 + $0x24] sm:$0xff]   ;;  %v1289_v7 = vrot.slane %v7522_v61, 5  ;;  %v2385_v8 = vshll.u32 %v7486_v17, 16 }
  0x98   : > { %v5273_v34 = vcombine.low %v6874_v26, %v7583_v30  ;;  %v5570_v33 = vcombine.low %v3020_v13, %v3023_v28  ;;  %v3030_v43 = vsel %vm7284_vm5, %v3028_v46, %v3029_v38  ;;  %v1229_v63 = vld [vmem:[%s7006_s10] sm:$0xe]  ;;  %v1230_v10 = vld [vmem:[%s7006_s10 + $0xc] sm:$0xe]  ;;  %v1296_v13 = vrot.slane %v7534_v15, 5 }
  0x99   : > { %v5571_v53 = vcombine.low %v3027_v42, %v3030_v43  ;;  %v1232_v61 = vld [vmem:[%s7006_s10 + $0x24] sm:$0xe]  ;;  %v5279_v15 = vcombine.low %v7336_v16, %v7344_v40  ;;  %v5280_v26 = vcombine.low %v7365_v2, %v7368_v3  ;;  %v5292_v17 = vrot.slane %v1229_v63, 9  ;;  %v6882_v38 = vld [vmem:[%s7006_s10 + $0x20] sm:$0x1]  ;;  %v6812_v2 = vld [vmem:[%s7006_s10 + $0x54] sm:$0xff]  }
  0x9a   : > { %6130 = vmatpush3.bf16.msra.mxu1 %v6786_v19  ;;  %v3016_v19 = vsel %vm7284_vm5, %v3014_v14, %v3015_v4  ;;  %v7605_v14 = vld [vmem:[%s7006_s10 + $0x58] sm:$0xf]  ;;  %v1298_v46 = vrot.slane %v1296_v13, 4  ;;  %v1299_v39 = vrot.slane %v6882_v38, 5  ;;  %v6883_v43 = vld [vmem:[%s7006_s10 + $0x2c] sm:$0x1] }
  0x9b   : > { %6131 = vmatprep.subr.bf16.mxu1 %v6790_v50  ;;  %v5569_v36 = vcombine.low %v3013_v60, %v3016_v19  ;;  %v7631_v60 = vld [vmem:[%s8795_s1 + $0xc0] sm:$0xff]   ;;  %v1231_v19 = vld [vmem:[%s7006_s10 + $0x18] sm:$0xe]  ;;  %v6886_v38 = vld [vmem:[%s7006_s10 + $0x50] sm:$0x1]  ;;  %v1331_v16 = vrot.slane %v7605_v14, 5 }
  0x9c   : > { %6308 = vmatmul.mubr.bf16.gmra.mrb[20].mxu0 %v5567_v45  ;;  %v6878_v45 = vld [vmem:[%s7006_s10 + $0x54] sm:$0xf]  ;;  %v7754_v40 = vld [vmem:[%s7006_s10 + $0x64] sm:$0xf] }
  0x9d   : > { %6100 = vmatmul.mubr.bf16.gmra.mrb[4].mxu1 %v5271_v55  ;;  %6311 = vmatprep.mubr.bf16.mxu0 %v5568_v56  ;;  %v5275_v4 = vcombine.low %v6878_v45, %v7605_v14  ;;  %v5276_v55 = vcombine.low %v7262_v25, %v7265_v35  ;;  %v6817_v56 = vld [vmem:[%s8795_s1 + $0xb8] sm:$0xff]   ;;  %v6881_v25 = vld [vmem:[%s7006_s10 + $0x14] sm:$0x1]  ;;  %v6815_v3 = vld [vmem:[%s7006_s10 + $0x60] sm:$0xff]  }
  0x9e   : > { %6103 = vmatprep.mubr.bf16.mxu1 %v5272_v59  ;;  %6132 = vmatpush3.bf16.msra.mxu1 %v6790_v50  ;;  %v2375_v50 = vshll.u32 %v7483_v11, 16  ;;  %v7619_v59 = vld [vmem:[%s7006_s10 + $0x8] sm:$0x1]  ;;  %v1292_v35 = vrot.slane %v6881_v25, 5 }
  0x9f   : > { %6133 = vmatprep.subr.bf16.mxu1 %v6794_v1  ;;  %v1285_v24 = vrot.slane %v7619_v59, 5 }
  0xa0   : > { %v7614_v11 = vrot.slane %v2375_v50, 5 }
  0xa2   : > { %6134 = vmatpush3.bf16.msra.mxu1 %v6794_v1  ;;  %v1282_v1 = vrot.slane %v7498_v62, 5  ;;  %v5277_v62 = vcombine.low %v7280_v5, %v7292_v21  ;;  %v5293_v21 = vrot.slane %v1230_v10, 9  ;;  %v5652_v10 = vld [vmem:[%s7006_s10 + $0x18] sm:$0xf] }
  0xa3   : > { %6135 = vmatprep.subr.bf16.mxu1 %v6799_v32 }
  0xa4   : > { %6312 = vmatmul.mubr.bf16.gmra.mrb[24].mxu0 %v5569_v36  ;;  %v5278_v36 = vcombine.low %v7303_v47, %v7314_v54  ;;  %v1284_v5 = vrot.slane %v1282_v1, 4  ;;  %v6807_v47 = vld [vmem:[%s8795_s1 + $0x1c8] sm:$0xff]   ;;  %v5294_v54 = vrot.slane %v1231_v19, 9  ;;  %v7674_v59 = vsel %vm7284_vm5, %v5292_v17, %v1282_v1  ;;  %v5653_v19 = vld [vmem:[%s7006_s10 + $0x1c] sm:$0xf] }
  0xa5   : > { %6104 = vmatmul.mubr.bf16.gmra.mrb[8].mxu1 %v5273_v34  ;;  %6315 = vmatprep.mubr.bf16.mxu0 %v5570_v33  ;;  %v1310_v34 = vrot.slane %v7562_v58, 5  ;;  %v1291_v33 = vrot.slane %v1289_v7, 4  ;;  %v5295_v58 = vrot.slane %v1232_v61, 9  ;;  %v1324_v1 = vrot.slane %v7588_v0, 5  ;;  %v6809_v0 = vld [vmem:[%s7006_s10 + $0x48] sm:$0xff]  }
  0xa6   : > { %6107 = vmatprep.mubr.bf16.mxu1 %v5274_v20  ;;  %6136 = vmatpush3.bf16.msra.mxu1 %v6799_v32  ;;  %v1303_v32 = vrot.slane %v7557_v51, 5  ;;  %v1233_v51 = vld [vmem:[%s7006_s10 + $0x30] sm:$0xe]  ;;  %v5281_v20 = vcombine.low %v7386_v31, %v7395_v48  ;;  %v7682_v25 = vsel %vm7284_vm5, %v1284_v5, %v1285_v24  ;;  %v7690_v63 = vsel %vm7284_vm5, %v5294_v54, %v1296_v13  ;;  %v1235_v13 = vld [vmem:[%s7006_s10 + $0x48] sm:$0xe] }
  0xa7   : > { %6137 = vmatprep.subr.bf16.mxu1 %v6805_v23  ;;  %v5296_v50 = vrot.slane %v1233_v51, 9  ;;  %v1312_v52 = vrot.slane %v1310_v34, 4  ;;  %v3789_v5 = vshrl.u32 %v5652_v10, 16  ;;  %v3802_v51 = vshrl.u32 %v5653_v19, 16  ;;  %v6818_v48 = vld [vmem:[%s7006_s10 + $0x6c] sm:$0xff]  }
  0xa8   : > { %v1305_v42 = vrot.slane %v1303_v32, 4  ;;  %v7702_v24 = vsel %vm7284_vm5, %v5295_v58, %v1303_v32  ;;  %v6885_v32 = vld [vmem:[%s7006_s10 + $0x44] sm:$0x1]  ;;  %v5298_v54 = vrot.slane %v1235_v13, 9  ;;  %v5656_v13 = vld [vmem:[%s7006_s10 + $0x28] sm:$0xf] }
  0xa9   : > { %v7712_v61 = vsel %vm7284_vm5, %v5296_v50, %v1310_v34  ;;  %v1320_v17 = vrot.slane %v6885_v32, 5  ;;  %v5654_v50 = vld [vmem:[%s7006_s10 + $0x20] sm:$0x1]  ;;  %v1237_v32 = vld [vmem:[%s7006_s10 + $0x60] sm:$0xe] }
  0xaa   : > { %6138 = vmatpush3.bf16.msra.mxu1 %v6805_v23  ;;  %v5282_v23 = vcombine.low %v7420_v27, %v7423_v29 }
  0xab   : > { %6139 = vmatprep.subr.bf16.mxu1 %v6811_v49 }
  0xac   : > { %6316 = vmatmul.mubr.bf16.gmra.mrb[28].mxu0 %v5571_v53  ;;  %v6884_v53 = vld [vmem:[%s7006_s10 + $0x38] sm:$0x1] }
  0xad   : > { %6108 = vmatmul.mubr.bf16.gmra.mrb[12].mxu1 %v5275_v4  ;;  %6335 = vmatprep.mubr.bf16.mxu0 %v6797_v22  ;;  %v1313_v45 = vrot.slane %v6884_v53, 5  ;;  %v1234_v4 = vld [vmem:[%s7006_s10 + $0x3c] sm:$0xe]  ;;  %v1317_v22 = vrot.slane %v7583_v30, 5  ;;  %v7678_v30 = vsel %vm7284_vm5, %v5293_v21, %v1289_v7  ;;  %v3792_v21 = vshll.u32 %v5652_v10, 16  ;;  %v6823_v53 = vld [vmem:[%s8795_s1 + $0x1e0] sm:$0xff]  }
  0xae   : > { %6111 = vmatprep.mubr.bf16.mxu1 %v5276_v55  ;;  %6140 = vmatpush3.bf16.msra.mxu1 %v6811_v49  ;;  %v1306_v49 = vrot.slane %v6883_v43, 5  ;;  %v7665_v55 = vrot.slane %v2385_v8, 5  ;;  %v6806_v7 = vld [vmem:[%s7006_s10 + $0x3c] sm:$0xff]   ;;  %v7698_v8 = vsel %vm7284_vm5, %v1298_v46, %v1299_v39  ;;  %v1326_v46 = vrot.slane %v1324_v1, 4  ;;  %v5658_v43 = vld [vmem:[%s7006_s10 + $0x30] sm:$0xf] }
  0xaf   : > { %6141 = vmatprep.subr.bf16.mxu1 %v6817_v56  ;;  %v1327_v39 = vrot.slane %v6886_v38, 5  ;;  %v3791_v10 = vrot.slane %v3789_v5, 4 }
  0xb0   : > { %8816 = vst [vmem:[#allocation2_spill] sm:$0xff] %v7665_v55 }
  0xb2   : > { %6142 = vmatpush3.bf16.msra.mxu1 %v6817_v56  ;;  %v6813_v56 = vld [vmem:[%s8795_s1 + $0x1d0] sm:$0xff]  }
  0xb3   : > { %6175 = vmatprep.subr.bf16.mxu1 %v7631_v60 }
  0xb4   : > { %6336 = vmatmul.mubr.bf16.vlgmr.msra.gmra.mrb[0].mxu0 %v6800_v6  ;;  %v7686_v6 = vsel %vm7284_vm5, %v1291_v33, %v1292_v35  ;;  %v7706_v35 = vsel %vm7284_vm5, %v1305_v42, %v1306_v49  ;;  %v3798_v33 = vshll.u32 %v5653_v19, 16  ;;  %v3794_v19 = vrot.slane %v3792_v21, 5  ;;  %v1238_v21 = vld [vmem:[%s7006_s10 + $0x6c] sm:$0xe] }
  0xb5   : > { %6112 = vmatmul.mubr.bf16.gmra.mrb[16].mxu1 %v5277_v62  ;;  %6368 = vmatpush3.bf16.msra.mxu0 %v7470_v44  ;;  %v5297_v62 = vrot.slane %v1234_v4, 9  ;;  %v5301_v58 = vrot.slane %v1238_v21, 9 }
  0xb6   : > { %6115 = vmatprep.mubr.bf16.mxu1 %v5278_v36  ;;  %6339 = vmatprep.mubr.bf16.mxu0 %v6803_v18  ;;  %v7716_v36 = vsel %vm7284_vm5, %v1312_v52, %v1313_v45  ;;  %v1319_v18 = vrot.slane %v1317_v22, 4  ;;  %v5655_v52 = vld [vmem:[%s7006_s10 + $0x24] sm:$0xf]  ;;  %v3826_v45 = vshrl.u32 %v5656_v13, 16 }
  0xb7   : > { %6369 = vmatprep.subr.bf16.mxu0 %v6807_v47  ;;  %v7733_v49 = vsel %vm7284_vm5, %v5297_v62, %v1317_v22  ;;  %v7750_v22 = vld [vmem:[%s7006_s10 + $0x54] sm:$0xe]  ;;  %v3804_v62 = vrot.slane %v3802_v51, 4  ;;  %v3813_v38 = vshrl.u32 %v5655_v52, 16  ;;  %v3816_v28 = vshll.u32 %v5655_v52, 16 }
  0xb8   : > { %v7747_v4 = vsel %vm7284_vm5, %v1319_v18, %v1320_v17  ;;  %v3808_v17 = vshll.u32 %v5654_v50, 16  ;;  %v5299_v5 = vrot.slane %v7750_v22, 9  ;;  %v6827_v50 = vld [vmem:[%s8795_s1 + $0x1e8] sm:$0xff]   ;;  %v1333_v52 = vrot.slane %v1331_v16, 4 }
  0xb9   : > { %6370 = vmatpush3.bf16.msra.mxu0 %v6807_v47  ;;  %v6819_v47 = vld [vmem:[%s8795_s1 + $0x1d8] sm:$0xff]   ;;  %v3795_v22 = vor.u32 %v3794_v19, %v3791_v10  ;;  %v3815_v34 = vrot.slane %v3813_v38, 4  ;;  %v3818_v44 = vrot.slane %v3816_v28, 5  ;;  %v6891_v10 = vld [vmem:[%s7006_s10 + $0x74] sm:$0x1]  ;;  %v3828_v28 = vrot.slane %v3826_v45, 4 }
  0xba   : > { %6371 = vmatprep.subr.bf16.mxu0 %v6813_v56  ;;  %v7788_v42 = vrot.slane %v3808_v17, 5  ;;  %v1348_v19 = vrot.slane %v6891_v10, 5  ;;  %v3837_v38 = vshrl.u32 %v5658_v43, 16  ;;  %v7813_v27 = vsel %vm7284_vm5, %v5299_v5, %v1331_v16 }
  0xbb   : > { %v3796_v21 = vrot.slane %v3795_v22, 4 }
  0xbc   : > { %6340 = vmatmul.mubr.bf16.gmra.mrb[4].mxu0 %v6806_v7  ;;  %v7760_v7 = vrot.slane %v3798_v33, 5  ;;  %v6889_v33 = vld [vmem:[%s7006_s10 + $0x70] sm:$0xf] }
  0xbd   : > { %6116 = vmatmul.mubr.bf16.gmra.mrb[20].mxu1 %v5279_v15  ;;  %6343 = vmatprep.mubr.bf16.mxu0 %v6809_v0  ;;  %v1338_v15 = vrot.slane %v7754_v40, 5  ;;  %v6888_v0 = vld [vmem:[%s7006_s10 + $0x5c] sm:$0x1]  ;;  %v1345_v51 = vrot.slane %v6889_v33, 5 }
  0xbe   : > { %6119 = vmatprep.mubr.bf16.mxu1 %v5280_v26  ;;  %6372 = vmatpush3.bf16.msra.mxu0 %v6813_v56  ;;  %v1334_v18 = vrot.slane %v6888_v0, 5  ;;  %v7769_v26 = vsel %vm7284_vm5, %v5298_v54, %v1324_v1  ;;  %v7773_v56 = vsel %vm7284_vm5, %v1326_v46, %v1327_v39  ;;  %v6890_v1 = vld [vmem:[%s7006_s10 + $0x68] sm:$0x1]  ;;  %v3822_v0 = vshll.u32 %v5656_v13, 16  ;;  %v6835_v40 = vld [vmem:[%s8795_s1 + $0x1f8] sm:$0xff]  }
  0xbf   : > { %6373 = vmatprep.subr.bf16.mxu0 %v6819_v47  ;;  %v1341_v54 = vrot.slane %v6890_v1, 5  ;;  %v5300_v46 = vrot.slane %v1237_v32, 9  ;;  %v1340_v39 = vrot.slane %v1338_v15, 4  ;;  %v3805_v33 = vor.u32 %v3804_v62, %v7760_v7  ;;  %v5659_v1 = vld [vmem:[%s7006_s10 + $0x34] sm:$0xf] }
  0xc0   : > { %v1347_v32 = vrot.slane %v1345_v51, 4  ;;  %v5657_v62 = vld [vmem:[%s7006_s10 + $0x2c] sm:$0x1]  ;;  %v7800_v17 = vrot.slane %v3822_v0, 5  ;;  %v3846_v13 = vshll.u32 %v5659_v1, 16  ;;  %v3850_v31 = vshrl.u32 %v5659_v1, 16 }
  0xc1   : > { %v3806_v10 = vrot.slane %v3805_v33, 4  ;;  %v7817_v29 = vsel %vm7284_vm5, %v1333_v52, %v1334_v18  ;;  %v7824_v45 = vsel %vm7284_vm5, %v5300_v46, %v1338_v15  ;;  %v7828_v14 = vsel %vm7284_vm5, %v1340_v39, %v1341_v54  ;;  %v1239_v18 = vld [vmem:[%s7006_s10 + $0x78] sm:$0xe] }
  0xc2   : > { %6374 = vmatpush3.bf16.msra.mxu0 %v6819_v47  ;;  %v7832_v16 = vsel %vm7284_vm5, %v5301_v58, %v1345_v51  ;;  %v7842_v15 = vsel %vm7284_vm5, %v1347_v32, %v1348_v19  ;;  %v3829_v5 = vor.u32 %v3828_v28, %v7800_v17  ;;  %v3839_v52 = vrot.slane %v3837_v38, 4  ;;  %v5661_v58 = vld [vmem:[%s7006_s10 + $0x3c] sm:$0xf]  ;;  %v5662_v51 = vld [vmem:[%s7006_s10 + $0x40] sm:$0xf] }
  0xc3   : > { %6375 = vmatprep.subr.bf16.mxu0 %v6823_v53  ;;  %v3801_v0 = vsel %vm7038_vm2, %v3796_v21, %v7760_v7  ;;  %v3811_v46 = vsel %vm7038_vm2, %v3806_v10, %v7788_v42  ;;  %v7853_v39 = vrot.slane %v3846_v13, 5  ;;  %v3852_v22 = vrot.slane %v3850_v31, 4  ;;  %v6893_v19 = vld [vmem:[%s7006_s10 + $0x80] sm:$0x1]  ;;  %v8012_v47 = vld [vmem:[%s7006_s10 + $0x68] sm:$0x1] }
  0xc4   : > { %6344 = vmatmul.mubr.bf16.gmra.mrb[8].mxu0 %v6812_v2  ;;  %v3840_v2 = vshll.u32 %v5658_v43, 16  ;;  %v3832_v43 = vshll.u32 %v5657_v62, 16  ;;  %v5302_v32 = vrot.slane %v1239_v18, 9  ;;  %v1240_v62 = vld [vmem:[%s7006_s10 + $0x84] sm:$0xe]  ;;  %v3861_v28 = vshrl.u32 %v5661_v58, 16 }
  0xc5   : > { %6120 = vmatmul.mubr.bf16.gmra.mrb[24].mxu1 %v5281_v20  ;;  %6347 = vmatprep.mubr.bf16.mxu0 %v6815_v3  ;;  %v6831_v20 = vld [vmem:[%s8795_s1 + $0x1f0] sm:$0xff]   ;;  %v6892_v3 = vld [vmem:[%s7006_s10 + $0x7c] sm:$0xf]  ;;  %v3864_v7 = vshll.u32 %v5661_v58, 16  ;;  %v3870_v38 = vshll.u32 %v5662_v51, 16  ;;  %v8817_v42 = vcombine.low %v7443_v41, %v7448_v12  ;;  %v7864_v13 = vrot.slane %v3829_v5, 4 }
  0xc6   : > { %6123 = vmatprep.mubr.bf16.mxu1 %v5282_v23  ;;  %6376 = vmatpush3.bf16.msra.mxu0 %v6823_v53  ;;  %v3819_v23 = vor.u32 %v3818_v44, %v3815_v34  ;;  %v6820_v53 = vld [vmem:[%s7006_s10 + $0x78] sm:$0xff]   ;;  %v1352_v44 = vrot.slane %v6892_v3, 5  ;;  %v3842_v54 = vrot.slane %v3840_v2, 5  ;;  %v7857_v1 = vrot.slane %v3832_v43, 5  ;;  %v7869_v21 = vld [vmem:[%s8795_s1 + $0x200] sm:$0xff]   ;;  %8825 = vst [vmem:[#allocation5_spill] sm:$0xff] %v8012_v47 }
  0xc7   : > { %6377 = vmatprep.subr.bf16.mxu0 %v6827_v50  ;;  %v5660_v34 = vld [vmem:[%s7006_s10 + $0x38] sm:$0x1]  ;;  %v3874_v2 = vshrl.u32 %v5662_v51, 16  ;;  %v6822_v43 = vld [vmem:[%s7006_s10 + $0x84] sm:$0xff]   ;;  %v3853_v12 = vor.u32 %v3852_v22, %v7853_v39  ;;  %v3866_v58 = vrot.slane %v3864_v7, 5  ;;  %v7891_v51 = vrot.slane %v3870_v38, 5 }
  0xc8   : > { %v7855_v33 = vrot.slane %v3819_v23, 4  ;;  %v1354_v10 = vrot.slane %v1352_v44, 4  ;;  %v3843_v31 = vor.u32 %v3842_v54, %v3839_v52  ;;  %v8818_v23 = vcombine.low %v7674_v59, %v7682_v25  ;;  %v6894_v18 = vld [vmem:[%s7006_s10 + $0x88] sm:$0xf]  ;;  %v5663_v5 = vld [vmem:[%s7006_s10 + $0x44] sm:$0x1] }
  0xc9   : > { %v1359_v3 = vrot.slane %v6894_v18, 5  ;;  %v7882_v59 = vcombine.low %v3801_v0, %v3811_v46  ;;  %v5664_v52 = vld [vmem:[%s7006_s10 + $0x48] sm:$0xf]  ;;  %v3863_v54 = vrot.slane %v3861_v28, 4  ;;  %v3876_v22 = vrot.slane %v3874_v2, 4 }
  0xca   : > { %6378 = vmatpush3.bf16.msra.mxu0 %v6827_v50  ;;  %v1355_v50 = vrot.slane %v6893_v19, 5  ;;  %v6824_v19 = vld [vmem:[%s7006_s10 + $0x90] sm:$0xff]   ;;  %v3825_v0 = vsel %vm7038_vm2, %v7855_v33, %v7800_v17  ;;  %v3844_v46 = vrot.slane %v3843_v31, 4  ;;  %v3835_v28 = vsel %vm7038_vm2, %v7864_v13, %v7857_v1  ;;  %v7913_v33 = vld [vmem:[%s7006_s10 + $0x58] sm:$0xf]  ;;  %v6825_v31 = vld [vmem:[%s8795_s1 + $0xc8] sm:$0xff]  }
  0xcb   : > { %6379 = vmatprep.subr.bf16.mxu0 %v6831_v20  ;;  %v3854_v38 = vrot.slane %v3853_v12, 4  ;;  %v1361_v2 = vrot.slane %v1359_v3, 4  ;;  %v5667_v17 = vld [vmem:[%s7006_s10 + $0x54] sm:$0xf]  ;;  %v3880_v1 = vshll.u32 %v5663_v5, 16  ;;  %v3885_v13 = vshrl.u32 %v5664_v52, 16 }
  0xcc   : > { %6348 = vmatmul.mubr.bf16.gmra.mrb[12].mxu0 %v6818_v48  ;;  %v3856_v48 = vshll.u32 %v5660_v34, 16  ;;  %v7909_v7 = vsel %vm7284_vm5, %v1354_v10, %v1355_v50  ;;  %v3888_v50 = vshll.u32 %v5664_v52, 16  ;;  %v3867_v10 = vor.u32 %v3866_v58, %v3863_v54  ;;  %v6826_v54 = vld [vmem:[%s7006_s10 + $0x9c] sm:$0xff]   ;;  %v6900_v41 = vld [vmem:[%s7006_s10 + $0xac] sm:$0xf] }
  0xcd   : > { %6124 = vmatmul.mubr.bf16.gmra.mrb[28].mxu1 %v8817_v42  ;;  %6351 = vmatprep.mubr.bf16.mxu0 %v6820_v53  ;;  %v5303_v53 = vrot.slane %v1240_v62, 9  ;;  %v6895_v42 = vld [vmem:[%s7006_s10 + $0x8c] sm:$0x1]  ;;  %v3918_v5 = vshll.u32 %v7913_v33, 16  ;;  %v8820_v52 = vcombine.low %v7690_v63, %v7698_v8  ;;  %v7949_v63 = vld [vmem:[%s7006_s10 + $0x50] sm:$0x1] }
  0xce   : > { %6143 = vmatprep.mubr.bf16.mxu1 %v8818_v23  ;;  %6380 = vmatpush3.bf16.msra.mxu0 %v6831_v20  ;;  %v7888_v20 = vsel %vm7284_vm5, %v5302_v32, %v1352_v44  ;;  %v3858_v62 = vrot.slane %v3856_v48, 5  ;;  %v1362_v23 = vrot.slane %v6895_v42, 5  ;;  %v1241_v44 = vld [vmem:[%s7006_s10 + $0x90] sm:$0xe]  ;;  %v7901_v32 = vld [vmem:[%s7006_s10 + $0x4c] sm:$0xf]  ;;  %v3877_v48 = vor.u32 %v3876_v22, %v7891_v51 }
  0xcf   : > { %6381 = vmatprep.subr.bf16.mxu0 %v6835_v40  ;;  %v3894_v12 = vshll.u32 %v7901_v32, 16  ;;  %v3898_v18 = vshrl.u32 %v7901_v32, 16  ;;  %v8819_v42 = vcombine.low %v7678_v30, %v7686_v6  ;;  %v6829_v30 = vld [vmem:[%s8795_s1 + $0xd0] sm:$0xff]   ;;  %v3849_v6 = vsel %vm7038_vm2, %v3844_v46, %v7853_v39  ;;  %v6828_v8 = vld [vmem:[%s7006_s10 + $0xa8] sm:$0xff]   ;;  %v7956_v39 = vld [vmem:[%s7006_s10 + $0x5c] sm:$0x1] }
  0xd0   : > { %v3859_v58 = vsel %vm7038_vm2, %v3854_v38, %v3858_v62  ;;  %v5304_v22 = vrot.slane %v1241_v44, 9  ;;  %v3890_v25 = vrot.slane %v3888_v50, 5  ;;  %8821 = vst [vmem:[#allocation3_spill] sm:$0xff] %v7956_v39  ;;  %v3868_v46 = vrot.slane %v3867_v10, 4 }
  0xd1   : > { %v3878_v62 = vrot.slane %v3877_v48, 4  ;;  %v7958_v38 = vrot.slane %v3894_v12, 5  ;;  %v7960_v34 = vrot.slane %v3918_v5, 5  ;;  %v7965_v50 = vcombine.low %v3825_v0, %v3835_v28  ;;  %v5670_v28 = vld [vmem:[%s7006_s10 + $0x60] sm:$0xf] }
  0xd2   : > { %6382 = vmatpush3.bf16.msra.mxu0 %v6835_v40  ;;  %v7921_v40 = vsel %vm7284_vm5, %v5303_v53, %v1359_v3  ;;  %v3909_v53 = vshrl.u32 %v5667_v17, 16  ;;  %v3912_v3 = vshll.u32 %v5667_v17, 16  ;;  %v6896_v17 = vld [vmem:[%s7006_s10 + $0x94] sm:$0xf]  ;;  %v7969_v48 = vcombine.low %v3849_v6, %v3859_v58 }
  0xd3   : > { %6415 = vmatprep.subr.bf16.mxu0 %v7869_v21  ;;  %v3904_v0 = vshll.u32 %v7949_v63, 16  ;;  %v3873_v6 = vsel %vm7038_vm2, %v3868_v46, %v7891_v51  ;;  %v8824_v46 = vcombine.low %v7712_v61, %v7716_v36 }
  0xd4   : > { %6352 = vmatmul.mubr.bf16.gmra.mrb[16].mxu0 %v6822_v43  ;;  %v3922_v43 = vshrl.u32 %v7913_v33, 16  ;;  %v3911_v44 = vrot.slane %v3909_v53, 4  ;;  %v6897_v53 = vld [vmem:[%s7006_s10 + $0x98] sm:$0x1] }
  0xd5   : > { %6144 = vmatmul.mubr.bf16.vlgmr.msra.gmra.mrb[0].mxu1 %v8819_v42  ;;  %6355 = vmatprep.mubr.bf16.mxu0 %v6824_v19  ;;  %v7952_v19 = vrot.slane %v3880_v1, 5  ;;  %v1366_v42 = vrot.slane %v6896_v17, 5  ;;  %v6898_v17 = vld [vmem:[%s7006_s10 + $0xa0] sm:$0xf]  ;;  %v3906_v36 = vrot.slane %v3904_v0, 5 }
  0xd6   : > { %6176 = vmatpush3.bf16.msra.mxu1 %v7631_v60  ;;  %6147 = vmatprep.mubr.bf16.mxu1 %v8820_v52  ;;  %v7946_v60 = vsel %vm7284_vm5, %v1361_v2, %v1362_v23  ;;  %v3887_v52 = vrot.slane %v3885_v13, 4  ;;  %v3900_v23 = vrot.slane %v3898_v18, 4  ;;  %v3914_v2 = vrot.slane %v3912_v3, 5  ;;  %v6833_v13 = vld [vmem:[%s8795_s1 + $0xd8] sm:$0xff]  }
  0xd7   : > { %6177 = vmatprep.subr.bf16.mxu1 %v6825_v31  ;;  %v3924_v1 = vrot.slane %v3922_v43, 4  ;;  %v1242_v18 = vld [vmem:[%s7006_s10 + $0x9c] sm:$0xe]  ;;  %v1369_v3 = vrot.slane %v6897_v53, 5  ;;  %v7982_v43 = vld [vmem:[%s7006_s10 + $0x64] sm:$0xf] }
  0xd8   : > { %v3891_v5 = vor.u32 %v3890_v25, %v3887_v52  ;;  %8822 = vst [vmem:[#allocation4_spill] sm:$0xff] %v7982_v43  ;;  %v3901_v58 = vor.u32 %v3900_v23, %v7958_v38  ;;  %v1373_v12 = vrot.slane %v6898_v17, 5  ;;  %v8823_v25 = vcombine.low %v7702_v24, %v7706_v35  ;;  %v6830_v23 = vld [vmem:[%s7006_s10 + $0xb4] sm:$0xff]   ;;  %v6836_v24 = vld [vmem:[%s8795_s1 + $0xe0] sm:$0xff]   ;;  %v5673_v17 = vld [vmem:[%s7006_s10 + $0x6c] sm:$0xf] }
  0xd9   : > { %v1368_v52 = vrot.slane %v1366_v42, 4  ;;  %v3915_v53 = vor.u32 %v3914_v2, %v3911_v44  ;;  %v3925_v51 = vor.u32 %v3924_v1, %v7960_v34  ;;  %v3933_v35 = vshrl.u32 %v5670_v28, 16  ;;  %v6899_v2 = vld [vmem:[%s7006_s10 + $0xa4] sm:$0x1] }
  0xda   : > { %6178 = vmatpush3.bf16.msra.mxu1 %v6825_v31  ;;  %v7976_v31 = vsel %vm7284_vm5, %v5304_v22, %v1366_v42  ;;  %v3928_v22 = vshll.u32 %v7956_v39, 16  ;;  %v3946_v42 = vshrl.u32 %v7982_v43, 16  ;;  %v3892_v61 = vrot.slane %v3891_v5, 4  ;;  %v8151_v39 = vld [vmem:[%s7006_s10 + $0x98] sm:$0x1] }
  0xdb   : > { %6179 = vmatprep.subr.bf16.mxu1 %v6829_v30  ;;  %v5305_v44 = vrot.slane %v1242_v18, 9  ;;  %v1376_v1 = vrot.slane %v6899_v2, 5  ;;  %v3916_v5 = vrot.slane %v3915_v53, 4  ;;  %v3926_v18 = vrot.slane %v3925_v51, 4  ;;  %8838 = vst [vmem:[#allocation14_spill] sm:$0xff] %v8151_v39 }
  0xdc   : > { %6356 = vmatmul.mubr.bf16.gmra.mrb[20].mxu0 %v6826_v54  ;;  %v3883_v54 = vsel %vm7038_vm2, %v3878_v62, %v7952_v19  ;;  %v3942_v19 = vshll.u32 %v7982_v43, 16  ;;  %v6832_v62 = vld [vmem:[%s7006_s10 + $0xc0] sm:$0xff]   ;;  %v3930_v10 = vrot.slane %v3928_v22, 5  ;;  %v8018_v43 = vsel %vm7284_vm5, %v1368_v52, %v1369_v3 }
  0xdd   : > { %6148 = vmatmul.mubr.bf16.gmra.mrb[4].mxu1 %v8823_v25  ;;  %6359 = vmatprep.mubr.bf16.mxu0 %v6828_v8  ;;  %v3936_v8 = vshll.u32 %v5670_v28, 16  ;;  %v3902_v25 = vrot.slane %v3901_v58, 4  ;;  %v1380_v28 = vrot.slane %v6900_v41, 5  ;;  %v8014_v55 = vcombine.low %v3873_v6, %v3883_v54  ;;  %v6838_v41 = vld [vmem:[%s8795_s1 + $0xe8] sm:$0xff]  }
  0xde   : > { %6151 = vmatprep.mubr.bf16.mxu1 %v8824_v46  ;;  %6180 = vmatpush3.bf16.msra.mxu1 %v6829_v30  ;;  %v1243_v30 = vld [vmem:[%s7006_s10 + $0xa8] sm:$0xe]  ;;  %v1375_v46 = vrot.slane %v1373_v12, 4  ;;  %v3935_v0 = vrot.slane %v3933_v35, 4  ;;  %v8020_v58 = vrot.slane %v3942_v19, 5  ;;  %v3948_v22 = vrot.slane %v3946_v42, 4 }
  0xdf   : > { %6181 = vmatprep.subr.bf16.mxu1 %v6833_v13  ;;  %v3938_v2 = vrot.slane %v3936_v8, 5  ;;  %v3897_v3 = vsel %vm7038_vm2, %v3892_v61, %v7958_v38  ;;  %v8030_v6 = vsel %vm7284_vm5, %v5305_v44, %v1373_v12  ;;  %v3957_v54 = vshrl.u32 %v5673_v17, 16  ;;  %v6901_v38 = vld [vmem:[%s7006_s10 + $0xb0] sm:$0x1]  ;;  %v1244_v19 = vld [vmem:[%s7006_s10 + $0xb4] sm:$0xe] }
  0xe0   : > { %v3960_v52 = vshll.u32 %v5673_v17, 16  ;;  %v3907_v53 = vsel %vm7038_vm2, %v3902_v25, %v3906_v36  ;;  %v8039_v51 = vsel %vm7284_vm5, %v1375_v46, %v1376_v1  ;;  %v5306_v35 = vrot.slane %v1243_v30, 9  ;;  %v8061_v30 = vld [vmem:[%s7006_s10 + $0x74] sm:$0x1]  ;;  %v6902_v25 = vld [vmem:[%s7006_s10 + $0xb8] sm:$0xf] }
  0xe1   : > { %v1383_v8 = vrot.slane %v6901_v38, 5  ;;  %v8827_v12 = vcombine.low %v7733_v49, %v7747_v4  ;;  %v3921_v42 = vsel %vm7038_vm2, %v3916_v5, %v7960_v34  ;;  %v3931_v61 = vsel %vm7038_vm2, %v3926_v18, %v3930_v10  ;;  %v6834_v4 = vld [vmem:[%s7006_s10 + $0xcc] sm:$0xff]   ;;  %8829 = vst [vmem:[#allocation7_spill] sm:$0xff] %v8061_v30  ;;  %v5679_v38 = vld [vmem:[%s7006_s10 + $0x84] sm:$0xf] }
  0xe2   : > { %6182 = vmatpush3.bf16.msra.mxu1 %v6833_v13  ;;  %v8033_v13 = vld [vmem:[%s7006_s10 + $0x70] sm:$0xf]  ;;  %v1382_v36 = vrot.slane %v1380_v28, 4  ;;  %v3952_v44 = vshll.u32 %v8012_v47, 16  ;;  %v8828_v49 = vcombine.low %v7769_v26, %v7773_v56  ;;  %v3949_v1 = vor.u32 %v3948_v22, %v8020_v58  ;;  %v8078_v22 = vld [vmem:[%s7006_s10 + $0x7c] sm:$0xf] }
  0xe3   : > { %6183 = vmatprep.subr.bf16.mxu1 %v6836_v24  ;;  %8826 = vst [vmem:[#allocation6_spill] sm:$0xff] %v8033_v13  ;;  %v3966_v34 = vshll.u32 %v8033_v13, 16  ;;  %v3970_v10 = vshrl.u32 %v8033_v13, 16  ;;  %v5307_v17 = vrot.slane %v1244_v19, 9  ;;  %v1387_v46 = vrot.slane %v6902_v25, 5  ;;  %8830 = vst [vmem:[#allocation8_spill] sm:$0xff] %v8078_v22 }
  0xe4   : > { %6360 = vmatmul.mubr.bf16.gmra.mrb[24].mxu0 %v6830_v23  ;;  %v6840_v23 = vld [vmem:[%s8795_s1 + $0xf0] sm:$0xff]   ;;  %v3959_v26 = vrot.slane %v3957_v54, 4  ;;  %v3962_v56 = vrot.slane %v3960_v52, 5  ;;  %v8069_v18 = vcombine.low %v3897_v3, %v3907_v53  ;;  %v8081_v19 = vcombine.low %v3921_v42, %v3931_v61  ;;  %v6903_v3 = vld [vmem:[%s7006_s10 + $0xbc] sm:$0x1] }
  0xe5   : > { %6152 = vmatmul.mubr.bf16.gmra.mrb[8].mxu1 %v8827_v12  ;;  %6363 = vmatprep.mubr.bf16.mxu0 %v6832_v62  ;;  %v3939_v62 = vor.u32 %v3938_v2, %v3935_v0  ;;  %v8075_v2 = vsel %vm7284_vm5, %v5306_v35, %v1380_v28  ;;  %v8085_v54 = vsel %vm7284_vm5, %v1382_v36, %v1383_v8  ;;  %v8087_v52 = vrot.slane %v3952_v44, 5  ;;  %v6842_v12 = vld [vmem:[%s8795_s1 + $0xf8] sm:$0xff]   ;;  %v8094_v28 = vld [vmem:[%s7006_s10 + $0x88] sm:$0xf] }
  0xe6   : > { %6155 = vmatprep.mubr.bf16.mxu1 %v8828_v49  ;;  %6184 = vmatpush3.bf16.msra.mxu1 %v6836_v24  ;;  %v5676_v24 = vld [vmem:[%s7006_s10 + $0x78] sm:$0xf]  ;;  %v1390_v53 = vrot.slane %v6903_v3, 5  ;;  %8831 = vst [vmem:[#allocation9_spill] sm:$0xff] %v8094_v28  ;;  %v8098_v42 = vrot.slane %v3949_v1, 4  ;;  %v8100_v61 = vrot.slane %v3966_v34, 5  ;;  %v8104_v36 = vsel %vm7284_vm5, %v5307_v17, %v1387_v46 }
  0xe7   : > { %6185 = vmatprep.subr.bf16.mxu1 %v6838_v41  ;;  %v8096_v35 = vrot.slane %v3939_v62, 4  ;;  %v3972_v8 = vrot.slane %v3970_v10, 4  ;;  %v1389_v44 = vrot.slane %v1387_v46, 4  ;;  %v3963_v49 = vor.u32 %v3962_v56, %v3959_v26  ;;  %v5682_v3 = vld [vmem:[%s7006_s10 + $0x90] sm:$0xf] }
  0xe8   : > { %v3976_v25 = vshll.u32 %v8061_v30, 16  ;;  %v3984_v0 = vshll.u32 %v5676_v24, 16  ;;  %v3990_v62 = vshll.u32 %v8078_v22, 16  ;;  %v3994_v1 = vshrl.u32 %v8078_v22, 16  ;;  %v8111_v34 = vld [vmem:[%s7006_s10 + $0x94] sm:$0xf] }
  0xe9   : > { %8832 = vst [vmem:[#allocation10_spill] sm:$0xff] %v8111_v34  ;;  %v8833_v10 = vcombine.low %v7813_v27, %v7817_v29  ;;  %v4005_v17 = vshrl.u32 %v5679_v38, 16  ;;  %v4008_v46 = vshll.u32 %v5679_v38, 16  ;;  %v4018_v26 = vshrl.u32 %v8094_v28, 16  ;;  %v5685_v38 = vld [vmem:[%s7006_s10 + $0x9c] sm:$0xf] }
  0xea   : > { %6186 = vmatpush3.bf16.msra.mxu1 %v6838_v41  ;;  %v3981_v41 = vshrl.u32 %v5676_v24, 16  ;;  %v8834_v56 = vcombine.low %v7824_v45, %v7828_v14  ;;  %v3973_v29 = vor.u32 %v3972_v8, %v8100_v61  ;;  %v4032_v24 = vshll.u32 %v5682_v3, 16  ;;  %v8133_v45 = vld [vmem:[%s7006_s10 + $0x80] sm:$0x1] }
  0xeb   : > { %6187 = vmatprep.subr.bf16.mxu1 %v6840_v23  ;;  %v8130_v5 = vrot.slane %v3976_v25, 5  ;;  %8835 = vst [vmem:[#allocation11_spill] sm:$0xff] %v8133_v45  ;;  %v4038_v14 = vshll.u32 %v8111_v34, 16  ;;  %v3986_v27 = vrot.slane %v3984_v0, 5  ;;  %v3996_v8 = vrot.slane %v3994_v1, 4 }
  0xec   : > { %6364 = vmatmul.mubr.bf16.gmra.mrb[28].mxu0 %v6834_v4  ;;  %v4014_v4 = vshll.u32 %v8094_v28, 16  ;;  %v8137_v28 = vrot.slane %v3990_v62, 5  ;;  %v8143_v22 = vld [vmem:[%s7006_s10 + $0xa0] sm:$0xf]  ;;  %v4007_v25 = vrot.slane %v4005_v17, 4  ;;  %v4010_v30 = vrot.slane %v4008_v46, 5 }
  0xed   : > { %6156 = vmatmul.mubr.bf16.gmra.mrb[12].mxu1 %v8833_v10  ;;  %6383 = vmatprep.mubr.bf16.mxu0 %v7882_v59  ;;  %v4029_v59 = vshrl.u32 %v5682_v3, 16  ;;  %v8128_v10 = vrot.slane %v3963_v49, 4  ;;  %v8140_v3 = vld [vmem:[%s7006_s10 + $0x8c] sm:$0x1]  ;;  %8837 = vst [vmem:[#allocation13_spill] sm:$0xff] %v8143_v22  ;;  %v4020_v47 = vrot.slane %v4018_v26, 4  ;;  %v8160_v62 = vsel %vm7284_vm5, %v1389_v44, %v1390_v53 }
  0xee   : > { %6159 = vmatprep.mubr.bf16.mxu1 %v8834_v56  ;;  %6188 = vmatpush3.bf16.msra.mxu1 %v6840_v23  ;;  %v4042_v23 = vshrl.u32 %v8111_v34, 16  ;;  %v3983_v56 = vrot.slane %v3981_v41, 4  ;;  %8836 = vst [vmem:[#allocation12_spill] sm:$0xff] %v8140_v3  ;;  %v6839_v49 = vld [vmem:[%s8795_s1 + $0x208] sm:$0xff]   ;;  %v8148_v13 = vrot.slane %v4014_v4, 5  ;;  %v4034_v34 = vrot.slane %v4032_v24, 5 }
  0xef   : > { %6189 = vmatprep.subr.bf16.mxu1 %v6842_v12  ;;  %v5688_v41 = vld [vmem:[%s7006_s10 + $0xa8] sm:$0xf]  ;;  %v4031_v1 = vrot.slane %v4029_v59, 4  ;;  %v8165_v17 = vld [vmem:[%s8795_s1 + $0x100] sm:$0xff]   ;;  %v8168_v46 = vrot.slane %v4038_v14, 5  ;;  %v4053_v26 = vshrl.u32 %v5685_v38, 16  ;;  %v8840_v24 = vcombine.low %v7832_v16, %v7842_v15 }
  0xf0   : > { %8839 = vst [vmem:[#allocation15_spill] sm:$0xff] %v8165_v17  ;;  %v4044_v4 = vrot.slane %v4042_v23, 4  ;;  %v4056_v0 = vshll.u32 %v5685_v38, 16  ;;  %v8171_v53 = vrot.slane %v3973_v29, 4  ;;  %v4062_v44 = vshll.u32 %v8143_v22, 16  ;;  %v6841_v16 = vld [vmem:[%s8795_s1 + $0x210] sm:$0xff]  }
  0xf1   : > { %v4066_v59 = vshrl.u32 %v8143_v22, 16  ;;  %v3987_v14 = vor.u32 %v3986_v27, %v3983_v56  ;;  %v3997_v38 = vor.u32 %v3996_v8, %v8137_v28  ;;  %v4011_v23 = vor.u32 %v4010_v30, %v4007_v25  ;;  %v8183_v29 = vld [vmem:[%s7006_s10 + $0xac] sm:$0xf]  ;;  %v8196_v25 = vld [vmem:[%s7006_s10 + $0xa4] sm:$0x1] }
  0xf2   : > { %6190 = vmatpush3.bf16.msra.mxu1 %v6842_v12  ;;  %v4000_v12 = vshll.u32 %v8133_v45, 16  ;;  %8841 = vst [vmem:[#allocation16_spill] sm:$0xff] %v8183_v29  ;;  %v4021_v15 = vor.u32 %v4020_v47, %v8148_v13  ;;  %v4077_v27 = vshrl.u32 %v5688_v41, 16  ;;  %v4080_v30 = vshll.u32 %v5688_v41, 16 }
  0xf3   : > { %6463 = vmatprep.subr.bf16.mxu1 %v8165_v17  ;;  %v8842_v17 = vcombine.low %v7888_v20, %v7909_v7  ;;  %v4035_v56 = vor.u32 %v4034_v34, %v4031_v1  ;;  %v4045_v8 = vor.u32 %v4044_v4, %v8168_v46  ;;  %v4055_v20 = vrot.slane %v4053_v26, 4 }
  0xf4   : > { %6384 = vmatmul.mubr.bf16.vlgmr.msra.gmra.mrb[0].mxu0 %v7965_v50  ;;  %v4024_v50 = vshll.u32 %v8140_v3, 16  ;;  %v4058_v7 = vrot.slane %v4056_v0, 5  ;;  %v4090_v22 = vshrl.u32 %v8183_v29, 16  ;;  %v3988_v47 = vrot.slane %v3987_v14, 4  ;;  %v6843_v0 = vld [vmem:[%s8795_s1 + $0x218] sm:$0xff]  }
  0xf5   : > { %6160 = vmatmul.mubr.bf16.gmra.mrb[16].mxu1 %v8840_v24  ;;  %6416 = vmatpush3.bf16.msra.mxu0 %v7869_v21  ;;  %v4048_v21 = vshll.u32 %v8151_v39, 16  ;;  %v4086_v24 = vshll.u32 %v8183_v29, 16  ;;  %v3998_v39 = vrot.slane %v3997_v38, 4  ;;  %v4002_v3 = vrot.slane %v4000_v12, 5 }
  0xf6   : > { %6163 = vmatprep.mubr.bf16.mxu1 %v8842_v17  ;;  %6387 = vmatprep.mubr.bf16.mxu0 %v7969_v48  ;;  %v8198_v17 = vrot.slane %v4062_v44, 5  ;;  %v4068_v48 = vrot.slane %v4066_v59, 4  ;;  %v4026_v41 = vrot.slane %v4024_v50, 5  ;;  %v4012_v34 = vrot.slane %v4011_v23, 4 }
  0xf7   : > { %6417 = vmatprep.subr.bf16.mxu0 %v6839_v49  ;;  %v4022_v1 = vrot.slane %v4021_v15, 4  ;;  %v4079_v4 = vrot.slane %v4077_v27, 4  ;;  %v4082_v45 = vrot.slane %v4080_v30, 5  ;;  %v4036_v26 = vrot.slane %v4035_v56, 4  ;;  %v8264_v27 = vld [vmem:[%s7006_s10 + $0xbc] sm:$0x1] }
  0xf8   : > { %v4050_v44 = vrot.slane %v4048_v21, 5  ;;  %v4059_v59 = vor.u32 %v4058_v7, %v4055_v20  ;;  %v4072_v29 = vshll.u32 %v8196_v25, 16  ;;  %v4069_v12 = vor.u32 %v4068_v48, %v8198_v17  ;;  %v8231_v21 = vld [vmem:[%s7006_s10 + $0xb0] sm:$0x1] }
  0xf9   : > { %6418 = vmatpush3.bf16.msra.mxu0 %v6839_v49  ;;  %v4046_v49 = vrot.slane %v4045_v8, 4  ;;  %v8208_v14 = vrot.slane %v4086_v24, 5  ;;  %v4092_v38 = vrot.slane %v4090_v22, 4  ;;  %v8843_v23 = vor.u32 %v7616_v57, %v7614_v11 }
  0xfa   : > { %6419 = vmatprep.subr.bf16.mxu0 %v6841_v16  ;;  %v8844_v15 = vcombine.low %v7921_v40, %v7946_v60  ;;  %v3979_v22 = vsel %vm7038_vm2, %v8171_v53, %v8130_v5  ;;  %v3993_v57 = vsel %vm7038_vm2, %v3988_v47, %v8137_v28  ;;  %v8845_v40 = vcombine.low %v7976_v31, %v8018_v43  ;;  %v6846_v31 = vld [vmem:[%s8795_s1 + $0x220] sm:$0xff]  }
  0xfb   : > { %v8213_v50 = vrot.slane %v8843_v23, 4  ;;  %v4003_v60 = vsel %vm7038_vm2, %v3998_v39, %v4002_v3  ;;  %v4083_v5 = vor.u32 %v4082_v45, %v4079_v4  ;;  %v4027_v28 = vsel %vm7038_vm2, %v4022_v1, %v4026_v41  ;;  %v5744_v41 = vld [vmem:[%s7006_s10 + $0x48] sm:$0xe] }
  0xfc   : > { %6388 = vmatmul.mubr.bf16.gmra.mrb[4].mxu0 %v8014_v55  ;;  %v3969_v55 = vsel %vm7038_vm2, %v8128_v10, %v8100_v61  ;;  %v5691_v61 = vld [vmem:[%s7006_s10 + $0xb4] sm:$0xf]  ;;  %v8243_v10 = vld [vmem:[%s7006_s10 + $0xb8] sm:$0xf]  ;;  %v4041_v39 = vsel %vm7038_vm2, %v4036_v26, %v8168_v46  ;;  %v8253_v43 = vrot.slane %v4059_v59, 4  ;;  %v8255_v3 = vrot.slane %v4072_v29, 5 }
  0xfd   : > { %6164 = vmatmul.mubr.bf16.gmra.mrb[20].mxu1 %v8844_v15  ;;  %6391 = vmatprep.mubr.bf16.mxu0 %v8069_v18  ;;  %v4017_v18 = vsel %vm7038_vm2, %v4012_v34, %v8148_v13  ;;  %v4051_v13 = vsel %vm7038_vm2, %v4046_v49, %v4050_v44  ;;  %v8259_v45 = vrot.slane %v4069_v12, 4  ;;  %v4093_v53 = vor.u32 %v4092_v38, %v8208_v14  ;;  %v5745_v26 = vld [vmem:[%s7006_s10 + $0x54] sm:$0xe] }
  0xfe   : > { %6167 = vmatprep.mubr.bf16.mxu1 %v8845_v40  ;;  %6420 = vmatpush3.bf16.msra.mxu0 %v6841_v16  ;;  %v4096_v16 = vshll.u32 %v8231_v21, 16  ;;  %v8846_v46 = vsel %vm7038_vm2, %v8098_v42, %v8087_v52  ;;  %v8847_v29 = vsel %vm7038_vm2, %v8096_v35, %v8020_v58  ;;  %v4101_v56 = vshrl.u32 %v5691_v61, 16 }
  0xff   : > { %6421 = vmatprep.subr.bf16.mxu0 %v6843_v0  ;;  %v5722_v30 = vcombine.low %v8847_v29, %v8846_v46  ;;  %v4104_v8 = vshll.u32 %v5691_v61, 16  ;;  %v4110_v20 = vshll.u32 %v8243_v10, 16  ;;  %v5338_v7 = vcombine.low %v8075_v2, %v8085_v54  ;;  %v6849_v2 = vld [vmem:[%s8795_s1 + $0x228] sm:$0xff]   ;;  %v5694_v54 = vld [vmem:[%s7006_s10 + $0xc0] sm:$0xf]  ;;  %v8851_v29 = vld [vmem:[#allocation5_spill] sm:$0xff] }
 0x100   : > { %v5339_v48 = vcombine.low %v8104_v36, %v8160_v62  ;;  %v5723_v24 = vcombine.low %v3969_v55, %v3979_v22  ;;  %v8281_v52 = vrot.slane %v4083_v5, 4  ;;  %v5724_v42 = vcombine.low %v3993_v57, %v4003_v60 }
 0x101   : > { %v8283_v58 = vcombine.low %v4017_v18, %v4027_v28  ;;  %v8285_v35 = vcombine.low %v4041_v39, %v4051_v13  ;;  %v4065_v47 = vsel %vm7038_vm2, %v8253_v43, %v8198_v17  ;;  %v4075_v34 = vsel %vm7038_vm2, %v8259_v45, %v8255_v3  ;;  %v5747_v28 = vld [vmem:[%s7006_s10 + $0x6c] sm:$0xe] }
 0x102   : > { %6422 = vmatpush3.bf16.msra.mxu0 %v6843_v0  ;;  %v8301_v1 = vrot.slane %v4093_v53, 4  ;;  %v8303_v4 = vrot.slane %v4096_v16, 5  ;;  %v4114_v0 = vshrl.u32 %v8243_v10, 16  ;;  %v8848_v44 = vcombine.low %v8030_v6, %v8039_v51  ;;  %v6852_v6 = vld [vmem:[%s8795_s1 + $0x230] sm:$0xff]   ;;  %v8325_v51 = vld [vmem:[%s7006_s10 + $0xc4] sm:$0xf] }
 0x103   : > { %6423 = vmatprep.subr.bf16.mxu0 %v6846_v31  ;;  %v8310_v59 = vrot.slane %v4101_v56, 4  ;;  %v8314_v49 = vrot.slane %v4110_v20, 5  ;;  %v4120_v12 = vshll.u32 %v8264_v27, 16  ;;  %v4089_v38 = vsel %vm7038_vm2, %v8281_v52, %v8208_v14  ;;  %v5746_v14 = vld [vmem:[%s7006_s10 + $0x60] sm:$0xe]  ;;  %v8849_v39 = vld [vmem:[#allocation3_spill] sm:$0xff] }
 0x104   : > { %6392 = vmatmul.mubr.bf16.gmra.mrb[8].mxu0 %v8081_v19  ;;  %v8312_v19 = vrot.slane %v4104_v8, 5  ;;  %v4125_v23 = vshrl.u32 %v5694_v54, 16  ;;  %v5760_v15 = vrot.slane %v5744_v41, 9  ;;  %v4588_v55 = vrot.slane %v7901_v32, 5  ;;  %v6844_v13 = vld [vmem:[%s7006_s10 + $0xc] sm:$0xff]   ;;  %v6855_v56 = vld [vmem:[%s8795_s1 + $0x238] sm:$0xff]  }
 0x105   : > { %6168 = vmatmul.mubr.bf16.gmra.mrb[24].mxu1 %v8848_v44  ;;  %6395 = vmatprep.mubr.bf16.mxu0 %v5722_v30  ;;  %v4128_v22 = vshll.u32 %v5694_v54, 16  ;;  %v4591_v57 = vrot.slane %v7949_v63, 5  ;;  %v5761_v40 = vrot.slane %v5745_v26, 9  ;;  %v4595_v60 = vrot.slane %v7913_v33, 5  ;;  %v8850_v16 = vld [vmem:[#allocation4_spill] sm:$0xff]  ;;  %v8852_v52 = vld [vmem:[#allocation6_spill] sm:$0xff] }
 0x106   : > { %6171 = vmatprep.mubr.bf16.mxu1 %v5338_v7  ;;  %6424 = vmatpush3.bf16.msra.mxu0 %v6846_v31  ;;  %v4099_v18 = vsel %vm7038_vm2, %v8301_v1, %v8303_v4  ;;  %v8335_v5 = vrot.slane %v4114_v0, 4  ;;  %v8339_v61 = vsel %vm7284_vm5, %v5760_v15, %v4588_v55  ;;  %v4590_v32 = vrot.slane %v4588_v55, 4  ;;  %v8853_v4 = vld [vmem:[#allocation7_spill] sm:$0xff] }
 0x107   : > { %6425 = vmatprep.subr.bf16.mxu0 %v6849_v2  ;;  %v4134_v31 = vshll.u32 %v8325_v51, 16  ;;  %v8345_v63 = vsel %vm7284_vm5, %v5761_v40, %v4595_v60  ;;  %v4597_v33 = vrot.slane %v4595_v60, 4  ;;  %v4598_v3 = vrot.slane %v8849_v39, 5  ;;  %v8376_v26 = vld [vmem:[%s7006_s10 + $0xc8] sm:$0x1]  ;;  %v6845_v40 = vld [vmem:[%s7006_s10 + $0x18] sm:$0xff]  }
 0x108   : > { %v8351_v45 = vsel %vm7284_vm5, %v4590_v32, %v4591_v57  ;;  %v5762_v53 = vrot.slane %v5746_v14, 9  ;;  %v4602_v46 = vrot.slane %v8850_v16, 5  ;;  %v4605_v30 = vrot.slane %v8851_v29, 5  ;;  %v6847_v39 = vld [vmem:[%s7006_s10 + $0x24] sm:$0xff]  }
 0x109   : > { %v5792_v8 = vcombine.low %v8339_v61, %v8351_v45  ;;  %v8362_v20 = vsel %vm7284_vm5, %v4597_v33, %v4598_v3  ;;  %v5763_v7 = vrot.slane %v5747_v28, 9  ;;  %v4612_v0 = vrot.slane %v8853_v4, 5  ;;  %v8855_v28 = vld [vmem:[#allocation11_spill] sm:$0xff]  ;;  %v5453_v61 = vld [vmem:[%s7006_s10 + $0x90] sm:$0xf] }
 0x10a   : > { %6426 = vmatpush3.bf16.msra.mxu0 %v6849_v2  ;;  %v4609_v2 = vrot.slane %v8852_v52, 5  ;;  %v5793_v54 = vcombine.low %v8345_v63, %v8362_v20  ;;  %v8369_v41 = vsel %vm7284_vm5, %v5762_v53, %v4602_v46  ;;  %v4604_v1 = vrot.slane %v4602_v46, 4  ;;  %v8856_v53 = vld [vmem:[#allocation2_spill] sm:$0xff]  ;;  %v6861_v45 = vld [vmem:[%s7006_s10 + $0xa8] sm:$0xff]  }
 0x10b   : > { %6427 = vmatprep.subr.bf16.mxu0 %v6852_v6  ;;  %v8378_v44 = vrot.slane %v4125_v23, 4  ;;  %v8391_v36 = vcombine.low %v4065_v47, %v4075_v34  ;;  %v4107_v62 = vor.u32 %v8312_v19, %v8310_v59  ;;  %v5748_v23 = vld [vmem:[%s7006_s10 + $0x78] sm:$0xe]  ;;  %v8403_v57 = vrot.slane %v4120_v12, 5  ;;  %v5697_v12 = vld [vmem:[%s7006_s10 + $0xcc] sm:$0xf] }
 0x10c   : > { %6396 = vmatmul.mubr.bf16.gmra.mrb[12].mxu0 %v5723_v24  ;;  %v8380_v24 = vrot.slane %v4128_v22, 5  ;;  %v8384_v15 = vsel %vm7284_vm5, %v5763_v7, %v4609_v2  ;;  %v4611_v55 = vrot.slane %v4609_v2, 4  ;;  %v8401_v22 = vcombine.low %v4089_v38, %v4099_v18  ;;  %v5447_v47 = vld [vmem:[%s7006_s10 + $0x78] sm:$0xf]  ;;  %v8854_v18 = vld [vmem:[#allocation8_spill] sm:$0xff] }
 0x10d   : > { %6172 = vmatmul.mubr.bf16.gmra.mrb[28].mxu1 %v5339_v48  ;;  %6399 = vmatprep.mubr.bf16.mxu0 %v5724_v42  ;;  %v4138_v48 = vshrl.u32 %v8325_v51, 16  ;;  %v8398_v42 = vsel %vm7284_vm5, %v4604_v1, %v4605_v30  ;;  %v4117_v34 = vor.u32 %v8335_v5, %v8314_v49  ;;  %v8414_v59 = vrot.slane %v4134_v31, 5  ;;  %v8428_v31 = vld [vmem:[%s7006_s10 + $0xd0] sm:$0xf]  ;;  %v8857_v1 = vld [vmem:[#allocation9_spill] sm:$0xff] }
 0x10e   : > { %6191 = vmatprep.mubr.bf16.mxu1 %v6844_v13  ;;  %6428 = vmatpush3.bf16.msra.mxu0 %v6852_v6  ;;  %v5794_v17 = vcombine.low %v8369_v41, %v8398_v42  ;;  %v8409_v43 = vsel %vm7284_vm5, %v4611_v55, %v4612_v0  ;;  %v4144_v19 = vshll.u32 %v8376_v26, 16  ;;  %v5749_v6 = vld [vmem:[%s7006_s10 + $0x84] sm:$0xe]  ;;  %v4131_v60 = vor.u32 %v8380_v24, %v8378_v44  ;;  %v8858_v24 = vld [vmem:[#allocation12_spill] sm:$0xff]  ;;  %v6925_v63 = vld [vmem:[%s7006_s10 + $0x8c] sm:$0x1] }
 0x10f   : > { %6429 = vmatprep.subr.bf16.mxu0 %v6855_v56  ;;  %v5795_v38 = vcombine.low %v8384_v15, %v8409_v43  ;;  %v5764_v14 = vrot.slane %v5748_v23, 9  ;;  %v4616_v32 = vrot.slane %v8854_v18, 5  ;;  %v4619_v33 = vrot.slane %v8855_v28, 5 }
 0x110   : > { %v4140_v5 = vrot.slane %v4138_v48, 4  ;;  %v2366_v3 = vshrl.u32 %v5447_v47, 16  ;;  %v2369_v13 = vshll.u32 %v5447_v47, 16  ;;  %v2388_v16 = vsel %vm7038_vm2, %v8213_v50, %v8856_v53 }
 0x111   : > { %v4149_v46 = vshrl.u32 %v5697_v12, 16  ;;  %v8436_v29 = vsel %vm7284_vm5, %v5764_v14, %v4616_v32  ;;  %v4618_v30 = vrot.slane %v4616_v32, 4  ;;  %v5765_v7 = vrot.slane %v5749_v6, 9  ;;  %v6905_v6 = vld [vmem:[%s8795_s1 + $0x108] sm:$0xff]  }
 0x112   : > { %6430 = vmatpush3.bf16.msra.mxu0 %v6855_v56  ;;  %v4152_v52 = vshll.u32 %v5697_v12, 16  ;;  %v2368_v2 = vrot.slane %v2366_v3, 4  ;;  %v2371_v56 = vrot.slane %v2369_v13, 5  ;;  %v4623_v4 = vrot.slane %v8857_v1, 5  ;;  %v5750_v12 = vld [vmem:[%s7006_s10 + $0x90] sm:$0xe] }
 0x113   : > { %v4158_v50 = vshll.u32 %v8428_v31, 16  ;;  %v4162_v0 = vshrl.u32 %v8428_v31, 16  ;;  %v8445_v44 = vsel %vm7284_vm5, %v4618_v30, %v4619_v33  ;;  %v4626_v55 = vrot.slane %v8858_v24, 5  ;;  %v6848_v3 = vld [vmem:[%s7006_s10 + $0x30] sm:$0xff]  }
 0x114   : > { %6400 = vmatmul.mubr.bf16.gmra.mrb[16].mxu0 %v8283_v58  ;;  %v8859_v58 = vld [vmem:[#allocation15_spill] sm:$0xff]  ;;  %v4141_v48 = vor.u32 %v4140_v5, %v8414_v59  ;;  %v2372_v23 = vor.u32 %v2371_v56, %v2368_v2  ;;  %v4625_v47 = vrot.slane %v4623_v4, 4  ;;  %v4118_v14 = vrot.slane %v4117_v34, 4  ;;  %v8466_v13 = vld [vmem:[%s7006_s10 + $0xd4] sm:$0x1]  ;;  %v8860_v2 = vld [vmem:[#allocation10_spill] sm:$0xff] }
 0x115   : > { %6192 = vmatmul.mubr.bf16.vlgmr.msra.gmra.mrb[0].mxu1 %v6845_v40  ;;  %6403 = vmatprep.mubr.bf16.mxu0 %v8285_v35  ;;  %v5796_v35 = vcombine.low %v8436_v29, %v8445_v44  ;;  %v4108_v40 = vrot.slane %v4107_v62, 4  ;;  %v4146_v18 = vrot.slane %v4144_v19, 5  ;;  %v8458_v32 = vsel %vm7284_vm5, %v5765_v7, %v4623_v4  ;;  %v6850_v19 = vld [vmem:[%s7006_s10 + $0x3c] sm:$0xff]   ;;  %v6906_v1 = vld [vmem:[%s8795_s1 + $0x110] sm:$0xff]  }
 0x116   : > { %6471 = vmatpush3.bf16.msra.mxu1 %v8859_v58  ;;  %6195 = vmatprep.mubr.bf16.mxu1 %v6847_v39  ;;  %v4151_v28 = vrot.slane %v4149_v46, 4  ;;  %v4154_v33 = vrot.slane %v4152_v52, 5  ;;  %v2373_v39 = vrot.slane %v2372_v23, 4  ;;  %v8462_v5 = vsel %vm7284_vm5, %v4625_v47, %v4626_v55  ;;  %v6907_v47 = vld [vmem:[%s7006_s10 + $0x1c] sm:$0xf] }
 0x117   : > { %6464 = vmatprep.subr.bf16.mxu1 %v6905_v6  ;;  %v8468_v53 = vrot.slane %v4158_v50, 5  ;;  %v4164_v30 = vrot.slane %v4162_v0, 4  ;;  %v5797_v62 = vcombine.low %v8458_v32, %v8462_v5  ;;  %v5766_v34 = vrot.slane %v5750_v12, 9 }
 0x118   : > { %v4132_v7 = vrot.slane %v4131_v60, 4  ;;  %v4142_v46 = vrot.slane %v4141_v48, 4  ;;  %v2378_v52 = vsel %vm7038_vm2, %v2373_v39, %v7614_v11  ;;  %v4630_v56 = vrot.slane %v8860_v2, 5  ;;  %v8861_v11 = vld [vmem:[#allocation14_spill] sm:$0xff]  ;;  %v6851_v39 = vld [vmem:[%s7006_s10 + $0x48] sm:$0xff]  }
 0x119   : > { %v4113_v4 = vsel %vm7038_vm2, %v4108_v40, %v8314_v49  ;;  %v4123_v60 = vsel %vm7038_vm2, %v4118_v14, %v8403_v57  ;;  %v8486_v50 = vcombine.low %v2378_v52, %v2388_v16  ;;  %v4633_v0 = vrot.slane %v8861_v11, 5  ;;  %v5740_v57 = vld [vmem:[%s7006_s10 + $0x18] sm:$0xe]  ;;  %v5751_v16 = vld [vmem:[%s7006_s10 + $0x9c] sm:$0xe] }
 0x11a   : > { %6472 = vmatpush3.bf16.msra.mxu1 %v6905_v6  ;;  %v4155_v24 = vor.u32 %v4154_v33, %v4151_v28  ;;  %v4168_v55 = vshll.u32 %v8466_v13, 16  ;;  %v8493_v58 = vsel %vm7284_vm5, %v5766_v34, %v4630_v56  ;;  %v4632_v48 = vrot.slane %v4630_v56, 4  ;;  %v6908_v40 = vld [vmem:[%s8795_s1 + $0x118] sm:$0xff]   ;;  %v6909_v2 = vld [vmem:[%s7006_s10 + $0x20] sm:$0x1] }
 0x11b   : > { %6465 = vmatprep.subr.bf16.mxu1 %v6906_v1  ;;  %v4165_v49 = vor.u32 %v4164_v30, %v8468_v53  ;;  %v4147_v23 = vsel %vm7038_vm2, %v4142_v46, %v4146_v18  ;;  %v4560_v12 = vrot.slane %v6907_v47, 5  ;;  %v5729_v6 = vcombine.low %v4113_v4, %v4123_v60  ;;  %v8862_v34 = vld [vmem:[#allocation13_spill] sm:$0xff]  ;;  %v5752_v11 = vld [vmem:[%s7006_s10 + $0xa8] sm:$0xe] }
 0x11c   : > { %6404 = vmatmul.mubr.bf16.gmra.mrb[20].mxu0 %v8391_v36  ;;  %v4137_v36 = vsel %vm7038_vm2, %v4132_v7, %v8414_v59  ;;  %v4156_v14 = vrot.slane %v4155_v24, 4  ;;  %v4170_v28 = vrot.slane %v4168_v55, 5  ;;  %v5756_v18 = vrot.slane %v5740_v57, 9  ;;  %v6853_v46 = vld [vmem:[%s7006_s10 + $0x54] sm:$0xff]   ;;  %v5741_v55 = vld [vmem:[%s7006_s10 + $0x24] sm:$0xe] }
 0x11d   : > { %6196 = vmatmul.mubr.bf16.gmra.mrb[4].mxu1 %v6848_v3  ;;  %6407 = vmatprep.mubr.bf16.mxu0 %v8401_v22  ;;  %v8507_v22 = vsel %vm7284_vm5, %v4632_v48, %v4633_v0  ;;  %v5767_v33 = vrot.slane %v5751_v16, 9  ;;  %v5730_v3 = vcombine.low %v4137_v36, %v4147_v23  ;;  %v4166_v30 = vrot.slane %v4165_v49, 4  ;;  %v6911_v48 = vld [vmem:[%s7006_s10 + $0x28] sm:$0xf]  ;;  %v6912_v36 = vld [vmem:[%s7006_s10 + $0x34] sm:$0xf] }
 0x11e   : > { %6199 = vmatprep.mubr.bf16.mxu1 %v6850_v19  ;;  %6473 = vmatpush3.bf16.msra.mxu1 %v6906_v1  ;;  %v5798_v59 = vcombine.low %v8493_v58, %v8507_v22  ;;  %v4637_v19 = vrot.slane %v8862_v34, 5  ;;  %v4640_v7 = vrot.slane %v8196_v25, 5  ;;  %v4562_v52 = vrot.slane %v4560_v12, 4  ;;  %v6910_v1 = vld [vmem:[%s8795_s1 + $0x120] sm:$0xff]  }
 0x11f   : > { %6466 = vmatprep.subr.bf16.mxu1 %v6908_v40  ;;  %v4563_v56 = vrot.slane %v6909_v2, 5  ;;  %v4561_v25 = vsel %vm7284_vm5, %v5756_v18, %v4560_v12  ;;  %v4161_v0 = vsel %vm7038_vm2, %v4156_v14, %v8468_v53  ;;  %v4171_v24 = vsel %vm7038_vm2, %v4166_v30, %v4170_v28  ;;  %v5742_v12 = vld [vmem:[%s7006_s10 + $0x30] sm:$0xe]  ;;  %v6854_v30 = vld [vmem:[%s7006_s10 + $0x60] sm:$0xff]  }
 0x120   : > { %v8524_v4 = vsel %vm7284_vm5, %v5767_v33, %v4637_v19  ;;  %v4639_v60 = vrot.slane %v4637_v19, 4  ;;  %v4567_v49 = vrot.slane %v6911_v48, 5  ;;  %v4574_v23 = vrot.slane %v6912_v36, 5  ;;  %v6914_v33 = vld [vmem:[%s7006_s10 + $0x2c] sm:$0x1] }
 0x121   : > { %v4564_v16 = vsel %vm7284_vm5, %v4562_v52, %v4563_v56  ;;  %v5768_v47 = vrot.slane %v5752_v11, 9  ;;  %v5731_v28 = vcombine.low %v4161_v0, %v4171_v24  ;;  %v5757_v18 = vrot.slane %v5741_v55, 9  ;;  %v6856_v52 = vld [vmem:[%s7006_s10 + $0x6c] sm:$0xff]   ;;  %v5753_v11 = vld [vmem:[%s7006_s10 + $0xb4] sm:$0xe] }
 0x122   : > { %6474 = vmatpush3.bf16.msra.mxu1 %v6908_v40  ;;  %v8538_v57 = vsel %vm7284_vm5, %v4639_v60, %v4640_v7  ;;  %v8863_v40 = vld [vmem:[#allocation16_spill] sm:$0xff]  ;;  %v5788_v34 = vcombine.low %v4561_v25, %v4564_v16  ;;  %v4569_v19 = vrot.slane %v4567_v49, 4  ;;  %v5758_v2 = vrot.slane %v5742_v12, 9  ;;  %v5743_v0 = vld [vmem:[%s7006_s10 + $0x3c] sm:$0xe] }
 0x123   : > { %6467 = vmatprep.subr.bf16.mxu1 %v6910_v1  ;;  %v5799_v53 = vcombine.low %v8524_v4, %v8538_v57  ;;  %v4644_v14 = vrot.slane %v8863_v40, 5  ;;  %v4576_v56 = vrot.slane %v4574_v23, 4  ;;  %v6916_v24 = vld [vmem:[%s7006_s10 + $0x40] sm:$0xf]  ;;  %v4568_v48 = vsel %vm7284_vm5, %v5757_v18, %v4567_v49  ;;  %v6918_v18 = vld [vmem:[%s7006_s10 + $0x44] sm:$0x1] }
 0x124   : > { %6408 = vmatmul.mubr.bf16.gmra.mrb[24].mxu0 %v5729_v6  ;;  %v6913_v6 = vld [vmem:[%s8795_s1 + $0x128] sm:$0xff]   ;;  %v4581_v55 = vrot.slane %v6916_v24, 5  ;;  %v4651_v12 = vrot.slane %v8243_v10, 5  ;;  %v4575_v49 = vsel %vm7284_vm5, %v5758_v2, %v4574_v23  ;;  %v6919_v10 = vld [vmem:[%s8795_s1 + $0x138] sm:$0xff]   ;;  %v5754_v23 = vld [vmem:[%s7006_s10 + $0xc0] sm:$0xe] }
 0x125   : > { %6200 = vmatmul.mubr.bf16.gmra.mrb[8].mxu1 %v6851_v39  ;;  %6411 = vmatprep.mubr.bf16.mxu0 %v5730_v3  ;;  %v4570_v39 = vrot.slane %v6914_v33, 5  ;;  %v4647_v3 = vrot.slane %v8231_v21, 5  ;;  %v8555_v7 = vsel %vm7284_vm5, %v5768_v47, %v4644_v14  ;;  %v6917_v21 = vld [vmem:[%s8795_s1 + $0x130] sm:$0xff]   ;;  %v5769_v47 = vrot.slane %v5753_v11, 9 }
 0x126   : > { %6203 = vmatprep.mubr.bf16.mxu1 %v6853_v46  ;;  %6475 = vmatpush3.bf16.msra.mxu1 %v6910_v1  ;;  %v4646_v46 = vrot.slane %v4644_v14, 4  ;;  %v6915_v1 = vld [vmem:[%s7006_s10 + $0x38] sm:$0x1]  ;;  %v5759_v14 = vrot.slane %v5743_v0, 9  ;;  %v4584_v33 = vrot.slane %v6918_v18, 5  ;;  %v4658_v11 = vrot.slane %v8325_v51, 5 }
 0x127   : > { %6468 = vmatprep.subr.bf16.mxu1 %v6913_v6  ;;  %v4577_v60 = vrot.slane %v6915_v1, 5  ;;  %v4571_v36 = vsel %vm7284_vm5, %v4569_v19, %v4570_v39  ;;  %v4653_v39 = vrot.slane %v4651_v12, 4  ;;  %v5444_v19 = vld [vmem:[%s7006_s10 + $0x6c] sm:$0xf]  ;;  %v6859_v18 = vld [vmem:[%s7006_s10 + $0x90] sm:$0xff]   ;;  %v2409_v20 = vshll.u32 %v6925_v63, 16 }
 0x128   : > { %v8567_v25 = vsel %vm7284_vm5, %v4646_v46, %v4647_v3  ;;  %v5789_v3 = vcombine.low %v4568_v48, %v4571_v36  ;;  %v4582_v1 = vsel %vm7284_vm5, %v5759_v14, %v4581_v55  ;;  %v2342_v0 = vshrl.u32 %v5444_v19, 16  ;;  %v5755_v51 = vld [vmem:[%s7006_s10 + $0xcc] sm:$0xe] }
 0x129   : > { %v5800_v16 = vcombine.low %v8555_v7, %v8567_v25  ;;  %v4578_v40 = vsel %vm7284_vm5, %v4576_v56, %v4577_v60  ;;  %v5770_v56 = vrot.slane %v5754_v23, 9  ;;  %v2345_v24 = vshll.u32 %v5444_v19, 16 }
 0x12a   : > { %6476 = vmatpush3.bf16.msra.mxu1 %v6913_v6  ;;  %v4654_v6 = vrot.slane %v8264_v27, 5  ;;  %v8587_v27 = vsel %vm7284_vm5, %v5769_v47, %v4651_v12  ;;  %v4661_v36 = vrot.slane %v8376_v26, 5  ;;  %v4660_v12 = vrot.slane %v4658_v11, 4 }
 0x12b   : > { %6469 = vmatprep.subr.bf16.mxu1 %v6917_v21  ;;  %v2347_v26 = vrot.slane %v2345_v24, 5  ;;  %v4668_v23 = vrot.slane %v8466_v13, 5 }
 0x12c   : > { %6412 = vmatmul.mubr.bf16.gmra.mrb[28].mxu0 %v5731_v28  ;;  %v4583_v28 = vrot.slane %v4581_v55, 4  ;;  %v8594_v46 = vsel %vm7284_vm5, %v4653_v39, %v4654_v6  ;;  %v8608_v55 = vsel %vm7284_vm5, %v5770_v56, %v4658_v11  ;;  %v4665_v39 = vrot.slane %v8428_v31, 5  ;;  %v6921_v56 = vld [vmem:[%s7006_s10 + $0x74] sm:$0x1] }
 0x12d   : > { %6204 = vmatmul.mubr.bf16.gmra.mrb[12].mxu1 %v6854_v30  ;;  %6431 = vmatprep.mubr.bf16.mxu0 %v5788_v34  ;;  %v6857_v30 = vld [vmem:[%s7006_s10 + $0x78] sm:$0xff]   ;;  %v5790_v34 = vcombine.low %v4575_v49, %v4578_v40  ;;  %v5801_v2 = vcombine.low %v8587_v27, %v8594_v46  ;;  %v8613_v49 = vsel %vm7284_vm5, %v4660_v12, %v4661_v36  ;;  %v2344_v40 = vrot.slane %v2342_v0, 4  ;;  %v6922_v0 = vld [vmem:[%s7006_s10 + $0x88] sm:$0xf] }
 0x12e   : > { %6207 = vmatprep.mubr.bf16.mxu1 %v6856_v52  ;;  %6477 = vmatpush3.bf16.msra.mxu1 %v6917_v21  ;;  %v6858_v52 = vld [vmem:[%s7006_s10 + $0x84] sm:$0xff]   ;;  %v4585_v60 = vsel %vm7284_vm5, %v4583_v28, %v4584_v33  ;;  %v6920_v21 = vld [vmem:[%s7006_s10 + $0x70] sm:$0xf]  ;;  %v5802_v28 = vcombine.low %v8608_v55, %v8613_v49  ;;  %v4667_v19 = vrot.slane %v4665_v39, 4  ;;  %v2399_v24 = vshll.u32 %v6922_v0, 16 }
 0x12f   : > { %6470 = vmatprep.subr.bf16.mxu1 %v6919_v10  ;;  %v2351_v48 = vshll.u32 %v6920_v21, 16  ;;  %v2355_v47 = vshrl.u32 %v6920_v21, 16  ;;  %v5791_v6 = vcombine.low %v4582_v1, %v4585_v60  ;;  %v2361_v1 = vshll.u32 %v6921_v56, 16 }
 0x130   : > { %v8635_v11 = vsel %vm7284_vm5, %v4667_v19, %v4668_v23  ;;  %v2403_v21 = vshrl.u32 %v6922_v0, 16  ;;  %v6924_v19 = vld [vmem:[%s7006_s10 + $0xa0] sm:$0xf] }
 0x131   : > { %v8615_v14 = vrot.slane %v2351_v48, 5  ;;  %v2357_v33 = vrot.slane %v2355_v47, 4  ;;  %v2451_v56 = vshrl.u32 %v6924_v19, 16 }
 0x132   : > { %6478 = vmatpush3.bf16.msra.mxu1 %v6919_v10  ;;  %v5771_v10 = vrot.slane %v5755_v51, 9 }
 0x133   : > { %v2358_v31 = vor.u32 %v2357_v33, %v8615_v14  ;;  %v2417_v33 = vshll.u32 %v5453_v61, 16 }
 0x134   : > { %6432 = vmatmul.mubr.bf16.vlgmr.msra.gmra.mrb[0].mxu0 %v5789_v3  ;;  %v6860_v3 = vld [vmem:[%s7006_s10 + $0x9c] sm:$0xff]  }
 0x135   : > { %6208 = vmatmul.mubr.bf16.gmra.mrb[16].mxu1 %v6857_v30  ;;  %6435 = vmatprep.mubr.bf16.mxu0 %v5790_v34  ;;  %v5450_v30 = vld [vmem:[%s7006_s10 + $0x84] sm:$0xf]  ;;  %v8626_v34 = vsel %vm7284_vm5, %v5771_v10, %v4665_v39  ;;  %v2359_v47 = vrot.slane %v2358_v31, 4  ;;  %v6923_v10 = vld [vmem:[%s7006_s10 + $0x94] sm:$0xf]  ;;  %v2419_v0 = vrot.slane %v2417_v33, 5 }
 0x136   : > { %6211 = vmatprep.mubr.bf16.mxu1 %v6858_v52  ;;  %v2348_v52 = vor.u32 %v2347_v26, %v2344_v40  ;;  %v2390_v13 = vshrl.u32 %v5450_v30, 16  ;;  %v2393_v60 = vshll.u32 %v5450_v30, 16  ;;  %v5803_v48 = vcombine.low %v8626_v34, %v8635_v11 }
 0x137   : > { %v8644_v40 = vrot.slane %v2399_v24, 5  ;;  %v2405_v26 = vrot.slane %v2403_v21, 4  ;;  %v2423_v39 = vshll.u32 %v6923_v10, 16  ;;  %v2427_v23 = vshrl.u32 %v6923_v10, 16  ;;  %v6927_v10 = vld [vmem:[%s7006_s10 + $0xa4] sm:$0x1] }
 0x138   : > { %v2349_v36 = vrot.slane %v2348_v52, 4  ;;  %v2392_v12 = vrot.slane %v2390_v13, 4  ;;  %v2395_v51 = vrot.slane %v2393_v60, 5  ;;  %v2447_v52 = vshll.u32 %v6924_v19, 16  ;;  %v6928_v19 = vld [vmem:[%s7006_s10 + $0xac] sm:$0xf] }
 0x139   : > { %v2406_v13 = vor.u32 %v2405_v26, %v8644_v40  ;;  %v8661_v41 = vrot.slane %v2423_v39, 5  ;;  %v2429_v42 = vrot.slane %v2427_v23, 4  ;;  %v2453_v21 = vrot.slane %v2451_v56, 4  ;;  %v5462_v23 = vld [vmem:[%s7006_s10 + $0xb4] sm:$0xf] }
 0x13a   : > { %v2457_v39 = vshll.u32 %v6927_v10, 16  ;;  %v2475_v15 = vshrl.u32 %v6928_v19, 16  ;;  %v2489_v63 = vshll.u32 %v5462_v23, 16 }
 0x13b   : > { %v2430_v26 = vor.u32 %v2429_v42, %v8661_v41 }
 0x13c   : > { %6436 = vmatmul.mubr.bf16.gmra.mrb[4].mxu0 %v5791_v6  ;;  %v5456_v6 = vld [vmem:[%s7006_s10 + $0x9c] sm:$0xf] }
 0x13d   : > { %6212 = vmatmul.mubr.bf16.gmra.mrb[20].mxu1 %v6859_v18  ;;  %6439 = vmatprep.mubr.bf16.mxu0 %v5792_v8  ;;  %v2363_v8 = vrot.slane %v2361_v1, 5  ;;  %v2414_v18 = vshrl.u32 %v5453_v61, 16  ;;  %v2441_v30 = vshll.u32 %v5456_v6, 16  ;;  %v2354_v1 = vsel %vm7038_vm2, %v2349_v36, %v8615_v14  ;;  %v6863_v61 = vld [vmem:[%s7006_s10 + $0xc0] sm:$0xff]  }
 0x13e   : > { %6215 = vmatprep.mubr.bf16.mxu1 %v6860_v3  ;;  %v2438_v3 = vshrl.u32 %v5456_v6, 16  ;;  %v8663_v14 = vrot.slane %v2447_v52, 5  ;;  %v2471_v52 = vshll.u32 %v6928_v19, 16 }
 0x13f   : > { %v2364_v31 = vsel %vm7038_vm2, %v2359_v47, %v2363_v8  ;;  %v2416_v60 = vrot.slane %v2414_v18, 4  ;;  %v2443_v24 = vrot.slane %v2441_v30, 5  ;;  %v2411_v8 = vrot.slane %v2409_v20, 5  ;;  %v6929_v20 = vld [vmem:[%s7006_s10 + $0xb8] sm:$0xf] }
 0x140   : > { %v2407_v47 = vrot.slane %v2406_v13, 4  ;;  %v2454_v33 = vor.u32 %v2453_v21, %v8663_v14  ;;  %v2495_v29 = vshll.u32 %v6929_v20, 16  ;;  %v2499_v44 = vshrl.u32 %v6929_v20, 16 }
 0x142   : > { %v2455_v13 = vrot.slane %v2454_v33, 4 }
 0x144   : > { %6440 = vmatmul.mubr.bf16.gmra.mrb[8].mxu0 %v5793_v54  ;;  %v2396_v54 = vor.u32 %v2395_v51, %v2392_v12  ;;  %v2420_v12 = vor.u32 %v2419_v0, %v2416_v60  ;;  %v6926_v51 = vld [vmem:[%s7006_s10 + $0x98] sm:$0x1]  ;;  %v2459_v60 = vrot.slane %v2457_v39, 5 }
 0x145   : > { %6216 = vmatmul.mubr.bf16.gmra.mrb[24].mxu1 %v6861_v45  ;;  %6443 = vmatprep.mubr.bf16.mxu0 %v5794_v17  ;;  %v2440_v17 = vrot.slane %v2438_v3, 4  ;;  %v5492_v45 = vcombine.low %v2354_v1, %v2364_v31  ;;  %v2433_v6 = vshll.u32 %v6926_v51, 16  ;;  %v2486_v31 = vshrl.u32 %v5462_v23, 16 }
 0x146   : > { %6219 = vmatprep.mubr.bf16.mxu1 %v6862_v9  ;;  %v2397_v36 = vrot.slane %v2396_v54, 4  ;;  %v5459_v9 = vld [vmem:[%s7006_s10 + $0xa8] sm:$0xf]  ;;  %v2421_v56 = vrot.slane %v2420_v12, 4  ;;  %v2460_v32 = vsel %vm7038_vm2, %v2455_v13, %v2459_v60 }
 0x147   : > { %v2444_v18 = vor.u32 %v2443_v24, %v2440_v17  ;;  %v2462_v3 = vshrl.u32 %v5459_v9, 16  ;;  %v2465_v30 = vshll.u32 %v5459_v9, 16  ;;  %v2435_v1 = vrot.slane %v2433_v6, 5 }
 0x148   : > { %v2402_v43 = vsel %vm7038_vm2, %v2397_v36, %v8644_v40  ;;  %v2473_v17 = vrot.slane %v2471_v52, 5  ;;  %v2477_v24 = vrot.slane %v2475_v15, 4  ;;  %v2488_v21 = vrot.slane %v2486_v31, 4  ;;  %v5465_v36 = vld [vmem:[%s7006_s10 + $0xc0] sm:$0xf] }
 0x149   : > { %v2445_v54 = vrot.slane %v2444_v18, 4  ;;  %v2464_v0 = vrot.slane %v2462_v3, 4  ;;  %v2467_v42 = vrot.slane %v2465_v30, 5  ;;  %v2510_v9 = vshrl.u32 %v5465_v36, 16  ;;  %v6931_v18 = vld [vmem:[%s7006_s10 + $0xc4] sm:$0xf] }
 0x14a   : > { %v2519_v33 = vshll.u32 %v6931_v18, 16 }
 0x14b   : > { %v2450_v51 = vsel %vm7038_vm2, %v2445_v54, %v8663_v14  ;;  %v2468_v5 = vor.u32 %v2467_v42, %v2464_v0  ;;  %v2523_v14 = vshrl.u32 %v6931_v18, 16  ;;  %v2512_v19 = vrot.slane %v2510_v9, 4 }
 0x14c   : > { %6444 = vmatmul.mubr.bf16.gmra.mrb[12].mxu0 %v5795_v38  ;;  %v2412_v38 = vsel %vm7038_vm2, %v2407_v47, %v2411_v8  ;;  %v2501_v8 = vrot.slane %v2499_v44, 4  ;;  %v2426_v47 = vsel %vm7038_vm2, %v2421_v56, %v8661_v41  ;;  %v6930_v41 = vld [vmem:[%s7006_s10 + $0xb0] sm:$0x1]  ;;  %v5496_v58 = vcombine.low %v2450_v51, %v2460_v32  ;;  %v6933_v44 = vld [vmem:[%s7006_s10 + $0xc8] sm:$0x1] }
 0x14d   : > { %6220 = vmatmul.mubr.bf16.gmra.mrb[28].mxu1 %v6863_v61  ;;  %6447 = vmatprep.mubr.bf16.mxu0 %v5796_v35  ;;  %v2431_v35 = vrot.slane %v2430_v26, 4  ;;  %v5494_v40 = vcombine.low %v2402_v43, %v2412_v38  ;;  %v2491_v61 = vrot.slane %v2489_v63, 5  ;;  %v2481_v6 = vshll.u32 %v6930_v41, 16 }
 0x14e   : > { %6255 = vmatprep.mubr.bf16.mxu1 %v5492_v45  ;;  %v2497_v45 = vrot.slane %v2495_v29, 5  ;;  %v2513_v26 = vshll.u32 %v5465_v36, 16  ;;  %v2469_v22 = vrot.slane %v2468_v5, 4  ;;  %v2521_v15 = vrot.slane %v2519_v33, 5 }
 0x14f   : > { %v2436_v12 = vsel %vm7038_vm2, %v2431_v35, %v2435_v1  ;;  %v2492_v10 = vor.u32 %v2491_v61, %v2488_v21  ;;  %v2483_v30 = vrot.slane %v2481_v6, 5  ;;  %v2525_v43 = vrot.slane %v2523_v14, 4 }
 0x150   : > { %v2502_v39 = vor.u32 %v2501_v8, %v2497_v45  ;;  %v5495_v3 = vcombine.low %v2426_v47, %v2436_v12  ;;  %v2515_v52 = vrot.slane %v2513_v26, 5  ;;  %v2474_v31 = vsel %vm7038_vm2, %v2469_v22, %v2473_v17 }
 0x151   : > { %v2493_v38 = vrot.slane %v2492_v10, 4  ;;  %v2526_v29 = vor.u32 %v2525_v43, %v2521_v15  ;;  %v2529_v35 = vshll.u32 %v6933_v44, 16 }
 0x152   : > { %v2503_v56 = vrot.slane %v2502_v39, 4  ;;  %v2516_v20 = vor.u32 %v2515_v52, %v2512_v19 }
 0x153   : > { %v2498_v4 = vsel %vm7038_vm2, %v2493_v38, %v2497_v45  ;;  %v2531_v54 = vrot.slane %v2529_v35, 5 }
 0x154   : > { %6448 = vmatmul.mubr.bf16.gmra.mrb[16].mxu0 %v5797_v62  ;;  %v2478_v62 = vor.u32 %v2477_v24, %v2473_v17  ;;  %v2517_v25 = vrot.slane %v2516_v20, 4 }
 0x155   : > { %6256 = vmatmul.mubr.bf16.vlgmr.msra.gmra.mrb[16].mxu1 %v8486_v50  ;;  %6451 = vmatprep.mubr.bf16.mxu0 %v5798_v59  ;;  %v6932_v50 = vld [vmem:[%s7006_s10 + $0xbc] sm:$0x1]  ;;  %s5814_s10 = sshll.u32 %s8865_s13, 8 }
 0x156   : > { %6259 = vmatprep.mubr.bf16.mxu1 %v5494_v40  ;;  %v2505_v23 = vshll.u32 %v6932_v50, 16  ;;  %v2479_v59 = vrot.slane %v2478_v62, 4  ;;  %v2522_v13 = vsel %vm7038_vm2, %v2517_v25, %v2521_v15  ;;  %s8748_s8 = scalar_lea.vmem %s8796_s2, %s5814_s10 }
 0x158   : > { %v2507_v1 = vrot.slane %v2505_v23, 5  ;;  %v2484_v63 = vsel %vm7038_vm2, %v2479_v59, %v2483_v30 }
 0x15a   : > { %v2508_v57 = vsel %vm7038_vm2, %v2503_v56, %v2507_v1 }
 0x15b   : > { %v5498_v7 = vcombine.low %v2498_v4, %v2508_v57 }
 0x15c   : > { %6452 = vmatmul.mubr.bf16.gmra.mrb[20].mxu0 %v5799_v53  ;;  %v5497_v53 = vcombine.low %v2474_v31, %v2484_v63 }
 0x15d   : > { %6260 = vmatmul.mubr.bf16.gmra.mrb[20].mxu1 %v5495_v3  ;;  %6455 = vmatprep.mubr.bf16.mxu0 %v5800_v16  ;;  %v2527_v16 = vrot.slane %v2526_v29, 4 }
 0x15e   : > { %6263 = vmatprep.mubr.bf16.mxu1 %v5496_v58 }
 0x15f   : > { %v2532_v60 = vsel %vm7038_vm2, %v2527_v16, %v2531_v54 }
 0x160   : > { %v5499_v0 = vcombine.low %v2522_v13, %v2532_v60 }
 0x164   : > { %6456 = vmatmul.mubr.bf16.gmra.mrb[24].mxu0 %v5801_v2 }
 0x165   : > { %6264 = vmatmul.mubr.bf16.gmra.mrb[24].mxu1 %v5497_v53  ;;  %6459 = vmatprep.mubr.bf16.mxu0 %v5802_v28 }
 0x166   : > { %6267 = vmatprep.mubr.bf16.mxu1 %v5498_v7 }
 0x16c   : > { %6460 = vmatmul.mubr.bf16.gmra.mrb[28].mxu0 %v5803_v48 }
 0x16d   : > { %6268 = vmatmul.mubr.bf16.gmra.mrb[28].mxu1 %v5499_v0 }
 0x1e8   : > { %v6193_v27 = vpop.f32.mrb[0].mxu1 }
 0x1e9   : > { %v1942_v46 = vpop.f32.mrb[1].mxu1 }
 0x1ea   : > { %v6194_v2 = vpop.f32.mrb[2].mxu1 }
 0x1eb   : > { %v1945_v42 = vpop.f32.mrb[3].mxu1 }
 0x1f0   : > { %v6197_v55 = vpop.f32.mrb[4].mxu1 }
 0x1f1   : > { %v1958_v49 = vpop.f32.mrb[5].mxu1 }
 0x1f2   : > { %v6198_v28 = vpop.f32.mrb[6].mxu1 }
 0x1f3   : > { %v1961_v17 = vpop.f32.mrb[7].mxu1 }
 0x1f8   : > { %v6201_v24 = vpop.f32.mrb[8].mxu1 }
 0x1f9   : > { %v1974_v40 = vpop.f32.mrb[9].mxu1 }
 0x1fa   : > { %v6202_v21 = vpop.f32.mrb[10].mxu1 }
 0x1fb   : > { %v8734_v37 = vpop.f32.mrb[11].mxu1 }
 0x200   : > { %v8736_v61 = vpop.f32.mrb[12].mxu1 }
 0x201   : > { %v8738_v45 = vpop.f32.mrb[13].mxu1 }
 0x202   : > { %v8740_v34 = vpop.f32.mrb[14].mxu1 }
 0x203   : > { %v8742_v11 = vpop.f32.mrb[15].mxu1 }
 0x207   : > { %v6433_v48 = vpop.f32.mrb[0].mxu0 }
 0x208   : > { %v6479_v8 = vadd.f32 %v6433_v48, %v6193_v27  ;;  %v4833_v36 = vpop.f32.mrb[1].mxu0 }
 0x209   : > { %v6480_v47 = vadd.f32 %v4833_v36, %v1942_v46  ;;  %v6434_v12 = vpop.f32.mrb[2].mxu0 }
 0x20a   : > { %4994 = vst [vmem:[%s8748_s8 + $0x10] sm:$0xff] %v6479_v8  ;;  %v6481_v51 = vadd.f32 %v6434_v12, %v6194_v2  ;;  %v4836_v32 = vpop.f32.mrb[3].mxu0  ;;  %v5063_v9 = vmul.f32 %v6479_v8, %v6479_v8 }
 0x20b   : > { %4992 = vst [vmem:[%s8748_s8] sm:$0xff] %v6480_v47  ;;  %v6482_v5 = vadd.f32 %v4836_v32, %v1945_v42  ;;  %v5061_v62 = vmul.f32 %v6480_v47, %v6480_v47 }
 0x20c   : > { %4995 = vst [vmem:[%s8748_s8 + $0x18] sm:$0xff] %v6481_v51  ;;  %v5064_v39 = vmul.f32 %v6481_v51, %v6481_v51 }
 0x20d   : > { %4993 = vst [vmem:[%s8748_s8 + $0x8] sm:$0xff] %v6482_v5  ;;  %v5024_v41 = vadd.f32 %v6482_v5, %v6480_v47  ;;  %v5062_v6 = vmul.f32 %v6482_v5, %v6482_v5 }
 0x20f   : > { %v5025_v26 = vadd.f32 %v6479_v8, %v5024_v41  ;;  %v5093_v18 = vadd.f32 %v5062_v6, %v5061_v62  ;;  %v6437_v33 = vpop.f32.mrb[4].mxu0 }
 0x210   : > { %v6483_v14 = vadd.f32 %v6437_v33, %v6197_v55  ;;  %v4849_v10 = vpop.f32.mrb[5].mxu0 }
 0x211   : > { %v5094_v50 = vadd.f32 %v5093_v18, %v5063_v9  ;;  %v6484_v23 = vadd.f32 %v4849_v10, %v1958_v49  ;;  %v5026_v3 = vadd.f32 %v6481_v51, %v5025_v26  ;;  %v6438_v58 = vpop.f32.mrb[6].mxu0 }
 0x212   : > { %4998 = vst [vmem:[%s8748_s8 + $0x30] sm:$0xff] %v6483_v14  ;;  %v6485_v22 = vadd.f32 %v6438_v58, %v6198_v28  ;;  %v4852_v59 = vpop.f32.mrb[7].mxu0  ;;  %v5067_v1 = vmul.f32 %v6483_v14, %v6483_v14 }
 0x213   : > { %4996 = vst [vmem:[%s8748_s8 + $0x20] sm:$0xff] %v6484_v23  ;;  %v5027_v30 = vadd.f32 %v6484_v23, %v5026_v3  ;;  %v5065_v19 = vmul.f32 %v6484_v23, %v6484_v23  ;;  %v5095_v52 = vadd.f32 %v5094_v50, %v5064_v39  ;;  %v6486_v15 = vadd.f32 %v4852_v59, %v1961_v17 }
 0x214   : > { %4999 = vst [vmem:[%s8748_s8 + $0x38] sm:$0xff] %v6485_v22  ;;  %v5068_v35 = vmul.f32 %v6485_v22, %v6485_v22 }
 0x215   : > { %v5096_v43 = vadd.f32 %v5095_v52, %v5065_v19  ;;  %4997 = vst [vmem:[%s8748_s8 + $0x28] sm:$0xff] %v6486_v15  ;;  %v5028_v38 = vadd.f32 %v6486_v15, %v5027_v30  ;;  %v5066_v56 = vmul.f32 %v6486_v15, %v6486_v15 }
 0x217   : > { %v5029_v31 = vadd.f32 %v6483_v14, %v5028_v38  ;;  %v5097_v63 = vadd.f32 %v5096_v43, %v5066_v56  ;;  %v6441_v20 = vpop.f32.mrb[8].mxu0 }
 0x218   : > { %v6487_v29 = vadd.f32 %v6441_v20, %v6201_v24  ;;  %v4865_v44 = vpop.f32.mrb[9].mxu0 }
 0x219   : > { %v5098_v4 = vadd.f32 %v5097_v63, %v5067_v1  ;;  %v6488_v57 = vadd.f32 %v4865_v44, %v1974_v40  ;;  %v5030_v53 = vadd.f32 %v6485_v22, %v5029_v31  ;;  %v6442_v7 = vpop.f32.mrb[10].mxu0 }
 0x21a   : > { %5002 = vst [vmem:[%s8748_s8 + $0x50] sm:$0xff] %v6487_v29  ;;  %v6489_v25 = vadd.f32 %v6442_v7, %v6202_v21  ;;  %v4868_v16 = vpop.f32.mrb[11].mxu0  ;;  %v5071_v42 = vmul.f32 %v6487_v29, %v6487_v29 }
 0x21b   : > { %5000 = vst [vmem:[%s8748_s8 + $0x40] sm:$0xff] %v6488_v57  ;;  %v5031_v54 = vadd.f32 %v6488_v57, %v5030_v53  ;;  %v5069_v13 = vmul.f32 %v6488_v57, %v6488_v57  ;;  %v5099_v60 = vadd.f32 %v5098_v4, %v5068_v35  ;;  %v6490_v0 = vadd.f32 %v4868_v16, %v8734_v37 }
 0x21c   : > { %5003 = vst [vmem:[%s8748_s8 + $0x58] sm:$0xff] %v6489_v25  ;;  %v5072_v40 = vmul.f32 %v6489_v25, %v6489_v25 }
 0x21d   : > { %v5100_v27 = vadd.f32 %v5099_v60, %v5069_v13  ;;  %5001 = vst [vmem:[%s8748_s8 + $0x48] sm:$0xff] %v6490_v0  ;;  %v5032_v46 = vadd.f32 %v6490_v0, %v5031_v54  ;;  %v5070_v2 = vmul.f32 %v6490_v0, %v6490_v0 }
 0x21f   : > { %v5033_v55 = vadd.f32 %v6487_v29, %v5032_v46  ;;  %v5101_v49 = vadd.f32 %v5100_v27, %v5070_v2  ;;  %v6445_v28 = vpop.f32.mrb[12].mxu0 }
 0x220   : > { %v6491_v17 = vadd.f32 %v6445_v28, %v8736_v61  ;;  %v4881_v24 = vpop.f32.mrb[13].mxu0 }
 0x221   : > { %v5102_v21 = vadd.f32 %v5101_v49, %v5071_v42  ;;  %v6492_v37 = vadd.f32 %v4881_v24, %v8738_v45  ;;  %v5034_v48 = vadd.f32 %v6489_v25, %v5033_v55  ;;  %v6446_v8 = vpop.f32.mrb[14].mxu0 }
 0x222   : > { %5006 = vst [vmem:[%s8748_s8 + $0x70] sm:$0xff] %v6491_v17  ;;  %v6493_v36 = vadd.f32 %v6446_v8, %v8740_v34  ;;  %v4884_v47 = vpop.f32.mrb[15].mxu0  ;;  %v5075_v6 = vmul.f32 %v6491_v17, %v6491_v17 }
 0x223   : > { %5004 = vst [vmem:[%s8748_s8 + $0x60] sm:$0xff] %v6492_v37  ;;  %v5035_v12 = vadd.f32 %v6492_v37, %v5034_v48  ;;  %v5073_v51 = vmul.f32 %v6492_v37, %v6492_v37  ;;  %v5103_v32 = vadd.f32 %v5102_v21, %v5072_v40  ;;  %v6494_v5 = vadd.f32 %v4884_v47, %v8742_v11 }
 0x224   : > { %5007 = vst [vmem:[%s8748_s8 + $0x78] sm:$0xff] %v6493_v36  ;;  %v5076_v33 = vmul.f32 %v6493_v36, %v6493_v36 }
 0x225   : > { %v5104_v61 = vadd.f32 %v5103_v32, %v5073_v51  ;;  %5005 = vst [vmem:[%s8748_s8 + $0x68] sm:$0xff] %v6494_v5  ;;  %v5036_v62 = vadd.f32 %v6494_v5, %v5035_v12  ;;  %v5074_v41 = vmul.f32 %v6494_v5, %v6494_v5 }
 0x227   : > { %v5037_v45 = vadd.f32 %v6491_v17, %v5036_v62  ;;  %v5105_v9 = vadd.f32 %v5104_v61, %v5074_v41  ;;  %v6449_v26 = vpop.f32.mrb[16].mxu0 }
 0x228   : > { %v6257_v18 = vpop.f32.mrb[16].mxu1  ;;  %v4897_v34 = vpop.f32.mrb[17].mxu0 }
 0x229   : > { %v5106_v14 = vadd.f32 %v5105_v9, %v5075_v6  ;;  %v6495_v10 = vadd.f32 %v6449_v26, %v6257_v18  ;;  %v2760_v39 = vpop.f32.mrb[17].mxu1  ;;  %v5038_v11 = vadd.f32 %v6493_v36, %v5037_v45  ;;  %v6450_v50 = vpop.f32.mrb[18].mxu0 }
 0x22a   : > { %v6496_v23 = vadd.f32 %v4897_v34, %v2760_v39  ;;  %v6258_v3 = vpop.f32.mrb[18].mxu1  ;;  %v4900_v58 = vpop.f32.mrb[19].mxu0 }
 0x22b   : > { %5010 = vst [vmem:[%s8748_s8 + $0x90] sm:$0xff] %v6495_v10  ;;  %v5107_v22 = vadd.f32 %v5106_v14, %v5076_v33  ;;  %v6497_v59 = vadd.f32 %v6450_v50, %v6258_v3  ;;  %v2763_v30 = vpop.f32.mrb[19].mxu1  ;;  %v5079_v31 = vmul.f32 %v6495_v10, %v6495_v10 }
 0x22c   : > { %5008 = vst [vmem:[%s8748_s8 + $0x80] sm:$0xff] %v6496_v23  ;;  %v5039_v19 = vadd.f32 %v6496_v23, %v5038_v11  ;;  %v5077_v52 = vmul.f32 %v6496_v23, %v6496_v23  ;;  %v6498_v15 = vadd.f32 %v4900_v58, %v2763_v30 }
 0x22d   : > { %5011 = vst [vmem:[%s8748_s8 + $0x98] sm:$0xff] %v6497_v59  ;;  %v5080_v53 = vmul.f32 %v6497_v59, %v6497_v59 }
 0x22e   : > { %v5108_v43 = vadd.f32 %v5107_v22, %v5077_v52  ;;  %5009 = vst [vmem:[%s8748_s8 + $0x88] sm:$0xff] %v6498_v15  ;;  %v5040_v38 = vadd.f32 %v6498_v15, %v5039_v19  ;;  %v5078_v56 = vmul.f32 %v6498_v15, %v6498_v15 }
 0x22f   : > { %v6453_v1 = vpop.f32.mrb[20].mxu0 }
 0x230   : > { %v5041_v63 = vadd.f32 %v6495_v10, %v5040_v38  ;;  %v5109_v20 = vadd.f32 %v5108_v43, %v5078_v56  ;;  %v6261_v29 = vpop.f32.mrb[20].mxu1  ;;  %v4913_v44 = vpop.f32.mrb[21].mxu0 }
 0x231   : > { %v6499_v35 = vadd.f32 %v6453_v1, %v6261_v29  ;;  %v2776_v4 = vpop.f32.mrb[21].mxu1  ;;  %v6454_v57 = vpop.f32.mrb[22].mxu0 }
 0x232   : > { %v5110_v7 = vadd.f32 %v5109_v20, %v5079_v31  ;;  %v6500_v25 = vadd.f32 %v4913_v44, %v2776_v4  ;;  %v5042_v16 = vadd.f32 %v6497_v59, %v5041_v63  ;;  %v6262_v54 = vpop.f32.mrb[22].mxu1  ;;  %v4916_v13 = vpop.f32.mrb[23].mxu0 }
 0x233   : > { %5014 = vst [vmem:[%s8748_s8 + $0xb0] sm:$0xff] %v6499_v35  ;;  %v6501_v60 = vadd.f32 %v6454_v57, %v6262_v54  ;;  %v2779_v0 = vpop.f32.mrb[23].mxu1  ;;  %v5083_v24 = vmul.f32 %v6499_v35, %v6499_v35 }
 0x234   : > { %5012 = vst [vmem:[%s8748_s8 + $0xa0] sm:$0xff] %v6500_v25  ;;  %v5043_v27 = vadd.f32 %v6500_v25, %v5042_v16  ;;  %v5081_v46 = vmul.f32 %v6500_v25, %v6500_v25  ;;  %v5111_v2 = vadd.f32 %v5110_v7, %v5080_v53  ;;  %v6502_v42 = vadd.f32 %v4916_v13, %v2779_v0 }
 0x235   : > { %5015 = vst [vmem:[%s8748_s8 + $0xb8] sm:$0xff] %v6501_v60  ;;  %v5084_v12 = vmul.f32 %v6501_v60, %v6501_v60 }
 0x236   : > { %v5112_v55 = vadd.f32 %v5111_v2, %v5081_v46  ;;  %5013 = vst [vmem:[%s8748_s8 + $0xa8] sm:$0xff] %v6502_v42  ;;  %v5044_v49 = vadd.f32 %v6502_v42, %v5043_v27  ;;  %v5082_v28 = vmul.f32 %v6502_v42, %v6502_v42 }
 0x237   : > { %v6457_v17 = vpop.f32.mrb[24].mxu0 }
 0x238   : > { %v5045_v40 = vadd.f32 %v6499_v35, %v5044_v49  ;;  %v5113_v21 = vadd.f32 %v5112_v55, %v5082_v28  ;;  %v6265_v37 = vpop.f32.mrb[24].mxu1  ;;  %v4929_v48 = vpop.f32.mrb[25].mxu0 }
 0x239   : > { %v6503_v8 = vadd.f32 %v6457_v17, %v6265_v37  ;;  %v2792_v36 = vpop.f32.mrb[25].mxu1  ;;  %v6458_v47 = vpop.f32.mrb[26].mxu0 }
 0x23a   : > { %v5114_v51 = vadd.f32 %v5113_v21, %v5083_v24  ;;  %v6504_v32 = vadd.f32 %v4929_v48, %v2792_v36  ;;  %v5046_v5 = vadd.f32 %v6501_v60, %v5045_v40  ;;  %v6266_v61 = vpop.f32.mrb[26].mxu1  ;;  %v4932_v62 = vpop.f32.mrb[27].mxu0 }
 0x23b   : > { %5018 = vst [vmem:[%s8748_s8 + $0xd0] sm:$0xff] %v6503_v8  ;;  %v6505_v41 = vadd.f32 %v6458_v47, %v6266_v61  ;;  %v2795_v6 = vpop.f32.mrb[27].mxu1  ;;  %v5087_v39 = vmul.f32 %v6503_v8, %v6503_v8 }
 0x23c   : > { %5016 = vst [vmem:[%s8748_s8 + $0xc0] sm:$0xff] %v6504_v32  ;;  %v5047_v45 = vadd.f32 %v6504_v32, %v5046_v5  ;;  %v5085_v9 = vmul.f32 %v6504_v32, %v6504_v32  ;;  %v5115_v26 = vadd.f32 %v5114_v51, %v5084_v12  ;;  %v6506_v18 = vadd.f32 %v4932_v62, %v2795_v6 }
 0x23d   : > { %5019 = vst [vmem:[%s8748_s8 + $0xd8] sm:$0xff] %v6505_v41  ;;  %v5088_v30 = vmul.f32 %v6505_v41, %v6505_v41 }
 0x23e   : > { %v5116_v34 = vadd.f32 %v5115_v26, %v5085_v9  ;;  %5017 = vst [vmem:[%s8748_s8 + $0xc8] sm:$0xff] %v6506_v18  ;;  %v5048_v33 = vadd.f32 %v6506_v18, %v5047_v45  ;;  %v5086_v14 = vmul.f32 %v6506_v18, %v6506_v18 }
 0x23f   : > { %v6461_v10 = vpop.f32.mrb[28].mxu0 }
 0x240   : > { %v5049_v11 = vadd.f32 %v6503_v8, %v5048_v33  ;;  %v5117_v50 = vadd.f32 %v5116_v34, %v5086_v14  ;;  %v6269_v23 = vpop.f32.mrb[28].mxu1  ;;  %v4945_v3 = vpop.f32.mrb[29].mxu0 }
 0x241   : > { %v6507_v58 = vadd.f32 %v6461_v10, %v6269_v23  ;;  %v2808_v22 = vpop.f32.mrb[29].mxu1  ;;  %v6462_v59 = vpop.f32.mrb[30].mxu0 }
 0x242   : > { %v5118_v19 = vadd.f32 %v5117_v50, %v5087_v39  ;;  %v6508_v52 = vadd.f32 %v4945_v3, %v2808_v22  ;;  %v5050_v15 = vadd.f32 %v6505_v41, %v5049_v11  ;;  %v6270_v43 = vpop.f32.mrb[30].mxu1  ;;  %v4948_v38 = vpop.f32.mrb[31].mxu0 }
 0x243   : > { %5022 = vst [vmem:[%s8748_s8 + $0xf0] sm:$0xff] %v6507_v58  ;;  %v6509_v56 = vadd.f32 %v6462_v59, %v6270_v43  ;;  %v2811_v1 = vpop.f32.mrb[31].mxu1  ;;  %v5091_v57 = vmul.f32 %v6507_v58, %v6507_v58 }
 0x244   : > { %5020 = vst [vmem:[%s8748_s8 + $0xe0] sm:$0xff] %v6508_v52  ;;  %v5051_v31 = vadd.f32 %v6508_v52, %v5050_v15  ;;  %v5089_v63 = vmul.f32 %v6508_v52, %v6508_v52  ;;  %v5119_v20 = vadd.f32 %v5118_v19, %v5088_v30  ;;  %v6510_v29 = vadd.f32 %v4948_v38, %v2811_v1 }
 0x245   : > { %5023 = vst [vmem:[%s8748_s8 + $0xf8] sm:$0xff] %v6509_v56  ;;  %v5092_v25 = vmul.f32 %v6509_v56, %v6509_v56 }
 0x246   : > { %v5120_v44 = vadd.f32 %v5119_v20, %v5089_v63  ;;  %5021 = vst [vmem:[%s8748_s8 + $0xe8] sm:$0xff] %v6510_v29  ;;  %v5052_v35 = vadd.f32 %v6510_v29, %v5051_v31  ;;  %v5090_v4 = vmul.f32 %v6510_v29, %v6510_v29 }
 0x248   : > { %v5053_v53 = vadd.f32 %v6507_v58, %v5052_v35  ;;  %v5121_v7 = vadd.f32 %v5120_v44, %v5090_v4 }
 0x24a   : > { %v5054_v16 = vadd.f32 %v6509_v56, %v5053_v53  ;;  %v5122_v54 = vadd.f32 %v5121_v7, %v5091_v57 }
 0x24c   : > { %v5055_v13 = vrot.slane %v5054_v16, 4  ;;  %v5123_v60 = vadd.f32 %v5122_v54, %v5092_v25 }
 0x24e   : > { %v5056_v0 = vadd.f32 %v5055_v13, %v5054_v16  ;;  %v5124_v27 = vrot.slane %v5123_v60, 4 }
 0x250   : > { %v5057_v46 = vrot.slane %v5056_v0, 2  ;;  %v5125_v2 = vadd.f32 %v5124_v27, %v5123_v60 }
 0x252   : > { %v5058_v42 = vadd.f32 %v5057_v46, %v5056_v0  ;;  %v5126_v55 = vrot.slane %v5125_v2, 2 }
 0x254   : > { %v5059_v49 = vrot.slane %v5058_v42, 1  ;;  %v5127_v28 = vadd.f32 %v5126_v55, %v5125_v2 }
 0x256   : > { %v5128_v17 = vrot.slane %v5127_v28, 1  ;;  %v5060_v24 = vadd.f32 %v5059_v49, %v5058_v42 }
 0x258   : > { %v5129_v40 = vadd.f32 %v5128_v17, %v5127_v28 }
 0x25a   : > { %v5131_v21 = vsel %vm5130_vm6, %v5060_v24, %v5129_v40 }
 0x25b   : > { %5132 = vst [vmem:[%s181_s15] sm:$0x3] %v5131_v21 }
 0x25c PF: > { %s14_s12 = sadd.s32 1, %s6940_s12  }
 0x25d   : > { %p11_p4 = scmp.ge.s32.totalorder %s14_s12, 4  }
 0x25f   :  { %13 = sbr.rel (!%p11_p4) target bundleno = 1 (0x1), region = 80 }

</bundles_post_ra>
